<compile_context>
chip_gen: v7x
topology: tpu7x:2x2x1
jax: 0.10.0
libtpu: 0.0.40
codegen_flags: <defaults>
</compile_context>

<pallas_src>
import functools
import numpy as np
import jax
import jax.numpy as jnp
from jax import lax
from jax.experimental import pallas as pl
from jax.experimental.pallas import tpu as pltpu


NETWORK_PARAMS = {
    "input_shape": (2, 16, 16),   # (C, H, W)
    "Nhid": [4],
    "kernel_size": [3],
    "stride": [1],
    "pool_size": [2],
    "Mhid": [32],
    "out_channels": 10,
    "delay": False,
    "analog_readout": False,
}
NEURON_PARAMS = {
    "threshold": 1.25,
    "current_decay": 0.25,
    "voltage_decay": 0.03,
    "quantize": False,
}

_LANE = 128


def _round_up(n, m):
    return ((n + m - 1) // m) * m


def _pick_b_tile(B, T):
    """Batch tile so the synapse matmuls have M = B_TILE*T ~ 256 rows (fills the
    v6e/v7x 256-tall MXU; >=128 also saturates v5e), while keeping >=2 grid
    steps when the batch allows it so v7x's two TensorCores both get work."""
    bt = max(1, min(B, max(1, 256 // max(T, 1))))
    if B > 1 and -(-B // bt) < 2:       # would leave a length-1 grid
        bt = max(1, -(-B // 2))
    return bt


# ---------------------------------------------------------------------------
# Fused whole-network kernel (one grid step = one B_TILE batch slab)
# ---------------------------------------------------------------------------
def _make_lava_kernel(T, b_tile, neuron_params):
    threshold = float(neuron_params["threshold"])
    c_keep = 1.0 - float(neuron_params["current_decay"])
    v_keep = 1.0 - float(neuron_params["voltage_decay"])
    BT = b_tile
    M = T * BT

    def run_cuba(z_ref, s_ref, delayed):
        """CUBA LIF recurrence over T steps of z_ref ((T*BT, F) f32, time-major).

        Binary spikes are written to s_ref rows [t*BT + off : (t+1)*BT + off).
        For delayed blocks off = BT and rows [0:BT) were pre-zeroed, so a
        downstream read of rows [0:T*BT) sees the 1-step delay-shifted train
        (the spike produced at t = T-1 lands in the trailing BT rows and is
        intentionally never read — 1-step axonal delay semantics).
        """
        F = z_ref.shape[-1]
        off = BT if delayed else 0
        # Lane-chunk so the (BT, fc) f32 current/voltage carries stay within a
        # few vregs (no spilling) even for large batch tiles.
        fc = _LANE
        while fc * 2 <= F and F % (fc * 2) == 0 and BT * fc * 2 <= 8 * 1024:
            fc *= 2
        for c in range(F // fc):
            c0, c1 = c * fc, (c + 1) * fc
            cur = jnp.zeros((BT, fc), jnp.float32)
            vol = jnp.zeros((BT, fc), jnp.float32)
            for t in range(T):                      # T is small & static: full unroll,
                r0 = t * BT                         # all ref slices are static.
                cur = cur * c_keep + z_ref[r0:r0 + BT, c0:c1]
                vol = vol * v_keep + cur
                spk = (vol >= threshold).astype(jnp.float32)
                s_ref[r0 + off:r0 + off + BT, c0:c1] = spk.astype(s_ref.dtype)
                vol = vol * (1.0 - spk)             # carried voltage resets on spike

    def kernel(x_ref, wc_ref, wp_ref, w1_ref, w2_ref, out_ref,
               z0, s0, z1, s1, z2, s2, z3):
        f32 = jnp.float32

        # Block 0: Conv synapse (Toeplitz matmul, bf16 MXU) + CUBA, delay_shift=True.
        z0[...] = jnp.dot(x_ref[...], wc_ref[...], preferred_element_type=f32)
        s0[0:BT, :] = jnp.zeros((BT, s0.shape[-1]), s0.dtype)
        run_cuba(z0, s0, delayed=True)

        # Block 1: Pool synapse (constant 0/1 sum-pool matrix) + CUBA, delay_shift=False.
        z1[...] = jnp.dot(s0[0:M, :], wp_ref[...], preferred_element_type=f32)
        run_cuba(z1, s1, delayed=False)

        # Block 2: Dense hidden (lane-padded to 128) + CUBA, delay_shift=True.
        z2[...] = jnp.dot(s1[...], w1_ref[...], preferred_element_type=f32)
        s2[0:BT, :] = jnp.zeros((BT, s2.shape[-1]), s2.dtype)
        run_cuba(z2, s2, delayed=True)

        # Block 3: Dense output (lane-padded) + CUBA, delay_shift=False; spikes -> output.
        z3[...] = jnp.dot(s2[0:M, :], w2_ref[...], preferred_element_type=f32)
        run_cuba(z3, out_ref, delayed=False)

    return kernel


# ---------------------------------------------------------------------------
# Host-side weight preparation (tiny, one-time; no activation-sized glue)
# ---------------------------------------------------------------------------
def _build_conv_matrix(w_conv, H, W, stride, pad):
    """Conv2d(zero-pad) as a dense (Cin*H*W, Cout*Ho*Wo) bf16 matrix.

    Input/output feature order is (c, h, w) — exactly the per-timestep conv in
    the PyTorch model (row-major flatten of (C, H, W))."""
    Cout, Cin, kh, kw = w_conv.shape
    Ho = (H + 2 * pad - kh) // stride + 1
    Wo = (W + 2 * pad - kw) // stride + 1
    co, ci, dh, dw, oh, ow = np.meshgrid(
        np.arange(Cout), np.arange(Cin), np.arange(kh), np.arange(kw),
        np.arange(Ho), np.arange(Wo), indexing="ij")
    ih = oh * stride + dh - pad
    iw = ow * stride + dw - pad
    valid = (ih >= 0) & (ih < H) & (iw >= 0) & (iw < W)
    rows = (ci * H * W + ih * W + iw)[valid]
    cols = (co * Ho * Wo + oh * Wo + ow)[valid]
    src = (((co * Cin + ci) * kh + dh) * kw + dw)[valid]
    mat = jnp.zeros((Cin * H * W, Cout * Ho * Wo), jnp.float32)
    mat = mat.at[rows, cols].add(w_conv.reshape(-1)[src])
    return mat.astype(jnp.bfloat16), Ho, Wo


def _build_pool_matrix(C, H, W, p):
    """Per-channel p x p sum pooling as a constant 0/1 (C*H*W, C*(H//p)*(W//p)) matrix."""
    # TODO(synk): lava-dl Pool synapse weight/weight_scale convention assumed = 1.0 (sum pool).
    Ho, Wo = H // p, W // p
    c, h, w = np.meshgrid(np.arange(C), np.arange(H), np.arange(W), indexing="ij")
    valid = (h // p < Ho) & (w // p < Wo)
    rows = (c * H * W + h * W + w)[valid]
    cols = (c * Ho * Wo + (h // p) * Wo + (w // p))[valid]
    m = np.zeros((C * H * W, C * Ho * Wo), np.float32)
    m[rows, cols] = 1.0
    return jnp.asarray(m, jnp.bfloat16), Ho, Wo


# ---------------------------------------------------------------------------
# LavaNet forward
# ---------------------------------------------------------------------------
def init_weights(key):
    C, H, W = NETWORK_PARAMS["input_shape"]
    Nhid = NETWORK_PARAMS["Nhid"][0]
    ks = NETWORK_PARAMS["kernel_size"][0]
    ps = NETWORK_PARAMS["pool_size"][0]
    mlp_in = Nhid * (H // ps) * (W // ps)
    Mhid = NETWORK_PARAMS["Mhid"][0]
    out_ch = NETWORK_PARAMS["out_channels"]
    k1, k2, k3 = jax.random.split(key, 3)
    return {
        "w_conv": jax.random.normal(k1, (Nhid, C, ks, ks), jnp.float32) * 0.5,
        "w_fc1": jax.random.normal(k2, (Mhid, mlp_in), jnp.float32) * (3.0 / np.sqrt(mlp_in)),
        "w_out": jax.random.normal(k3, (out_ch, Mhid), jnp.float32) * (3.0 / np.sqrt(Mhid)),
    }


def lava_net_forward(spike, weights, b_tile=None):
    """spike: (B, T, C, H, W) -> output spikes (B, out_channels, T)."""
    B, T, C, H, W = spike.shape
    ks = NETWORK_PARAMS["kernel_size"][0]
    stride = NETWORK_PARAMS["stride"][0]
    pad = (ks - 1) // 2
    ps = NETWORK_PARAMS["pool_size"][0]
    n_hid = NETWORK_PARAMS["Mhid"][0]
    n_out = NETWORK_PARAMS["out_channels"]

    if b_tile is None:
        b_tile = _pick_b_tile(B, T)
    G = -(-B // b_tile)
    Bp = G * b_tile
    if Bp != B:                      # zero-pad batch; padded rows produce no spikes
        spike = jnp.pad(spike, ((0, Bp - B), (0, 0), (0, 0), (0, 0), (0, 0)))

    f_in = C * H * W
    # PyTorch does spike.permute(0,2,3,4,1) and convolves each time step over
    # (C,H,W); here that is a per-(b,t) row of length C*H*W.  Rows are laid out
    # time-major WITHIN each batch tile (row = t*b_tile + b) so every CUBA step
    # touches one contiguous (b_tile, F) slab and every synapse matmul sees
    # M = T*b_tile rows.  The permute is a one-time XLA op on the host side.
    x = (spike.reshape(G, b_tile, T, f_in)
              .transpose(0, 2, 1, 3)
              .reshape(G, T * b_tile, f_in)
              .astype(jnp.bfloat16))

    wc, Ho, Wo = _build_conv_matrix(weights["w_conv"], H, W, stride, pad)
    Cout = weights["w_conv"].shape[0]
    wp, Hp, Wp = _build_pool_matrix(Cout, Ho, Wo, ps)
    f_conv = Cout * Ho * Wo
    f_pool = Cout * Hp * Wp

    # Lane-pad the two narrow dense layers to 128: padded lanes receive zero
    # current -> never spike -> sliced off on host.  Keeps all spike/voltage
    # buffers and the output writeback lane-dense (no masked partial stores).
    hid_pad = _round_up(n_hid, _LANE)
    out_pad = _round_up(n_out, _LANE)
    w1 = jnp.zeros((f_pool, hid_pad), jnp.float32).at[:, :n_hid].set(
        weights["w_fc1"].T).astype(jnp.bfloat16)
    w2 = jnp.zeros((hid_pad, out_pad), jnp.float32).at[:n_hid, :n_out].set(
        weights["w_out"].T).astype(jnp.bfloat16)

    M = T * b_tile
    kernel = _make_lava_kernel(T, b_tile, NEURON_PARAMS)
    out = pl.pallas_call(
        kernel,
        grid=(G,),
        in_specs=[
            pl.BlockSpec((None, M, f_in), lambda g: (g, 0, 0)),    # per-tile input spikes
            pl.BlockSpec((f_in, f_conv), lambda g: (0, 0)),        # conv Toeplitz (resident)
            pl.BlockSpec((f_conv, f_pool), lambda g: (0, 0)),      # pool matrix (resident)
            pl.BlockSpec((f_pool, hid_pad), lambda g: (0, 0)),     # fc1 (lane-padded)
            pl.BlockSpec((hid_pad, out_pad), lambda g: (0, 0)),    # fc out (lane-padded)
        ],
        out_specs=pl.BlockSpec((None, M, out_pad), lambda g: (g, 0, 0)),
        out_shape=jax.ShapeDtypeStruct((G, M, out_pad), jnp.float32),
        scratch_shapes=[
            pltpu.VMEM((M, f_conv), jnp.float32),             # z0 (conv synapse output)
            pltpu.VMEM((M + b_tile, f_conv), jnp.bfloat16),   # s0 spikes (rows 0:BT = delay zero)
            pltpu.VMEM((M, f_pool), jnp.float32),             # z1
            pltpu.VMEM((M, f_pool), jnp.bfloat16),            # s1 spikes
            pltpu.VMEM((M, hid_pad), jnp.float32),            # z2
            pltpu.VMEM((M + b_tile, hid_pad), jnp.bfloat16),  # s2 spikes (delayed)
            pltpu.VMEM((M, out_pad), jnp.float32),            # z3
        ],
        compiler_params=pltpu.CompilerParams(
            dimension_semantics=("parallel",),      # batch tiles across TCs (v7x: 2 cores)
            vmem_limit_bytes=32 * 1024 * 1024,      # few-MiB working set even at B_TILE=32
        ),
    )(x, wc, wp, w1, w2)

    # (G, T*b_tile, out_pad) -> (B, T, n_out) -> (B, out_channels, T)  (lava-dl NCT output)
    out = (out.reshape(G, T, b_tile, out_pad)
              .transpose(0, 2, 1, 3)
              .reshape(Bp, T, out_pad)[:B, :, :n_out])
    # TODO(synk): learnable axonal delays / quantized pre_hook_fx not modeled
    # (delay=False, quantize=False in this config).
    return jnp.transpose(out, (0, 2, 1))


if __name__ == "__main__":
    key = jax.random.PRNGKey(0)
    k_w, k_x = jax.random.split(key)
    weights = init_weights(k_w)

    B, T = 8, 8
    C, H, W = NETWORK_PARAMS["input_shape"]
    spike_in = jax.random.bernoulli(k_x, p=0.3, shape=(B, T, C, H, W)).astype(jnp.float32)

    fwd = jax.jit(functools.partial(lava_net_forward, weights=weights))
    out = jax.block_until_ready(fwd(spike_in))

    assert out.shape == (B, NETWORK_PARAMS["out_channels"], T), out.shape
    assert bool(jnp.isfinite(out).all())
    assert bool(jnp.all((out == 0.0) | (out == 1.0)))   # outputs are binary spikes
    print("KERNEL_OK")
</pallas_src>

<mosaic_0001>
module attributes {stable_mosaic.version = 11 : i64} {
  func.func @kernel(%arg0: i32, %arg1: memref<1x32x512xbf16, #tpu.memory_space<vmem>>, %arg2: memref<512x1024xbf16, #tpu.memory_space<vmem>>, %arg3: memref<1024x256xbf16, #tpu.memory_space<vmem>>, %arg4: memref<256x128xbf16, #tpu.memory_space<vmem>>, %arg5: memref<128x128xbf16, #tpu.memory_space<vmem>>, %arg6: memref<1x32x128xf32, #tpu.memory_space<vmem>>, %arg7: memref<32x1024xf32, #tpu.memory_space<vmem>>, %arg8: memref<36x1024xbf16, #tpu.memory_space<vmem>>, %arg9: memref<32x256xf32, #tpu.memory_space<vmem>>, %arg10: memref<32x256xbf16, #tpu.memory_space<vmem>>, %arg11: memref<32x128xf32, #tpu.memory_space<vmem>>, %arg12: memref<36x128xbf16, #tpu.memory_space<vmem>>, %arg13: memref<32x128xf32, #tpu.memory_space<vmem>>) attributes {dimension_semantics = [#tpu.dimension_semantics<parallel>], iteration_bounds = array<i64: 2>, scalar_prefetch = 0 : i64, scratch_operands = 7 : i64, tpu.core_type = #tpu.core_type<tc>, window_params = [{transform_indices = @transform_0, window_bounds = array<i64: 1, 32, 512>}, {pipeline_mode = #tpu.pipeline_mode<synchronous>, transform_indices = @transform_1, window_bounds = array<i64: 512, 1024>}, {pipeline_mode = #tpu.pipeline_mode<synchronous>, transform_indices = @transform_2, window_bounds = array<i64: 1024, 256>}, {pipeline_mode = #tpu.pipeline_mode<synchronous>, transform_indices = @transform_3, window_bounds = array<i64: 256, 128>}, {pipeline_mode = #tpu.pipeline_mode<synchronous>, transform_indices = @transform_4, window_bounds = array<i64: 128, 128>}, {transform_indices = @transform_5, window_bounds = array<i64: 1, 32, 128>}]} {
    %c0 = arith.constant 0 : index
    %c0_0 = arith.constant 0 : index
    %c0_1 = arith.constant 0 : index
    %0 = vector.load %arg1[%c0, %c0_0, %c0_1] : memref<1x32x512xbf16, #tpu.memory_space<vmem>>, vector<1x32x512xbf16>
    %1 = vector.shape_cast %0 : vector<1x32x512xbf16> to vector<32x512xbf16>
    %c0_2 = arith.constant 0 : index
    %c0_3 = arith.constant 0 : index
    %2 = vector.load %arg2[%c0_2, %c0_3] : memref<512x1024xbf16, #tpu.memory_space<vmem>>, vector<512x1024xbf16>
    %cst = arith.constant dense<0.000000e+00> : vector<32x1024xf32>
    %3 = tpu.matmul %1, %2, %cst {dimension_numbers = #tpu.dot_dimension_numbers<[1], [0], [0], [1], [0, 0, 1, 1], [], []>} : vector<32x512xbf16>, vector<512x1024xbf16>, vector<32x1024xf32> -> vector<32x1024xf32>
    %c0_4 = arith.constant 0 : index
    %c0_5 = arith.constant 0 : index
    %4 = vector.load %arg7[%c0_4, %c0_5] : memref<32x1024xf32, #tpu.memory_space<vmem>>, vector<32x1024xf32>
    tpu.vector_store %arg7[%c0_4, %c0_5], %3 {strides = array<i32>} : memref<32x1024xf32, #tpu.memory_space<vmem>>, vector<32x1024xf32>,
    %cst_6 = arith.constant 0.000000e+00 : bf16
    %5 = vector.broadcast %cst_6 : bf16 to vector<4x1024xbf16>
    %c0_7 = arith.constant 0 : index
    %c0_8 = arith.constant 0 : index
    %6 = vector.load %arg8[%c0_7, %c0_8] : memref<36x1024xbf16, #tpu.memory_space<vmem>>, vector<4x1024xbf16>
    tpu.vector_store %arg8[%c0_7, %c0_8], %5 {strides = array<i32>} : memref<36x1024xbf16, #tpu.memory_space<vmem>>, vector<4x1024xbf16>,
    %cst_9 = arith.constant 0.000000e+00 : f32
    %7 = vector.broadcast %cst_9 : f32 to vector<4x1024xf32>
    %cst_10 = arith.constant 0.000000e+00 : f32
    %8 = vector.broadcast %cst_10 : f32 to vector<4x1024xf32>
    %cst_11 = arith.constant 7.500000e-01 : f32
    %9 = vector.broadcast %cst_11 : f32 to vector<4x1024xf32>
    %10 = arith.mulf %7, %9 : vector<4x1024xf32>
    %c0_12 = arith.constant 0 : index
    %c0_13 = arith.constant 0 : index
    %11 = vector.load %arg7[%c0_12, %c0_13] : memref<32x1024xf32, #tpu.memory_space<vmem>>, vector<4x1024xf32>
    %12 = arith.addf %10, %11 : vector<4x1024xf32>
    %cst_14 = arith.constant 9.700000e-01 : f32
    %13 = vector.broadcast %cst_14 : f32 to vector<4x1024xf32>
    %14 = arith.mulf %8, %13 : vector<4x1024xf32>
    %15 = arith.addf %14, %12 : vector<4x1024xf32>
    %cst_15 = arith.constant 1.250000e+00 : f32
    %16 = vector.broadcast %cst_15 : f32 to vector<4x1024xf32>
    %17 = arith.cmpf oge, %15, %16 : vector<4x1024xf32>
    %18 = arith.extui %17 : vector<4x1024xi1> to vector<4x1024xi32>
    %19 = arith.sitofp %18 : vector<4x1024xi32> to vector<4x1024xf32>
    %20 = arith.truncf %19 : vector<4x1024xf32> to vector<4x1024xbf16>
    %c4 = arith.constant 4 : index
    %c0_16 = arith.constant 0 : index
    %21 = vector.load %arg8[%c4, %c0_16] : memref<36x1024xbf16, #tpu.memory_space<vmem>>, vector<4x1024xbf16>
    tpu.vector_store %arg8[%c4, %c0_16], %20 {strides = array<i32>} : memref<36x1024xbf16, #tpu.memory_space<vmem>>, vector<4x1024xbf16>,
    %cst_17 = arith.constant 1.000000e+00 : f32
    %22 = vector.broadcast %cst_17 : f32 to vector<4x1024xf32>
    %23 = arith.subf %22, %19 : vector<4x1024xf32>
    %24 = arith.mulf %15, %23 : vector<4x1024xf32>
    %cst_18 = arith.constant 7.500000e-01 : f32
    %25 = vector.broadcast %cst_18 : f32 to vector<4x1024xf32>
    %26 = arith.mulf %12, %25 : vector<4x1024xf32>
    %c4_19 = arith.constant 4 : index
    %c0_20 = arith.constant 0 : index
    %27 = vector.load %arg7[%c4_19, %c0_20] : memref<32x1024xf32, #tpu.memory_space<vmem>>, vector<4x1024xf32>
    %28 = arith.addf %26, %27 : vector<4x1024xf32>
    %cst_21 = arith.constant 9.700000e-01 : f32
    %29 = vector.broadcast %cst_21 : f32 to vector<4x1024xf32>
    %30 = arith.mulf %24, %29 : vector<4x1024xf32>
    %31 = arith.addf %30, %28 : vector<4x1024xf32>
    %cst_22 = arith.constant 1.250000e+00 : f32
    %32 = vector.broadcast %cst_22 : f32 to vector<4x1024xf32>
    %33 = arith.cmpf oge, %31, %32 : vector<4x1024xf32>
    %34 = arith.extui %33 : vector<4x1024xi1> to vector<4x1024xi32>
    %35 = arith.sitofp %34 : vector<4x1024xi32> to vector<4x1024xf32>
    %36 = arith.truncf %35 : vector<4x1024xf32> to vector<4x1024xbf16>
    %c8 = arith.constant 8 : index
    %c0_23 = arith.constant 0 : index
    %37 = vector.load %arg8[%c8, %c0_23] : memref<36x1024xbf16, #tpu.memory_space<vmem>>, vector<4x1024xbf16>
    tpu.vector_store %arg8[%c8, %c0_23], %36 {strides = array<i32>} : memref<36x1024xbf16, #tpu.memory_space<vmem>>, vector<4x1024xbf16>,
    %cst_24 = arith.constant 1.000000e+00 : f32
    %38 = vector.broadcast %cst_24 : f32 to vector<4x1024xf32>
    %39 = arith.subf %38, %35 : vector<4x1024xf32>
    %40 = arith.mulf %31, %39 : vector<4x1024xf32>
    %cst_25 = arith.constant 7.500000e-01 : f32
    %41 = vector.broadcast %cst_25 : f32 to vector<4x1024xf32>
    %42 = arith.mulf %28, %41 : vector<4x1024xf32>
    %c8_26 = arith.constant 8 : index
    %c0_27 = arith.constant 0 : index
    %43 = vector.load %arg7[%c8_26, %c0_27] : memref<32x1024xf32, #tpu.memory_space<vmem>>, vector<4x1024xf32>
    %44 = arith.addf %42, %43 : vector<4x1024xf32>
    %cst_28 = arith.constant 9.700000e-01 : f32
    %45 = vector.broadcast %cst_28 : f32 to vector<4x1024xf32>
    %46 = arith.mulf %40, %45 : vector<4x1024xf32>
    %47 = arith.addf %46, %44 : vector<4x1024xf32>
    %cst_29 = arith.constant 1.250000e+00 : f32
    %48 = vector.broadcast %cst_29 : f32 to vector<4x1024xf32>
    %49 = arith.cmpf oge, %47, %48 : vector<4x1024xf32>
    %50 = arith.extui %49 : vector<4x1024xi1> to vector<4x1024xi32>
    %51 = arith.sitofp %50 : vector<4x1024xi32> to vector<4x1024xf32>
    %52 = arith.truncf %51 : vector<4x1024xf32> to vector<4x1024xbf16>
    %c12 = arith.constant 12 : index
    %c0_30 = arith.constant 0 : index
    %53 = vector.load %arg8[%c12, %c0_30] : memref<36x1024xbf16, #tpu.memory_space<vmem>>, vector<4x1024xbf16>
    tpu.vector_store %arg8[%c12, %c0_30], %52 {strides = array<i32>} : memref<36x1024xbf16, #tpu.memory_space<vmem>>, vector<4x1024xbf16>,
    %cst_31 = arith.constant 1.000000e+00 : f32
    %54 = vector.broadcast %cst_31 : f32 to vector<4x1024xf32>
    %55 = arith.subf %54, %51 : vector<4x1024xf32>
    %56 = arith.mulf %47, %55 : vector<4x1024xf32>
    %cst_32 = arith.constant 7.500000e-01 : f32
    %57 = vector.broadcast %cst_32 : f32 to vector<4x1024xf32>
    %58 = arith.mulf %44, %57 : vector<4x1024xf32>
    %c12_33 = arith.constant 12 : index
    %c0_34 = arith.constant 0 : index
    %59 = vector.load %arg7[%c12_33, %c0_34] : memref<32x1024xf32, #tpu.memory_space<vmem>>, vector<4x1024xf32>
    %60 = arith.addf %58, %59 : vector<4x1024xf32>
    %cst_35 = arith.constant 9.700000e-01 : f32
    %61 = vector.broadcast %cst_35 : f32 to vector<4x1024xf32>
    %62 = arith.mulf %56, %61 : vector<4x1024xf32>
    %63 = arith.addf %62, %60 : vector<4x1024xf32>
    %cst_36 = arith.constant 1.250000e+00 : f32
    %64 = vector.broadcast %cst_36 : f32 to vector<4x1024xf32>
    %65 = arith.cmpf oge, %63, %64 : vector<4x1024xf32>
    %66 = arith.extui %65 : vector<4x1024xi1> to vector<4x1024xi32>
    %67 = arith.sitofp %66 : vector<4x1024xi32> to vector<4x1024xf32>
    %68 = arith.truncf %67 : vector<4x1024xf32> to vector<4x1024xbf16>
    %c16 = arith.constant 16 : index
    %c0_37 = arith.constant 0 : index
    %69 = vector.load %arg8[%c16, %c0_37] : memref<36x1024xbf16, #tpu.memory_space<vmem>>, vector<4x1024xbf16>
    tpu.vector_store %arg8[%c16, %c0_37], %68 {strides = array<i32>} : memref<36x1024xbf16, #tpu.memory_space<vmem>>, vector<4x1024xbf16>,
    %cst_38 = arith.constant 1.000000e+00 : f32
    %70 = vector.broadcast %cst_38 : f32 to vector<4x1024xf32>
    %71 = arith.subf %70, %67 : vector<4x1024xf32>
    %72 = arith.mulf %63, %71 : vector<4x1024xf32>
    %cst_39 = arith.constant 7.500000e-01 : f32
    %73 = vector.broadcast %cst_39 : f32 to vector<4x1024xf32>
    %74 = arith.mulf %60, %73 : vector<4x1024xf32>
    %c16_40 = arith.constant 16 : index
    %c0_41 = arith.constant 0 : index
    %75 = vector.load %arg7[%c16_40, %c0_41] : memref<32x1024xf32, #tpu.memory_space<vmem>>, vector<4x1024xf32>
    %76 = arith.addf %74, %75 : vector<4x1024xf32>
    %cst_42 = arith.constant 9.700000e-01 : f32
    %77 = vector.broadcast %cst_42 : f32 to vector<4x1024xf32>
    %78 = arith.mulf %72, %77 : vector<4x1024xf32>
    %79 = arith.addf %78, %76 : vector<4x1024xf32>
    %cst_43 = arith.constant 1.250000e+00 : f32
    %80 = vector.broadcast %cst_43 : f32 to vector<4x1024xf32>
    %81 = arith.cmpf oge, %79, %80 : vector<4x1024xf32>
    %82 = arith.extui %81 : vector<4x1024xi1> to vector<4x1024xi32>
    %83 = arith.sitofp %82 : vector<4x1024xi32> to vector<4x1024xf32>
    %84 = arith.truncf %83 : vector<4x1024xf32> to vector<4x1024xbf16>
    %c20 = arith.constant 20 : index
    %c0_44 = arith.constant 0 : index
    %85 = vector.load %arg8[%c20, %c0_44] : memref<36x1024xbf16, #tpu.memory_space<vmem>>, vector<4x1024xbf16>
    tpu.vector_store %arg8[%c20, %c0_44], %84 {strides = array<i32>} : memref<36x1024xbf16, #tpu.memory_space<vmem>>, vector<4x1024xbf16>,
    %cst_45 = arith.constant 1.000000e+00 : f32
    %86 = vector.broadcast %cst_45 : f32 to vector<4x1024xf32>
    %87 = arith.subf %86, %83 : vector<4x1024xf32>
    %88 = arith.mulf %79, %87 : vector<4x1024xf32>
    %cst_46 = arith.constant 7.500000e-01 : f32
    %89 = vector.broadcast %cst_46 : f32 to vector<4x1024xf32>
    %90 = arith.mulf %76, %89 : vector<4x1024xf32>
    %c20_47 = arith.constant 20 : index
    %c0_48 = arith.constant 0 : index
    %91 = vector.load %arg7[%c20_47, %c0_48] : memref<32x1024xf32, #tpu.memory_space<vmem>>, vector<4x1024xf32>
    %92 = arith.addf %90, %91 : vector<4x1024xf32>
    %cst_49 = arith.constant 9.700000e-01 : f32
    %93 = vector.broadcast %cst_49 : f32 to vector<4x1024xf32>
    %94 = arith.mulf %88, %93 : vector<4x1024xf32>
    %95 = arith.addf %94, %92 : vector<4x1024xf32>
    %cst_50 = arith.constant 1.250000e+00 : f32
    %96 = vector.broadcast %cst_50 : f32 to vector<4x1024xf32>
    %97 = arith.cmpf oge, %95, %96 : vector<4x1024xf32>
    %98 = arith.extui %97 : vector<4x1024xi1> to vector<4x1024xi32>
    %99 = arith.sitofp %98 : vector<4x1024xi32> to vector<4x1024xf32>
    %100 = arith.truncf %99 : vector<4x1024xf32> to vector<4x1024xbf16>
    %c24 = arith.constant 24 : index
    %c0_51 = arith.constant 0 : index
    %101 = vector.load %arg8[%c24, %c0_51] : memref<36x1024xbf16, #tpu.memory_space<vmem>>, vector<4x1024xbf16>
    tpu.vector_store %arg8[%c24, %c0_51], %100 {strides = array<i32>} : memref<36x1024xbf16, #tpu.memory_space<vmem>>, vector<4x1024xbf16>,
    %cst_52 = arith.constant 1.000000e+00 : f32
    %102 = vector.broadcast %cst_52 : f32 to vector<4x1024xf32>
    %103 = arith.subf %102, %99 : vector<4x1024xf32>
    %104 = arith.mulf %95, %103 : vector<4x1024xf32>
    %cst_53 = arith.constant 7.500000e-01 : f32
    %105 = vector.broadcast %cst_53 : f32 to vector<4x1024xf32>
    %106 = arith.mulf %92, %105 : vector<4x1024xf32>
    %c24_54 = arith.constant 24 : index
    %c0_55 = arith.constant 0 : index
    %107 = vector.load %arg7[%c24_54, %c0_55] : memref<32x1024xf32, #tpu.memory_space<vmem>>, vector<4x1024xf32>
    %108 = arith.addf %106, %107 : vector<4x1024xf32>
    %cst_56 = arith.constant 9.700000e-01 : f32
    %109 = vector.broadcast %cst_56 : f32 to vector<4x1024xf32>
    %110 = arith.mulf %104, %109 : vector<4x1024xf32>
    %111 = arith.addf %110, %108 : vector<4x1024xf32>
    %cst_57 = arith.constant 1.250000e+00 : f32
    %112 = vector.broadcast %cst_57 : f32 to vector<4x1024xf32>
    %113 = arith.cmpf oge, %111, %112 : vector<4x1024xf32>
    %114 = arith.extui %113 : vector<4x1024xi1> to vector<4x1024xi32>
    %115 = arith.sitofp %114 : vector<4x1024xi32> to vector<4x1024xf32>
    %116 = arith.truncf %115 : vector<4x1024xf32> to vector<4x1024xbf16>
    %c28 = arith.constant 28 : index
    %c0_58 = arith.constant 0 : index
    %117 = vector.load %arg8[%c28, %c0_58] : memref<36x1024xbf16, #tpu.memory_space<vmem>>, vector<4x1024xbf16>
    tpu.vector_store %arg8[%c28, %c0_58], %116 {strides = array<i32>} : memref<36x1024xbf16, #tpu.memory_space<vmem>>, vector<4x1024xbf16>,
    %cst_59 = arith.constant 1.000000e+00 : f32
    %118 = vector.broadcast %cst_59 : f32 to vector<4x1024xf32>
    %119 = arith.subf %118, %115 : vector<4x1024xf32>
    %120 = arith.mulf %111, %119 : vector<4x1024xf32>
    %cst_60 = arith.constant 7.500000e-01 : f32
    %121 = vector.broadcast %cst_60 : f32 to vector<4x1024xf32>
    %122 = arith.mulf %108, %121 : vector<4x1024xf32>
    %c28_61 = arith.constant 28 : index
    %c0_62 = arith.constant 0 : index
    %123 = vector.load %arg7[%c28_61, %c0_62] : memref<32x1024xf32, #tpu.memory_space<vmem>>, vector<4x1024xf32>
    %124 = arith.addf %122, %123 : vector<4x1024xf32>
    %cst_63 = arith.constant 9.700000e-01 : f32
    %125 = vector.broadcast %cst_63 : f32 to vector<4x1024xf32>
    %126 = arith.mulf %120, %125 : vector<4x1024xf32>
    %127 = arith.addf %126, %124 : vector<4x1024xf32>
    %cst_64 = arith.constant 1.250000e+00 : f32
    %128 = vector.broadcast %cst_64 : f32 to vector<4x1024xf32>
    %129 = arith.cmpf oge, %127, %128 : vector<4x1024xf32>
    %130 = arith.extui %129 : vector<4x1024xi1> to vector<4x1024xi32>
    %131 = arith.sitofp %130 : vector<4x1024xi32> to vector<4x1024xf32>
    %132 = arith.truncf %131 : vector<4x1024xf32> to vector<4x1024xbf16>
    %c32 = arith.constant 32 : index
    %c0_65 = arith.constant 0 : index
    %133 = vector.load %arg8[%c32, %c0_65] : memref<36x1024xbf16, #tpu.memory_space<vmem>>, vector<4x1024xbf16>
    tpu.vector_store %arg8[%c32, %c0_65], %132 {strides = array<i32>} : memref<36x1024xbf16, #tpu.memory_space<vmem>>, vector<4x1024xbf16>,
    %c0_66 = arith.constant 0 : index
    %c0_67 = arith.constant 0 : index
    %134 = vector.load %arg8[%c0_66, %c0_67] : memref<36x1024xbf16, #tpu.memory_space<vmem>>, vector<32x1024xbf16>
    %c0_68 = arith.constant 0 : index
    %c0_69 = arith.constant 0 : index
    %135 = vector.load %arg3[%c0_68, %c0_69] : memref<1024x256xbf16, #tpu.memory_space<vmem>>, vector<1024x256xbf16>
    %cst_70 = arith.constant dense<0.000000e+00> : vector<32x256xf32>
    %136 = tpu.matmul %134, %135, %cst_70 {dimension_numbers = #tpu.dot_dimension_numbers<[1], [0], [0], [1], [0, 0, 1, 1], [], []>} : vector<32x1024xbf16>, vector<1024x256xbf16>, vector<32x256xf32> -> vector<32x256xf32>
    %c0_71 = arith.constant 0 : index
    %c0_72 = arith.constant 0 : index
    %137 = vector.load %arg9[%c0_71, %c0_72] : memref<32x256xf32, #tpu.memory_space<vmem>>, vector<32x256xf32>
    tpu.vector_store %arg9[%c0_71, %c0_72], %136 {strides = array<i32>} : memref<32x256xf32, #tpu.memory_space<vmem>>, vector<32x256xf32>,
    %cst_73 = arith.constant 0.000000e+00 : f32
    %138 = vector.broadcast %cst_73 : f32 to vector<4x256xf32>
    %cst_74 = arith.constant 0.000000e+00 : f32
    %139 = vector.broadcast %cst_74 : f32 to vector<4x256xf32>
    %cst_75 = arith.constant 7.500000e-01 : f32
    %140 = vector.broadcast %cst_75 : f32 to vector<4x256xf32>
    %141 = arith.mulf %138, %140 : vector<4x256xf32>
    %c0_76 = arith.constant 0 : index
    %c0_77 = arith.constant 0 : index
    %142 = vector.load %arg9[%c0_76, %c0_77] : memref<32x256xf32, #tpu.memory_space<vmem>>, vector<4x256xf32>
    %143 = arith.addf %141, %142 : vector<4x256xf32>
    %cst_78 = arith.constant 9.700000e-01 : f32
    %144 = vector.broadcast %cst_78 : f32 to vector<4x256xf32>
    %145 = arith.mulf %139, %144 : vector<4x256xf32>
    %146 = arith.addf %145, %143 : vector<4x256xf32>
    %cst_79 = arith.constant 1.250000e+00 : f32
    %147 = vector.broadcast %cst_79 : f32 to vector<4x256xf32>
    %148 = arith.cmpf oge, %146, %147 : vector<4x256xf32>
    %149 = arith.extui %148 : vector<4x256xi1> to vector<4x256xi32>
    %150 = arith.sitofp %149 : vector<4x256xi32> to vector<4x256xf32>
    %151 = arith.truncf %150 : vector<4x256xf32> to vector<4x256xbf16>
    %c0_80 = arith.constant 0 : index
    %c0_81 = arith.constant 0 : index
    %152 = vector.load %arg10[%c0_80, %c0_81] : memref<32x256xbf16, #tpu.memory_space<vmem>>, vector<4x256xbf16>
    tpu.vector_store %arg10[%c0_80, %c0_81], %151 {strides = array<i32>} : memref<32x256xbf16, #tpu.memory_space<vmem>>, vector<4x256xbf16>,
    %cst_82 = arith.constant 1.000000e+00 : f32
    %153 = vector.broadcast %cst_82 : f32 to vector<4x256xf32>
    %154 = arith.subf %153, %150 : vector<4x256xf32>
    %155 = arith.mulf %146, %154 : vector<4x256xf32>
    %cst_83 = arith.constant 7.500000e-01 : f32
    %156 = vector.broadcast %cst_83 : f32 to vector<4x256xf32>
    %157 = arith.mulf %143, %156 : vector<4x256xf32>
    %c4_84 = arith.constant 4 : index
    %c0_85 = arith.constant 0 : index
    %158 = vector.load %arg9[%c4_84, %c0_85] : memref<32x256xf32, #tpu.memory_space<vmem>>, vector<4x256xf32>
    %159 = arith.addf %157, %158 : vector<4x256xf32>
    %cst_86 = arith.constant 9.700000e-01 : f32
    %160 = vector.broadcast %cst_86 : f32 to vector<4x256xf32>
    %161 = arith.mulf %155, %160 : vector<4x256xf32>
    %162 = arith.addf %161, %159 : vector<4x256xf32>
    %cst_87 = arith.constant 1.250000e+00 : f32
    %163 = vector.broadcast %cst_87 : f32 to vector<4x256xf32>
    %164 = arith.cmpf oge, %162, %163 : vector<4x256xf32>
    %165 = arith.extui %164 : vector<4x256xi1> to vector<4x256xi32>
    %166 = arith.sitofp %165 : vector<4x256xi32> to vector<4x256xf32>
    %167 = arith.truncf %166 : vector<4x256xf32> to vector<4x256xbf16>
    %c4_88 = arith.constant 4 : index
    %c0_89 = arith.constant 0 : index
    %168 = vector.load %arg10[%c4_88, %c0_89] : memref<32x256xbf16, #tpu.memory_space<vmem>>, vector<4x256xbf16>
    tpu.vector_store %arg10[%c4_88, %c0_89], %167 {strides = array<i32>} : memref<32x256xbf16, #tpu.memory_space<vmem>>, vector<4x256xbf16>,
    %cst_90 = arith.constant 1.000000e+00 : f32
    %169 = vector.broadcast %cst_90 : f32 to vector<4x256xf32>
    %170 = arith.subf %169, %166 : vector<4x256xf32>
    %171 = arith.mulf %162, %170 : vector<4x256xf32>
    %cst_91 = arith.constant 7.500000e-01 : f32
    %172 = vector.broadcast %cst_91 : f32 to vector<4x256xf32>
    %173 = arith.mulf %159, %172 : vector<4x256xf32>
    %c8_92 = arith.constant 8 : index
    %c0_93 = arith.constant 0 : index
    %174 = vector.load %arg9[%c8_92, %c0_93] : memref<32x256xf32, #tpu.memory_space<vmem>>, vector<4x256xf32>
    %175 = arith.addf %173, %174 : vector<4x256xf32>
    %cst_94 = arith.constant 9.700000e-01 : f32
    %176 = vector.broadcast %cst_94 : f32 to vector<4x256xf32>
    %177 = arith.mulf %171, %176 : vector<4x256xf32>
    %178 = arith.addf %177, %175 : vector<4x256xf32>
    %cst_95 = arith.constant 1.250000e+00 : f32
    %179 = vector.broadcast %cst_95 : f32 to vector<4x256xf32>
    %180 = arith.cmpf oge, %178, %179 : vector<4x256xf32>
    %181 = arith.extui %180 : vector<4x256xi1> to vector<4x256xi32>
    %182 = arith.sitofp %181 : vector<4x256xi32> to vector<4x256xf32>
    %183 = arith.truncf %182 : vector<4x256xf32> to vector<4x256xbf16>
    %c8_96 = arith.constant 8 : index
    %c0_97 = arith.constant 0 : index
    %184 = vector.load %arg10[%c8_96, %c0_97] : memref<32x256xbf16, #tpu.memory_space<vmem>>, vector<4x256xbf16>
    tpu.vector_store %arg10[%c8_96, %c0_97], %183 {strides = array<i32>} : memref<32x256xbf16, #tpu.memory_space<vmem>>, vector<4x256xbf16>,
    %cst_98 = arith.constant 1.000000e+00 : f32
    %185 = vector.broadcast %cst_98 : f32 to vector<4x256xf32>
    %186 = arith.subf %185, %182 : vector<4x256xf32>
    %187 = arith.mulf %178, %186 : vector<4x256xf32>
    %cst_99 = arith.constant 7.500000e-01 : f32
    %188 = vector.broadcast %cst_99 : f32 to vector<4x256xf32>
    %189 = arith.mulf %175, %188 : vector<4x256xf32>
    %c12_100 = arith.constant 12 : index
    %c0_101 = arith.constant 0 : index
    %190 = vector.load %arg9[%c12_100, %c0_101] : memref<32x256xf32, #tpu.memory_space<vmem>>, vector<4x256xf32>
    %191 = arith.addf %189, %190 : vector<4x256xf32>
    %cst_102 = arith.constant 9.700000e-01 : f32
    %192 = vector.broadcast %cst_102 : f32 to vector<4x256xf32>
    %193 = arith.mulf %187, %192 : vector<4x256xf32>
    %194 = arith.addf %193, %191 : vector<4x256xf32>
    %cst_103 = arith.constant 1.250000e+00 : f32
    %195 = vector.broadcast %cst_103 : f32 to vector<4x256xf32>
    %196 = arith.cmpf oge, %194, %195 : vector<4x256xf32>
    %197 = arith.extui %196 : vector<4x256xi1> to vector<4x256xi32>
    %198 = arith.sitofp %197 : vector<4x256xi32> to vector<4x256xf32>
    %199 = arith.truncf %198 : vector<4x256xf32> to vector<4x256xbf16>
    %c12_104 = arith.constant 12 : index
    %c0_105 = arith.constant 0 : index
    %200 = vector.load %arg10[%c12_104, %c0_105] : memref<32x256xbf16, #tpu.memory_space<vmem>>, vector<4x256xbf16>
    tpu.vector_store %arg10[%c12_104, %c0_105], %199 {strides = array<i32>} : memref<32x256xbf16, #tpu.memory_space<vmem>>, vector<4x256xbf16>,
    %cst_106 = arith.constant 1.000000e+00 : f32
    %201 = vector.broadcast %cst_106 : f32 to vector<4x256xf32>
    %202 = arith.subf %201, %198 : vector<4x256xf32>
    %203 = arith.mulf %194, %202 : vector<4x256xf32>
    %cst_107 = arith.constant 7.500000e-01 : f32
    %204 = vector.broadcast %cst_107 : f32 to vector<4x256xf32>
    %205 = arith.mulf %191, %204 : vector<4x256xf32>
    %c16_108 = arith.constant 16 : index
    %c0_109 = arith.constant 0 : index
    %206 = vector.load %arg9[%c16_108, %c0_109] : memref<32x256xf32, #tpu.memory_space<vmem>>, vector<4x256xf32>
    %207 = arith.addf %205, %206 : vector<4x256xf32>
    %cst_110 = arith.constant 9.700000e-01 : f32
    %208 = vector.broadcast %cst_110 : f32 to vector<4x256xf32>
    %209 = arith.mulf %203, %208 : vector<4x256xf32>
    %210 = arith.addf %209, %207 : vector<4x256xf32>
    %cst_111 = arith.constant 1.250000e+00 : f32
    %211 = vector.broadcast %cst_111 : f32 to vector<4x256xf32>
    %212 = arith.cmpf oge, %210, %211 : vector<4x256xf32>
    %213 = arith.extui %212 : vector<4x256xi1> to vector<4x256xi32>
    %214 = arith.sitofp %213 : vector<4x256xi32> to vector<4x256xf32>
    %215 = arith.truncf %214 : vector<4x256xf32> to vector<4x256xbf16>
    %c16_112 = arith.constant 16 : index
    %c0_113 = arith.constant 0 : index
    %216 = vector.load %arg10[%c16_112, %c0_113] : memref<32x256xbf16, #tpu.memory_space<vmem>>, vector<4x256xbf16>
    tpu.vector_store %arg10[%c16_112, %c0_113], %215 {strides = array<i32>} : memref<32x256xbf16, #tpu.memory_space<vmem>>, vector<4x256xbf16>,
    %cst_114 = arith.constant 1.000000e+00 : f32
    %217 = vector.broadcast %cst_114 : f32 to vector<4x256xf32>
    %218 = arith.subf %217, %214 : vector<4x256xf32>
    %219 = arith.mulf %210, %218 : vector<4x256xf32>
    %cst_115 = arith.constant 7.500000e-01 : f32
    %220 = vector.broadcast %cst_115 : f32 to vector<4x256xf32>
    %221 = arith.mulf %207, %220 : vector<4x256xf32>
    %c20_116 = arith.constant 20 : index
    %c0_117 = arith.constant 0 : index
    %222 = vector.load %arg9[%c20_116, %c0_117] : memref<32x256xf32, #tpu.memory_space<vmem>>, vector<4x256xf32>
    %223 = arith.addf %221, %222 : vector<4x256xf32>
    %cst_118 = arith.constant 9.700000e-01 : f32
    %224 = vector.broadcast %cst_118 : f32 to vector<4x256xf32>
    %225 = arith.mulf %219, %224 : vector<4x256xf32>
    %226 = arith.addf %225, %223 : vector<4x256xf32>
    %cst_119 = arith.constant 1.250000e+00 : f32
    %227 = vector.broadcast %cst_119 : f32 to vector<4x256xf32>
    %228 = arith.cmpf oge, %226, %227 : vector<4x256xf32>
    %229 = arith.extui %228 : vector<4x256xi1> to vector<4x256xi32>
    %230 = arith.sitofp %229 : vector<4x256xi32> to vector<4x256xf32>
    %231 = arith.truncf %230 : vector<4x256xf32> to vector<4x256xbf16>
    %c20_120 = arith.constant 20 : index
    %c0_121 = arith.constant 0 : index
    %232 = vector.load %arg10[%c20_120, %c0_121] : memref<32x256xbf16, #tpu.memory_space<vmem>>, vector<4x256xbf16>
    tpu.vector_store %arg10[%c20_120, %c0_121], %231 {strides = array<i32>} : memref<32x256xbf16, #tpu.memory_space<vmem>>, vector<4x256xbf16>,
    %cst_122 = arith.constant 1.000000e+00 : f32
    %233 = vector.broadcast %cst_122 : f32 to vector<4x256xf32>
    %234 = arith.subf %233, %230 : vector<4x256xf32>
    %235 = arith.mulf %226, %234 : vector<4x256xf32>
    %cst_123 = arith.constant 7.500000e-01 : f32
    %236 = vector.broadcast %cst_123 : f32 to vector<4x256xf32>
    %237 = arith.mulf %223, %236 : vector<4x256xf32>
    %c24_124 = arith.constant 24 : index
    %c0_125 = arith.constant 0 : index
    %238 = vector.load %arg9[%c24_124, %c0_125] : memref<32x256xf32, #tpu.memory_space<vmem>>, vector<4x256xf32>
    %239 = arith.addf %237, %238 : vector<4x256xf32>
    %cst_126 = arith.constant 9.700000e-01 : f32
    %240 = vector.broadcast %cst_126 : f32 to vector<4x256xf32>
    %241 = arith.mulf %235, %240 : vector<4x256xf32>
    %242 = arith.addf %241, %239 : vector<4x256xf32>
    %cst_127 = arith.constant 1.250000e+00 : f32
    %243 = vector.broadcast %cst_127 : f32 to vector<4x256xf32>
    %244 = arith.cmpf oge, %242, %243 : vector<4x256xf32>
    %245 = arith.extui %244 : vector<4x256xi1> to vector<4x256xi32>
    %246 = arith.sitofp %245 : vector<4x256xi32> to vector<4x256xf32>
    %247 = arith.truncf %246 : vector<4x256xf32> to vector<4x256xbf16>
    %c24_128 = arith.constant 24 : index
    %c0_129 = arith.constant 0 : index
    %248 = vector.load %arg10[%c24_128, %c0_129] : memref<32x256xbf16, #tpu.memory_space<vmem>>, vector<4x256xbf16>
    tpu.vector_store %arg10[%c24_128, %c0_129], %247 {strides = array<i32>} : memref<32x256xbf16, #tpu.memory_space<vmem>>, vector<4x256xbf16>,
    %cst_130 = arith.constant 1.000000e+00 : f32
    %249 = vector.broadcast %cst_130 : f32 to vector<4x256xf32>
    %250 = arith.subf %249, %246 : vector<4x256xf32>
    %251 = arith.mulf %242, %250 : vector<4x256xf32>
    %cst_131 = arith.constant 7.500000e-01 : f32
    %252 = vector.broadcast %cst_131 : f32 to vector<4x256xf32>
    %253 = arith.mulf %239, %252 : vector<4x256xf32>
    %c28_132 = arith.constant 28 : index
    %c0_133 = arith.constant 0 : index
    %254 = vector.load %arg9[%c28_132, %c0_133] : memref<32x256xf32, #tpu.memory_space<vmem>>, vector<4x256xf32>
    %255 = arith.addf %253, %254 : vector<4x256xf32>
    %cst_134 = arith.constant 9.700000e-01 : f32
    %256 = vector.broadcast %cst_134 : f32 to vector<4x256xf32>
    %257 = arith.mulf %251, %256 : vector<4x256xf32>
    %258 = arith.addf %257, %255 : vector<4x256xf32>
    %cst_135 = arith.constant 1.250000e+00 : f32
    %259 = vector.broadcast %cst_135 : f32 to vector<4x256xf32>
    %260 = arith.cmpf oge, %258, %259 : vector<4x256xf32>
    %261 = arith.extui %260 : vector<4x256xi1> to vector<4x256xi32>
    %262 = arith.sitofp %261 : vector<4x256xi32> to vector<4x256xf32>
    %263 = arith.truncf %262 : vector<4x256xf32> to vector<4x256xbf16>
    %c28_136 = arith.constant 28 : index
    %c0_137 = arith.constant 0 : index
    %264 = vector.load %arg10[%c28_136, %c0_137] : memref<32x256xbf16, #tpu.memory_space<vmem>>, vector<4x256xbf16>
    tpu.vector_store %arg10[%c28_136, %c0_137], %263 {strides = array<i32>} : memref<32x256xbf16, #tpu.memory_space<vmem>>, vector<4x256xbf16>,
    %c0_138 = arith.constant 0 : index
    %c0_139 = arith.constant 0 : index
    %265 = vector.load %arg10[%c0_138, %c0_139] : memref<32x256xbf16, #tpu.memory_space<vmem>>, vector<32x256xbf16>
    %c0_140 = arith.constant 0 : index
    %c0_141 = arith.constant 0 : index
    %266 = vector.load %arg4[%c0_140, %c0_141] : memref<256x128xbf16, #tpu.memory_space<vmem>>, vector<256x128xbf16>
    %cst_142 = arith.constant dense<0.000000e+00> : vector<32x128xf32>
    %267 = tpu.matmul %265, %266, %cst_142 {dimension_numbers = #tpu.dot_dimension_numbers<[1], [0], [0], [1], [0, 0, 1, 1], [], []>} : vector<32x256xbf16>, vector<256x128xbf16>, vector<32x128xf32> -> vector<32x128xf32>
    %c0_143 = arith.constant 0 : index
    %c0_144 = arith.constant 0 : index
    %268 = vector.load %arg11[%c0_143, %c0_144] : memref<32x128xf32, #tpu.memory_space<vmem>>, vector<32x128xf32>
    tpu.vector_store %arg11[%c0_143, %c0_144], %267 {strides = array<i32>} : memref<32x128xf32, #tpu.memory_space<vmem>>, vector<32x128xf32>,
    %cst_145 = arith.constant 0.000000e+00 : bf16
    %269 = vector.broadcast %cst_145 : bf16 to vector<4x128xbf16>
    %c0_146 = arith.constant 0 : index
    %c0_147 = arith.constant 0 : index
    %270 = vector.load %arg12[%c0_146, %c0_147] : memref<36x128xbf16, #tpu.memory_space<vmem>>, vector<4x128xbf16>
    tpu.vector_store %arg12[%c0_146, %c0_147], %269 {strides = array<i32>} : memref<36x128xbf16, #tpu.memory_space<vmem>>, vector<4x128xbf16>,
    %cst_148 = arith.constant 0.000000e+00 : f32
    %271 = vector.broadcast %cst_148 : f32 to vector<4x128xf32>
    %cst_149 = arith.constant 0.000000e+00 : f32
    %272 = vector.broadcast %cst_149 : f32 to vector<4x128xf32>
    %cst_150 = arith.constant 7.500000e-01 : f32
    %273 = vector.broadcast %cst_150 : f32 to vector<4x128xf32>
    %274 = arith.mulf %271, %273 : vector<4x128xf32>
    %c0_151 = arith.constant 0 : index
    %c0_152 = arith.constant 0 : index
    %275 = vector.load %arg11[%c0_151, %c0_152] : memref<32x128xf32, #tpu.memory_space<vmem>>, vector<4x128xf32>
    %276 = arith.addf %274, %275 : vector<4x128xf32>
    %cst_153 = arith.constant 9.700000e-01 : f32
    %277 = vector.broadcast %cst_153 : f32 to vector<4x128xf32>
    %278 = arith.mulf %272, %277 : vector<4x128xf32>
    %279 = arith.addf %278, %276 : vector<4x128xf32>
    %cst_154 = arith.constant 1.250000e+00 : f32
    %280 = vector.broadcast %cst_154 : f32 to vector<4x128xf32>
    %281 = arith.cmpf oge, %279, %280 : vector<4x128xf32>
    %282 = arith.extui %281 : vector<4x128xi1> to vector<4x128xi32>
    %283 = arith.sitofp %282 : vector<4x128xi32> to vector<4x128xf32>
    %284 = arith.truncf %283 : vector<4x128xf32> to vector<4x128xbf16>
    %c4_155 = arith.constant 4 : index
    %c0_156 = arith.constant 0 : index
    %285 = vector.load %arg12[%c4_155, %c0_156] : memref<36x128xbf16, #tpu.memory_space<vmem>>, vector<4x128xbf16>
    tpu.vector_store %arg12[%c4_155, %c0_156], %284 {strides = array<i32>} : memref<36x128xbf16, #tpu.memory_space<vmem>>, vector<4x128xbf16>,
    %cst_157 = arith.constant 1.000000e+00 : f32
    %286 = vector.broadcast %cst_157 : f32 to vector<4x128xf32>
    %287 = arith.subf %286, %283 : vector<4x128xf32>
    %288 = arith.mulf %279, %287 : vector<4x128xf32>
    %cst_158 = arith.constant 7.500000e-01 : f32
    %289 = vector.broadcast %cst_158 : f32 to vector<4x128xf32>
    %290 = arith.mulf %276, %289 : vector<4x128xf32>
    %c4_159 = arith.constant 4 : index
    %c0_160 = arith.constant 0 : index
    %291 = vector.load %arg11[%c4_159, %c0_160] : memref<32x128xf32, #tpu.memory_space<vmem>>, vector<4x128xf32>
    %292 = arith.addf %290, %291 : vector<4x128xf32>
    %cst_161 = arith.constant 9.700000e-01 : f32
    %293 = vector.broadcast %cst_161 : f32 to vector<4x128xf32>
    %294 = arith.mulf %288, %293 : vector<4x128xf32>
    %295 = arith.addf %294, %292 : vector<4x128xf32>
    %cst_162 = arith.constant 1.250000e+00 : f32
    %296 = vector.broadcast %cst_162 : f32 to vector<4x128xf32>
    %297 = arith.cmpf oge, %295, %296 : vector<4x128xf32>
    %298 = arith.extui %297 : vector<4x128xi1> to vector<4x128xi32>
    %299 = arith.sitofp %298 : vector<4x128xi32> to vector<4x128xf32>
    %300 = arith.truncf %299 : vector<4x128xf32> to vector<4x128xbf16>
    %c8_163 = arith.constant 8 : index
    %c0_164 = arith.constant 0 : index
    %301 = vector.load %arg12[%c8_163, %c0_164] : memref<36x128xbf16, #tpu.memory_space<vmem>>, vector<4x128xbf16>
    tpu.vector_store %arg12[%c8_163, %c0_164], %300 {strides = array<i32>} : memref<36x128xbf16, #tpu.memory_space<vmem>>, vector<4x128xbf16>,
    %cst_165 = arith.constant 1.000000e+00 : f32
    %302 = vector.broadcast %cst_165 : f32 to vector<4x128xf32>
    %303 = arith.subf %302, %299 : vector<4x128xf32>
    %304 = arith.mulf %295, %303 : vector<4x128xf32>
    %cst_166 = arith.constant 7.500000e-01 : f32
    %305 = vector.broadcast %cst_166 : f32 to vector<4x128xf32>
    %306 = arith.mulf %292, %305 : vector<4x128xf32>
    %c8_167 = arith.constant 8 : index
    %c0_168 = arith.constant 0 : index
    %307 = vector.load %arg11[%c8_167, %c0_168] : memref<32x128xf32, #tpu.memory_space<vmem>>, vector<4x128xf32>
    %308 = arith.addf %306, %307 : vector<4x128xf32>
    %cst_169 = arith.constant 9.700000e-01 : f32
    %309 = vector.broadcast %cst_169 : f32 to vector<4x128xf32>
    %310 = arith.mulf %304, %309 : vector<4x128xf32>
    %311 = arith.addf %310, %308 : vector<4x128xf32>
    %cst_170 = arith.constant 1.250000e+00 : f32
    %312 = vector.broadcast %cst_170 : f32 to vector<4x128xf32>
    %313 = arith.cmpf oge, %311, %312 : vector<4x128xf32>
    %314 = arith.extui %313 : vector<4x128xi1> to vector<4x128xi32>
    %315 = arith.sitofp %314 : vector<4x128xi32> to vector<4x128xf32>
    %316 = arith.truncf %315 : vector<4x128xf32> to vector<4x128xbf16>
    %c12_171 = arith.constant 12 : index
    %c0_172 = arith.constant 0 : index
    %317 = vector.load %arg12[%c12_171, %c0_172] : memref<36x128xbf16, #tpu.memory_space<vmem>>, vector<4x128xbf16>
    tpu.vector_store %arg12[%c12_171, %c0_172], %316 {strides = array<i32>} : memref<36x128xbf16, #tpu.memory_space<vmem>>, vector<4x128xbf16>,
    %cst_173 = arith.constant 1.000000e+00 : f32
    %318 = vector.broadcast %cst_173 : f32 to vector<4x128xf32>
    %319 = arith.subf %318, %315 : vector<4x128xf32>
    %320 = arith.mulf %311, %319 : vector<4x128xf32>
    %cst_174 = arith.constant 7.500000e-01 : f32
    %321 = vector.broadcast %cst_174 : f32 to vector<4x128xf32>
    %322 = arith.mulf %308, %321 : vector<4x128xf32>
    %c12_175 = arith.constant 12 : index
    %c0_176 = arith.constant 0 : index
    %323 = vector.load %arg11[%c12_175, %c0_176] : memref<32x128xf32, #tpu.memory_space<vmem>>, vector<4x128xf32>
    %324 = arith.addf %322, %323 : vector<4x128xf32>
    %cst_177 = arith.constant 9.700000e-01 : f32
    %325 = vector.broadcast %cst_177 : f32 to vector<4x128xf32>
    %326 = arith.mulf %320, %325 : vector<4x128xf32>
    %327 = arith.addf %326, %324 : vector<4x128xf32>
    %cst_178 = arith.constant 1.250000e+00 : f32
    %328 = vector.broadcast %cst_178 : f32 to vector<4x128xf32>
    %329 = arith.cmpf oge, %327, %328 : vector<4x128xf32>
    %330 = arith.extui %329 : vector<4x128xi1> to vector<4x128xi32>
    %331 = arith.sitofp %330 : vector<4x128xi32> to vector<4x128xf32>
    %332 = arith.truncf %331 : vector<4x128xf32> to vector<4x128xbf16>
    %c16_179 = arith.constant 16 : index
    %c0_180 = arith.constant 0 : index
    %333 = vector.load %arg12[%c16_179, %c0_180] : memref<36x128xbf16, #tpu.memory_space<vmem>>, vector<4x128xbf16>
    tpu.vector_store %arg12[%c16_179, %c0_180], %332 {strides = array<i32>} : memref<36x128xbf16, #tpu.memory_space<vmem>>, vector<4x128xbf16>,
    %cst_181 = arith.constant 1.000000e+00 : f32
    %334 = vector.broadcast %cst_181 : f32 to vector<4x128xf32>
    %335 = arith.subf %334, %331 : vector<4x128xf32>
    %336 = arith.mulf %327, %335 : vector<4x128xf32>
    %cst_182 = arith.constant 7.500000e-01 : f32
    %337 = vector.broadcast %cst_182 : f32 to vector<4x128xf32>
    %338 = arith.mulf %324, %337 : vector<4x128xf32>
    %c16_183 = arith.constant 16 : index
    %c0_184 = arith.constant 0 : index
    %339 = vector.load %arg11[%c16_183, %c0_184] : memref<32x128xf32, #tpu.memory_space<vmem>>, vector<4x128xf32>
    %340 = arith.addf %338, %339 : vector<4x128xf32>
    %cst_185 = arith.constant 9.700000e-01 : f32
    %341 = vector.broadcast %cst_185 : f32 to vector<4x128xf32>
    %342 = arith.mulf %336, %341 : vector<4x128xf32>
    %343 = arith.addf %342, %340 : vector<4x128xf32>
    %cst_186 = arith.constant 1.250000e+00 : f32
    %344 = vector.broadcast %cst_186 : f32 to vector<4x128xf32>
    %345 = arith.cmpf oge, %343, %344 : vector<4x128xf32>
    %346 = arith.extui %345 : vector<4x128xi1> to vector<4x128xi32>
    %347 = arith.sitofp %346 : vector<4x128xi32> to vector<4x128xf32>
    %348 = arith.truncf %347 : vector<4x128xf32> to vector<4x128xbf16>
    %c20_187 = arith.constant 20 : index
    %c0_188 = arith.constant 0 : index
    %349 = vector.load %arg12[%c20_187, %c0_188] : memref<36x128xbf16, #tpu.memory_space<vmem>>, vector<4x128xbf16>
    tpu.vector_store %arg12[%c20_187, %c0_188], %348 {strides = array<i32>} : memref<36x128xbf16, #tpu.memory_space<vmem>>, vector<4x128xbf16>,
    %cst_189 = arith.constant 1.000000e+00 : f32
    %350 = vector.broadcast %cst_189 : f32 to vector<4x128xf32>
    %351 = arith.subf %350, %347 : vector<4x128xf32>
    %352 = arith.mulf %343, %351 : vector<4x128xf32>
    %cst_190 = arith.constant 7.500000e-01 : f32
    %353 = vector.broadcast %cst_190 : f32 to vector<4x128xf32>
    %354 = arith.mulf %340, %353 : vector<4x128xf32>
    %c20_191 = arith.constant 20 : index
    %c0_192 = arith.constant 0 : index
    %355 = vector.load %arg11[%c20_191, %c0_192] : memref<32x128xf32, #tpu.memory_space<vmem>>, vector<4x128xf32>
    %356 = arith.addf %354, %355 : vector<4x128xf32>
    %cst_193 = arith.constant 9.700000e-01 : f32
    %357 = vector.broadcast %cst_193 : f32 to vector<4x128xf32>
    %358 = arith.mulf %352, %357 : vector<4x128xf32>
    %359 = arith.addf %358, %356 : vector<4x128xf32>
    %cst_194 = arith.constant 1.250000e+00 : f32
    %360 = vector.broadcast %cst_194 : f32 to vector<4x128xf32>
    %361 = arith.cmpf oge, %359, %360 : vector<4x128xf32>
    %362 = arith.extui %361 : vector<4x128xi1> to vector<4x128xi32>
    %363 = arith.sitofp %362 : vector<4x128xi32> to vector<4x128xf32>
    %364 = arith.truncf %363 : vector<4x128xf32> to vector<4x128xbf16>
    %c24_195 = arith.constant 24 : index
    %c0_196 = arith.constant 0 : index
    %365 = vector.load %arg12[%c24_195, %c0_196] : memref<36x128xbf16, #tpu.memory_space<vmem>>, vector<4x128xbf16>
    tpu.vector_store %arg12[%c24_195, %c0_196], %364 {strides = array<i32>} : memref<36x128xbf16, #tpu.memory_space<vmem>>, vector<4x128xbf16>,
    %cst_197 = arith.constant 1.000000e+00 : f32
    %366 = vector.broadcast %cst_197 : f32 to vector<4x128xf32>
    %367 = arith.subf %366, %363 : vector<4x128xf32>
    %368 = arith.mulf %359, %367 : vector<4x128xf32>
    %cst_198 = arith.constant 7.500000e-01 : f32
    %369 = vector.broadcast %cst_198 : f32 to vector<4x128xf32>
    %370 = arith.mulf %356, %369 : vector<4x128xf32>
    %c24_199 = arith.constant 24 : index
    %c0_200 = arith.constant 0 : index
    %371 = vector.load %arg11[%c24_199, %c0_200] : memref<32x128xf32, #tpu.memory_space<vmem>>, vector<4x128xf32>
    %372 = arith.addf %370, %371 : vector<4x128xf32>
    %cst_201 = arith.constant 9.700000e-01 : f32
    %373 = vector.broadcast %cst_201 : f32 to vector<4x128xf32>
    %374 = arith.mulf %368, %373 : vector<4x128xf32>
    %375 = arith.addf %374, %372 : vector<4x128xf32>
    %cst_202 = arith.constant 1.250000e+00 : f32
    %376 = vector.broadcast %cst_202 : f32 to vector<4x128xf32>
    %377 = arith.cmpf oge, %375, %376 : vector<4x128xf32>
    %378 = arith.extui %377 : vector<4x128xi1> to vector<4x128xi32>
    %379 = arith.sitofp %378 : vector<4x128xi32> to vector<4x128xf32>
    %380 = arith.truncf %379 : vector<4x128xf32> to vector<4x128xbf16>
    %c28_203 = arith.constant 28 : index
    %c0_204 = arith.constant 0 : index
    %381 = vector.load %arg12[%c28_203, %c0_204] : memref<36x128xbf16, #tpu.memory_space<vmem>>, vector<4x128xbf16>
    tpu.vector_store %arg12[%c28_203, %c0_204], %380 {strides = array<i32>} : memref<36x128xbf16, #tpu.memory_space<vmem>>, vector<4x128xbf16>,
    %cst_205 = arith.constant 1.000000e+00 : f32
    %382 = vector.broadcast %cst_205 : f32 to vector<4x128xf32>
    %383 = arith.subf %382, %379 : vector<4x128xf32>
    %384 = arith.mulf %375, %383 : vector<4x128xf32>
    %cst_206 = arith.constant 7.500000e-01 : f32
    %385 = vector.broadcast %cst_206 : f32 to vector<4x128xf32>
    %386 = arith.mulf %372, %385 : vector<4x128xf32>
    %c28_207 = arith.constant 28 : index
    %c0_208 = arith.constant 0 : index
    %387 = vector.load %arg11[%c28_207, %c0_208] : memref<32x128xf32, #tpu.memory_space<vmem>>, vector<4x128xf32>
    %388 = arith.addf %386, %387 : vector<4x128xf32>
    %cst_209 = arith.constant 9.700000e-01 : f32
    %389 = vector.broadcast %cst_209 : f32 to vector<4x128xf32>
    %390 = arith.mulf %384, %389 : vector<4x128xf32>
    %391 = arith.addf %390, %388 : vector<4x128xf32>
    %cst_210 = arith.constant 1.250000e+00 : f32
    %392 = vector.broadcast %cst_210 : f32 to vector<4x128xf32>
    %393 = arith.cmpf oge, %391, %392 : vector<4x128xf32>
    %394 = arith.extui %393 : vector<4x128xi1> to vector<4x128xi32>
    %395 = arith.sitofp %394 : vector<4x128xi32> to vector<4x128xf32>
    %396 = arith.truncf %395 : vector<4x128xf32> to vector<4x128xbf16>
    %c32_211 = arith.constant 32 : index
    %c0_212 = arith.constant 0 : index
    %397 = vector.load %arg12[%c32_211, %c0_212] : memref<36x128xbf16, #tpu.memory_space<vmem>>, vector<4x128xbf16>
    tpu.vector_store %arg12[%c32_211, %c0_212], %396 {strides = array<i32>} : memref<36x128xbf16, #tpu.memory_space<vmem>>, vector<4x128xbf16>,
    %c0_213 = arith.constant 0 : index
    %c0_214 = arith.constant 0 : index
    %398 = vector.load %arg12[%c0_213, %c0_214] : memref<36x128xbf16, #tpu.memory_space<vmem>>, vector<32x128xbf16>
    %c0_215 = arith.constant 0 : index
    %c0_216 = arith.constant 0 : index
    %399 = vector.load %arg5[%c0_215, %c0_216] : memref<128x128xbf16, #tpu.memory_space<vmem>>, vector<128x128xbf16>
    %cst_217 = arith.constant dense<0.000000e+00> : vector<32x128xf32>
    %400 = tpu.matmul %398, %399, %cst_217 {dimension_numbers = #tpu.dot_dimension_numbers<[1], [0], [0], [1], [0, 0, 1, 1], [], []>} : vector<32x128xbf16>, vector<128x128xbf16>, vector<32x128xf32> -> vector<32x128xf32>
    %c0_218 = arith.constant 0 : index
    %c0_219 = arith.constant 0 : index
    %401 = vector.load %arg13[%c0_218, %c0_219] : memref<32x128xf32, #tpu.memory_space<vmem>>, vector<32x128xf32>
    tpu.vector_store %arg13[%c0_218, %c0_219], %400 {strides = array<i32>} : memref<32x128xf32, #tpu.memory_space<vmem>>, vector<32x128xf32>,
    %cst_220 = arith.constant 0.000000e+00 : f32
    %402 = vector.broadcast %cst_220 : f32 to vector<4x128xf32>
    %cst_221 = arith.constant 0.000000e+00 : f32
    %403 = vector.broadcast %cst_221 : f32 to vector<4x128xf32>
    %cst_222 = arith.constant 7.500000e-01 : f32
    %404 = vector.broadcast %cst_222 : f32 to vector<4x128xf32>
    %405 = arith.mulf %402, %404 : vector<4x128xf32>
    %c0_223 = arith.constant 0 : index
    %c0_224 = arith.constant 0 : index
    %406 = vector.load %arg13[%c0_223, %c0_224] : memref<32x128xf32, #tpu.memory_space<vmem>>, vector<4x128xf32>
    %407 = arith.addf %405, %406 : vector<4x128xf32>
    %cst_225 = arith.constant 9.700000e-01 : f32
    %408 = vector.broadcast %cst_225 : f32 to vector<4x128xf32>
    %409 = arith.mulf %403, %408 : vector<4x128xf32>
    %410 = arith.addf %409, %407 : vector<4x128xf32>
    %cst_226 = arith.constant 1.250000e+00 : f32
    %411 = vector.broadcast %cst_226 : f32 to vector<4x128xf32>
    %412 = arith.cmpf oge, %410, %411 : vector<4x128xf32>
    %413 = arith.extui %412 : vector<4x128xi1> to vector<4x128xi32>
    %414 = arith.sitofp %413 : vector<4x128xi32> to vector<4x128xf32>
    %c0_227 = arith.constant 0 : index
    %c0_228 = arith.constant 0 : index
    %c0_229 = arith.constant 0 : index
    %415 = vector.load %arg6[%c0_227, %c0_228, %c0_229] : memref<1x32x128xf32, #tpu.memory_space<vmem>>, vector<1x4x128xf32>
    %416 = vector.shape_cast %415 : vector<1x4x128xf32> to vector<4x128xf32>
    %417 = vector.shape_cast %414 : vector<4x128xf32> to vector<1x4x128xf32>
    tpu.vector_store %arg6[%c0_227, %c0_228, %c0_229], %417 {strides = array<i32>} : memref<1x32x128xf32, #tpu.memory_space<vmem>>, vector<1x4x128xf32>,
    %cst_230 = arith.constant 1.000000e+00 : f32
    %418 = vector.broadcast %cst_230 : f32 to vector<4x128xf32>
    %419 = arith.subf %418, %414 : vector<4x128xf32>
    %420 = arith.mulf %410, %419 : vector<4x128xf32>
    %cst_231 = arith.constant 7.500000e-01 : f32
    %421 = vector.broadcast %cst_231 : f32 to vector<4x128xf32>
    %422 = arith.mulf %407, %421 : vector<4x128xf32>
    %c4_232 = arith.constant 4 : index
    %c0_233 = arith.constant 0 : index
    %423 = vector.load %arg13[%c4_232, %c0_233] : memref<32x128xf32, #tpu.memory_space<vmem>>, vector<4x128xf32>
    %424 = arith.addf %422, %423 : vector<4x128xf32>
    %cst_234 = arith.constant 9.700000e-01 : f32
    %425 = vector.broadcast %cst_234 : f32 to vector<4x128xf32>
    %426 = arith.mulf %420, %425 : vector<4x128xf32>
    %427 = arith.addf %426, %424 : vector<4x128xf32>
    %cst_235 = arith.constant 1.250000e+00 : f32
    %428 = vector.broadcast %cst_235 : f32 to vector<4x128xf32>
    %429 = arith.cmpf oge, %427, %428 : vector<4x128xf32>
    %430 = arith.extui %429 : vector<4x128xi1> to vector<4x128xi32>
    %431 = arith.sitofp %430 : vector<4x128xi32> to vector<4x128xf32>
    %c0_236 = arith.constant 0 : index
    %c4_237 = arith.constant 4 : index
    %c0_238 = arith.constant 0 : index
    %432 = vector.load %arg6[%c0_236, %c4_237, %c0_238] : memref<1x32x128xf32, #tpu.memory_space<vmem>>, vector<1x4x128xf32>
    %433 = vector.shape_cast %432 : vector<1x4x128xf32> to vector<4x128xf32>
    %434 = vector.shape_cast %431 : vector<4x128xf32> to vector<1x4x128xf32>
    tpu.vector_store %arg6[%c0_236, %c4_237, %c0_238], %434 {strides = array<i32>} : memref<1x32x128xf32, #tpu.memory_space<vmem>>, vector<1x4x128xf32>,
    %cst_239 = arith.constant 1.000000e+00 : f32
    %435 = vector.broadcast %cst_239 : f32 to vector<4x128xf32>
    %436 = arith.subf %435, %431 : vector<4x128xf32>
    %437 = arith.mulf %427, %436 : vector<4x128xf32>
    %cst_240 = arith.constant 7.500000e-01 : f32
    %438 = vector.broadcast %cst_240 : f32 to vector<4x128xf32>
    %439 = arith.mulf %424, %438 : vector<4x128xf32>
    %c8_241 = arith.constant 8 : index
    %c0_242 = arith.constant 0 : index
    %440 = vector.load %arg13[%c8_241, %c0_242] : memref<32x128xf32, #tpu.memory_space<vmem>>, vector<4x128xf32>
    %441 = arith.addf %439, %440 : vector<4x128xf32>
    %cst_243 = arith.constant 9.700000e-01 : f32
    %442 = vector.broadcast %cst_243 : f32 to vector<4x128xf32>
    %443 = arith.mulf %437, %442 : vector<4x128xf32>
    %444 = arith.addf %443, %441 : vector<4x128xf32>
    %cst_244 = arith.constant 1.250000e+00 : f32
    %445 = vector.broadcast %cst_244 : f32 to vector<4x128xf32>
    %446 = arith.cmpf oge, %444, %445 : vector<4x128xf32>
    %447 = arith.extui %446 : vector<4x128xi1> to vector<4x128xi32>
    %448 = arith.sitofp %447 : vector<4x128xi32> to vector<4x128xf32>
    %c0_245 = arith.constant 0 : index
    %c8_246 = arith.constant 8 : index
    %c0_247 = arith.constant 0 : index
    %449 = vector.load %arg6[%c0_245, %c8_246, %c0_247] : memref<1x32x128xf32, #tpu.memory_space<vmem>>, vector<1x4x128xf32>
    %450 = vector.shape_cast %449 : vector<1x4x128xf32> to vector<4x128xf32>
    %451 = vector.shape_cast %448 : vector<4x128xf32> to vector<1x4x128xf32>
    tpu.vector_store %arg6[%c0_245, %c8_246, %c0_247], %451 {strides = array<i32>} : memref<1x32x128xf32, #tpu.memory_space<vmem>>, vector<1x4x128xf32>,
    %cst_248 = arith.constant 1.000000e+00 : f32
    %452 = vector.broadcast %cst_248 : f32 to vector<4x128xf32>
    %453 = arith.subf %452, %448 : vector<4x128xf32>
    %454 = arith.mulf %444, %453 : vector<4x128xf32>
    %cst_249 = arith.constant 7.500000e-01 : f32
    %455 = vector.broadcast %cst_249 : f32 to vector<4x128xf32>
    %456 = arith.mulf %441, %455 : vector<4x128xf32>
    %c12_250 = arith.constant 12 : index
    %c0_251 = arith.constant 0 : index
    %457 = vector.load %arg13[%c12_250, %c0_251] : memref<32x128xf32, #tpu.memory_space<vmem>>, vector<4x128xf32>
    %458 = arith.addf %456, %457 : vector<4x128xf32>
    %cst_252 = arith.constant 9.700000e-01 : f32
    %459 = vector.broadcast %cst_252 : f32 to vector<4x128xf32>
    %460 = arith.mulf %454, %459 : vector<4x128xf32>
    %461 = arith.addf %460, %458 : vector<4x128xf32>
    %cst_253 = arith.constant 1.250000e+00 : f32
    %462 = vector.broadcast %cst_253 : f32 to vector<4x128xf32>
    %463 = arith.cmpf oge, %461, %462 : vector<4x128xf32>
    %464 = arith.extui %463 : vector<4x128xi1> to vector<4x128xi32>
    %465 = arith.sitofp %464 : vector<4x128xi32> to vector<4x128xf32>
    %c0_254 = arith.constant 0 : index
    %c12_255 = arith.constant 12 : index
    %c0_256 = arith.constant 0 : index
    %466 = vector.load %arg6[%c0_254, %c12_255, %c0_256] : memref<1x32x128xf32, #tpu.memory_space<vmem>>, vector<1x4x128xf32>
    %467 = vector.shape_cast %466 : vector<1x4x128xf32> to vector<4x128xf32>
    %468 = vector.shape_cast %465 : vector<4x128xf32> to vector<1x4x128xf32>
    tpu.vector_store %arg6[%c0_254, %c12_255, %c0_256], %468 {strides = array<i32>} : memref<1x32x128xf32, #tpu.memory_space<vmem>>, vector<1x4x128xf32>,
    %cst_257 = arith.constant 1.000000e+00 : f32
    %469 = vector.broadcast %cst_257 : f32 to vector<4x128xf32>
    %470 = arith.subf %469, %465 : vector<4x128xf32>
    %471 = arith.mulf %461, %470 : vector<4x128xf32>
    %cst_258 = arith.constant 7.500000e-01 : f32
    %472 = vector.broadcast %cst_258 : f32 to vector<4x128xf32>
    %473 = arith.mulf %458, %472 : vector<4x128xf32>
    %c16_259 = arith.constant 16 : index
    %c0_260 = arith.constant 0 : index
    %474 = vector.load %arg13[%c16_259, %c0_260] : memref<32x128xf32, #tpu.memory_space<vmem>>, vector<4x128xf32>
    %475 = arith.addf %473, %474 : vector<4x128xf32>
    %cst_261 = arith.constant 9.700000e-01 : f32
    %476 = vector.broadcast %cst_261 : f32 to vector<4x128xf32>
    %477 = arith.mulf %471, %476 : vector<4x128xf32>
    %478 = arith.addf %477, %475 : vector<4x128xf32>
    %cst_262 = arith.constant 1.250000e+00 : f32
    %479 = vector.broadcast %cst_262 : f32 to vector<4x128xf32>
    %480 = arith.cmpf oge, %478, %479 : vector<4x128xf32>
    %481 = arith.extui %480 : vector<4x128xi1> to vector<4x128xi32>
    %482 = arith.sitofp %481 : vector<4x128xi32> to vector<4x128xf32>
    %c0_263 = arith.constant 0 : index
    %c16_264 = arith.constant 16 : index
    %c0_265 = arith.constant 0 : index
    %483 = vector.load %arg6[%c0_263, %c16_264, %c0_265] : memref<1x32x128xf32, #tpu.memory_space<vmem>>, vector<1x4x128xf32>
    %484 = vector.shape_cast %483 : vector<1x4x128xf32> to vector<4x128xf32>
    %485 = vector.shape_cast %482 : vector<4x128xf32> to vector<1x4x128xf32>
    tpu.vector_store %arg6[%c0_263, %c16_264, %c0_265], %485 {strides = array<i32>} : memref<1x32x128xf32, #tpu.memory_space<vmem>>, vector<1x4x128xf32>,
    %cst_266 = arith.constant 1.000000e+00 : f32
    %486 = vector.broadcast %cst_266 : f32 to vector<4x128xf32>
    %487 = arith.subf %486, %482 : vector<4x128xf32>
    %488 = arith.mulf %478, %487 : vector<4x128xf32>
    %cst_267 = arith.constant 7.500000e-01 : f32
    %489 = vector.broadcast %cst_267 : f32 to vector<4x128xf32>
    %490 = arith.mulf %475, %489 : vector<4x128xf32>
    %c20_268 = arith.constant 20 : index
    %c0_269 = arith.constant 0 : index
    %491 = vector.load %arg13[%c20_268, %c0_269] : memref<32x128xf32, #tpu.memory_space<vmem>>, vector<4x128xf32>
    %492 = arith.addf %490, %491 : vector<4x128xf32>
    %cst_270 = arith.constant 9.700000e-01 : f32
    %493 = vector.broadcast %cst_270 : f32 to vector<4x128xf32>
    %494 = arith.mulf %488, %493 : vector<4x128xf32>
    %495 = arith.addf %494, %492 : vector<4x128xf32>
    %cst_271 = arith.constant 1.250000e+00 : f32
    %496 = vector.broadcast %cst_271 : f32 to vector<4x128xf32>
    %497 = arith.cmpf oge, %495, %496 : vector<4x128xf32>
    %498 = arith.extui %497 : vector<4x128xi1> to vector<4x128xi32>
    %499 = arith.sitofp %498 : vector<4x128xi32> to vector<4x128xf32>
    %c0_272 = arith.constant 0 : index
    %c20_273 = arith.constant 20 : index
    %c0_274 = arith.constant 0 : index
    %500 = vector.load %arg6[%c0_272, %c20_273, %c0_274] : memref<1x32x128xf32, #tpu.memory_space<vmem>>, vector<1x4x128xf32>
    %501 = vector.shape_cast %500 : vector<1x4x128xf32> to vector<4x128xf32>
    %502 = vector.shape_cast %499 : vector<4x128xf32> to vector<1x4x128xf32>
    tpu.vector_store %arg6[%c0_272, %c20_273, %c0_274], %502 {strides = array<i32>} : memref<1x32x128xf32, #tpu.memory_space<vmem>>, vector<1x4x128xf32>,
    %cst_275 = arith.constant 1.000000e+00 : f32
    %503 = vector.broadcast %cst_275 : f32 to vector<4x128xf32>
    %504 = arith.subf %503, %499 : vector<4x128xf32>
    %505 = arith.mulf %495, %504 : vector<4x128xf32>
    %cst_276 = arith.constant 7.500000e-01 : f32
    %506 = vector.broadcast %cst_276 : f32 to vector<4x128xf32>
    %507 = arith.mulf %492, %506 : vector<4x128xf32>
    %c24_277 = arith.constant 24 : index
    %c0_278 = arith.constant 0 : index
    %508 = vector.load %arg13[%c24_277, %c0_278] : memref<32x128xf32, #tpu.memory_space<vmem>>, vector<4x128xf32>
    %509 = arith.addf %507, %508 : vector<4x128xf32>
    %cst_279 = arith.constant 9.700000e-01 : f32
    %510 = vector.broadcast %cst_279 : f32 to vector<4x128xf32>
    %511 = arith.mulf %505, %510 : vector<4x128xf32>
    %512 = arith.addf %511, %509 : vector<4x128xf32>
    %cst_280 = arith.constant 1.250000e+00 : f32
    %513 = vector.broadcast %cst_280 : f32 to vector<4x128xf32>
    %514 = arith.cmpf oge, %512, %513 : vector<4x128xf32>
    %515 = arith.extui %514 : vector<4x128xi1> to vector<4x128xi32>
    %516 = arith.sitofp %515 : vector<4x128xi32> to vector<4x128xf32>
    %c0_281 = arith.constant 0 : index
    %c24_282 = arith.constant 24 : index
    %c0_283 = arith.constant 0 : index
    %517 = vector.load %arg6[%c0_281, %c24_282, %c0_283] : memref<1x32x128xf32, #tpu.memory_space<vmem>>, vector<1x4x128xf32>
    %518 = vector.shape_cast %517 : vector<1x4x128xf32> to vector<4x128xf32>
    %519 = vector.shape_cast %516 : vector<4x128xf32> to vector<1x4x128xf32>
    tpu.vector_store %arg6[%c0_281, %c24_282, %c0_283], %519 {strides = array<i32>} : memref<1x32x128xf32, #tpu.memory_space<vmem>>, vector<1x4x128xf32>,
    %cst_284 = arith.constant 1.000000e+00 : f32
    %520 = vector.broadcast %cst_284 : f32 to vector<4x128xf32>
    %521 = arith.subf %520, %516 : vector<4x128xf32>
    %522 = arith.mulf %512, %521 : vector<4x128xf32>
    %cst_285 = arith.constant 7.500000e-01 : f32
    %523 = vector.broadcast %cst_285 : f32 to vector<4x128xf32>
    %524 = arith.mulf %509, %523 : vector<4x128xf32>
    %c28_286 = arith.constant 28 : index
    %c0_287 = arith.constant 0 : index
    %525 = vector.load %arg13[%c28_286, %c0_287] : memref<32x128xf32, #tpu.memory_space<vmem>>, vector<4x128xf32>
    %526 = arith.addf %524, %525 : vector<4x128xf32>
    %cst_288 = arith.constant 9.700000e-01 : f32
    %527 = vector.broadcast %cst_288 : f32 to vector<4x128xf32>
    %528 = arith.mulf %522, %527 : vector<4x128xf32>
    %529 = arith.addf %528, %526 : vector<4x128xf32>
    %cst_289 = arith.constant 1.250000e+00 : f32
    %530 = vector.broadcast %cst_289 : f32 to vector<4x128xf32>
    %531 = arith.cmpf oge, %529, %530 : vector<4x128xf32>
    %532 = arith.extui %531 : vector<4x128xi1> to vector<4x128xi32>
    %533 = arith.sitofp %532 : vector<4x128xi32> to vector<4x128xf32>
    %c0_290 = arith.constant 0 : index
    %c28_291 = arith.constant 28 : index
    %c0_292 = arith.constant 0 : index
    %534 = vector.load %arg6[%c0_290, %c28_291, %c0_292] : memref<1x32x128xf32, #tpu.memory_space<vmem>>, vector<1x4x128xf32>
    %535 = vector.shape_cast %534 : vector<1x4x128xf32> to vector<4x128xf32>
    %536 = vector.shape_cast %533 : vector<4x128xf32> to vector<1x4x128xf32>
    tpu.vector_store %arg6[%c0_290, %c28_291, %c0_292], %536 {strides = array<i32>} : memref<1x32x128xf32, #tpu.memory_space<vmem>>, vector<1x4x128xf32>,
    return
  }
  func.func @transform_0(%arg0: i32) -> (i32, i32, i32) {
    %c0_i32 = arith.constant 0 : i32
    %c0_i32_0 = arith.constant 0 : i32
    %c0_i32_1 = arith.constant 0 : i32
    return %arg0, %c0_i32, %c0_i32_0 : i32, i32, i32
  }
  func.func @transform_1(%arg0: i32) -> (i32, i32) {
    %c0_i32 = arith.constant 0 : i32
    %c0_i32_0 = arith.constant 0 : i32
    %c0_i32_1 = arith.constant 0 : i32
    return %c0_i32, %c0_i32_0 : i32, i32
  }
  func.func @transform_2(%arg0: i32) -> (i32, i32) {
    %c0_i32 = arith.constant 0 : i32
    %c0_i32_0 = arith.constant 0 : i32
    %c0_i32_1 = arith.constant 0 : i32
    return %c0_i32, %c0_i32_0 : i32, i32
  }
  func.func @transform_3(%arg0: i32) -> (i32, i32) {
    %c0_i32 = arith.constant 0 : i32
    %c0_i32_0 = arith.constant 0 : i32
    %c0_i32_1 = arith.constant 0 : i32
    return %c0_i32, %c0_i32_0 : i32, i32
  }
  func.func @transform_4(%arg0: i32) -> (i32, i32) {
    %c0_i32 = arith.constant 0 : i32
    %c0_i32_0 = arith.constant 0 : i32
    %c0_i32_1 = arith.constant 0 : i32
    return %c0_i32, %c0_i32_0 : i32, i32
  }
  func.func @transform_5(%arg0: i32) -> (i32, i32, i32) {
    %c0_i32 = arith.constant 0 : i32
    %c0_i32_0 = arith.constant 0 : i32
    %c0_i32_1 = arith.constant 0 : i32
    return %arg0, %c0_i32, %c0_i32_0 : i32, i32, i32
  }
}

</mosaic_0001>

<bundles_post_ra>
// kernel: lava_net_forward.1
= control target key start
LH: loop header
LB: loop body
LE: loop exit
PB: predicated region body
PF: predicated region fallthrough
CT: control target
= control target key end

     0   :  { %s6193_s18 = smov 0   ;;  %s7632_s0 = inlined_call_operand.vmem [shape: bf16[2,32,512], index: 0, kind: input, shape index: {}]   ;;  %s7633_s1 = inlined_call_operand.vmem [shape: bf16[512,1024], index: 1, kind: input, shape index: {}]   ;;  %s7634_s2 = inlined_call_operand.vmem [shape: bf16[1024,256], index: 2, kind: input, shape index: {}]   ;;  %s7635_s3 = inlined_call_operand.vmem [shape: bf16[256,128], index: 3, kind: input, shape index: {}]   ;;  %s7636_s4 = inlined_call_operand.vmem [shape: bf16[128,128], index: 4, kind: input, shape index: {}]   ;;  %s7637_s5 = inlined_call_operand.vmem [shape: f32[2,32,128], index: 5, kind: output, shape index: {}]  }
   0x1 LB: > { %s5176_s19 = sadd.s32 4294967295, %s6159_s18   ;;  %p5180_p0 = scmp.ge.s32.totalorder %s6159_s18, 1  ;;  %s6159_s18 = sphi %s6193_s18, %s15_s18  }
   0x2   : > { %p187_p1 = scmp.lt.s32.totalorder %s6159_s18, 3 }
   0x4   : > { %p188_p2 = pnand %p5180_p0, %p187_p1 }
   0x5   : > { %v234_v0 = vld [vmem:[%s7633_s1] sm:$0xff] (!%p188_p2)  ;;  %p215_p3 = scmp.lt.s32.totalorder (!%p188_p2), %s5176_s19, 1  ;;  %v236_v22 = vld [vmem:[%s7633_s1 + $0x10] sm:$0xff] (!%p188_p2) }
   0x6   : > { %191 = sbr.rel (%p188_p2) target bundleno = 1516 (0x5ec), region = 40  ;;  %v238_v1 = vld [vmem:[%s7633_s1 + $0x20] sm:$0xff] (!%p188_p2)  ;;  %v240_v23 = vld [vmem:[%s7633_s1 + $0x30] sm:$0xff] (!%p188_p2) }
   0x7   : > { %v242_v2 = vld [vmem:[%s7633_s1 + $0x40] sm:$0xff] (!%p188_p2)  ;;  %v5194_v3 = vcombine.high (!%p188_p2), %v234_v0, %v238_v1  ;;  %v5193_v4 = vcombine.low (!%p188_p2), %v234_v0, %v238_v1  ;;  %v5198_v25 = vcombine.high (!%p188_p2), %v236_v22, %v240_v23  ;;  %v5197_v26 = vcombine.low (!%p188_p2), %v236_v22, %v240_v23  ;;  %v244_v27 = vld [vmem:[%s7633_s1 + $0x50] sm:$0xff] (!%p188_p2) }
   0x8   : > { %v246_v5 = vld [vmem:[%s7633_s1 + $0x60] sm:$0xff] (!%p188_p2)  ;;  %v248_v28 = vld [vmem:[%s7633_s1 + $0x70] sm:$0xff] (!%p188_p2) }
   0x9   : > { %v5202_v6 = vcombine.high (!%p188_p2), %v242_v2, %v246_v5  ;;  %v250_v7 = vld [vmem:[%s7633_s1 + $0x80] sm:$0xff] (!%p188_p2)  ;;  %1810 = vmatprep.subr.bf16.mxu1 (!%p188_p2), %v5194_v3  ;;  %v5201_v9 = vcombine.low (!%p188_p2), %v242_v2, %v246_v5  ;;  %v5206_v30 = vcombine.high (!%p188_p2), %v244_v27, %v248_v28  ;;  %v252_v31 = vld [vmem:[%s7633_s1 + $0x90] sm:$0xff] (!%p188_p2)  ;;  %2022 = vmatprep.subr.bf16.mxu0 (!%p188_p2), %v5198_v25 }
   0xa   : > { %v254_v8 = vld [vmem:[%s7633_s1 + $0xa0] sm:$0xff] (!%p188_p2)  ;;  %1811 = vmatpush1.bf16.msra.mxu1 (!%p188_p2), %v5193_v4  ;;  %v256_v32 = vld [vmem:[%s7633_s1 + $0xb0] sm:$0xff] (!%p188_p2)  ;;  %2023 = vmatpush1.bf16.msra.mxu0 (!%p188_p2), %v5197_v26  ;;  %v5205_v35 = vcombine.low (!%p188_p2), %v244_v27, %v248_v28 }
   0xb   : > { %1812 = vmatprep.subr.bf16.mxu1 (!%p188_p2), %v5202_v6  ;;  %v5210_v10 = vcombine.high (!%p188_p2), %v250_v7, %v254_v8  ;;  %v258_v11 = vld [vmem:[%s7633_s1 + $0xc0] sm:$0xff] (!%p188_p2)  ;;  %v5209_v13 = vcombine.low (!%p188_p2), %v250_v7, %v254_v8  ;;  %2024 = vmatprep.subr.bf16.mxu0 (!%p188_p2), %v5206_v30  ;;  %v5214_v37 = vcombine.high (!%p188_p2), %v252_v31, %v256_v32  ;;  %v260_v39 = vld [vmem:[%s7633_s1 + $0xd0] sm:$0xff] (!%p188_p2) }
   0xc   : > { %v262_v12 = vld [vmem:[%s7633_s1 + $0xe0] sm:$0xff] (!%p188_p2)  ;;  %v264_v40 = vld [vmem:[%s7633_s1 + $0xf0] sm:$0xff] (!%p188_p2)  ;;  %v5213_v43 = vcombine.low (!%p188_p2), %v252_v31, %v256_v32 }
   0xd   : > { %s7639_s19 = smov (!%p215_p3, %s5176_s19), 1  ;;  %v5218_v14 = vcombine.high %v258_v11, %v262_v12  ;;  %v266_v15 = vld [vmem:[%s7633_s1 + $0x100] sm:$0xff]  ;;  %v5217_v18 = vcombine.low %v258_v11, %v262_v12  ;;  %v5222_v45 = vcombine.high %v260_v39, %v264_v40  ;;  %v268_v47 = vld [vmem:[%s7633_s1 + $0x110] sm:$0xff]  ;;  %v5221_v51 = vcombine.low %v260_v39, %v264_v40 }
   0xe   : > { %s5753_s7 = sshll.u32 %s7639_s19, 6  ;;  %1813 = vmatpush1.bf16.msra.mxu1 %v5201_v9  ;;  %v270_v16 = vld [vmem:[%s7633_s1 + $0x120] sm:$0xff]  ;;  %2025 = vmatpush1.bf16.msra.mxu0 %v5205_v35  ;;  %v272_v48 = vld [vmem:[%s7633_s1 + $0x130] sm:$0xff]  ;;  %s5754_s12 = sshll.u32 %s7639_s19, 5 }
   0xf   : > { %s6231_s14 = scalar_lea.vmem %s7632_s0, %s5753_s7  ;;  %1814 = vmatprep.subr.bf16.mxu1 %v5210_v10  ;;  %v5226_v19 = vcombine.high %v266_v15, %v270_v16  ;;  %v274_v20 = vld [vmem:[%s7633_s1 + $0x140] sm:$0xff]  ;;  %v5225_v24 = vcombine.low %v266_v15, %v270_v16  ;;  %2026 = vmatprep.subr.bf16.mxu0 %v5214_v37  ;;  %v5230_v53 = vcombine.high %v268_v47, %v272_v48  ;;  %v276_v55 = vld [vmem:[%s7633_s1 + $0x150] sm:$0xff]  ;;  %s7611_s16 = scalar_lea.vmem %s7637_s5, %s5754_s12 }
  0x10   : > { %v5915_v17 = vld [vmem:[%s6231_s14 + $0x4] ss:$16 sps:$4 sm:$0xff]   ;;  %v5229_v59 = vcombine.low %v268_v47, %v272_v48 }
  0x11   : > { %1842 = vmatprep.mubr.bf16.mxu1 %v5915_v17  ;;  %v278_v21 = vld [vmem:[%s7633_s1 + $0x160] sm:$0xff]  ;;  %2054 = vmatprep.mubr.bf16.mxu0 %v5915_v17  ;;  %v280_v56 = vld [vmem:[%s7633_s1 + $0x170] sm:$0xff] }
  0x12   : > { %1815 = vmatpush1.bf16.msra.mxu1 %v5209_v13  ;;  %v5234_v29 = vcombine.high %v274_v20, %v278_v21  ;;  %v282_v33 = vld [vmem:[%s7633_s1 + $0x180] sm:$0xff]  ;;  %v5233_v36 = vcombine.low %v274_v20, %v278_v21  ;;  %2027 = vmatpush1.bf16.msra.mxu0 %v5213_v43  ;;  %v5238_v61 = vcombine.high %v276_v55, %v280_v56  ;;  %v284_v63 = vld [vmem:[%s7633_s1 + $0x190] sm:$0xff] }
  0x13   : > { %1816 = vmatprep.subr.bf16.mxu1 %v5218_v14  ;;  %v286_v34 = vld [vmem:[%s7633_s1 + $0x1a0] sm:$0xff]  ;;  %2028 = vmatprep.subr.bf16.mxu0 %v5222_v45  ;;  %v288_v0 = vld [vmem:[%s7633_s1 + $0x1b0] sm:$0xff]  ;;  %v5237_v3 = vcombine.low %v276_v55, %v280_v56 }
  0x14   : > { %v5242_v38 = vcombine.high %v282_v33, %v286_v34  ;;  %v290_v41 = vld [vmem:[%s7633_s1 + $0x1c0] sm:$0xff]  ;;  %v5241_v44 = vcombine.low %v282_v33, %v286_v34  ;;  %v5246_v5 = vcombine.high %v284_v63, %v288_v0  ;;  %v292_v7 = vld [vmem:[%s7633_s1 + $0x1d0] sm:$0xff]  ;;  %v5245_v11 = vcombine.low %v284_v63, %v288_v0 }
  0x15   : > { %v294_v42 = vld [vmem:[%s7633_s1 + $0x1e0] sm:$0xff]  ;;  %v296_v8 = vld [vmem:[%s7633_s1 + $0x1f0] sm:$0xff] }
  0x16   : > { %1817 = vmatpush1.bf16.msra.mxu1 %v5217_v18  ;;  %v5250_v46 = vcombine.high %v290_v41, %v294_v42  ;;  %v298_v49 = vld [vmem:[%s7633_s1 + $0x200] sm:$0xff]  ;;  %v5249_v52 = vcombine.low %v290_v41, %v294_v42  ;;  %2029 = vmatpush1.bf16.msra.mxu0 %v5221_v51  ;;  %v5254_v13 = vcombine.high %v292_v7, %v296_v8  ;;  %v300_v15 = vld [vmem:[%s7633_s1 + $0x210] sm:$0xff] }
  0x17   : > { %1818 = vmatprep.subr.bf16.mxu1 %v5226_v19  ;;  %v302_v50 = vld [vmem:[%s7633_s1 + $0x220] sm:$0xff]  ;;  %2030 = vmatprep.subr.bf16.mxu0 %v5230_v53  ;;  %v304_v16 = vld [vmem:[%s7633_s1 + $0x230] sm:$0xff]  ;;  %v5253_v19 = vcombine.low %v292_v7, %v296_v8 }
  0x18   : > { %v5258_v54 = vcombine.high %v298_v49, %v302_v50  ;;  %v306_v57 = vld [vmem:[%s7633_s1 + $0x240] sm:$0xff]  ;;  %v5257_v60 = vcombine.low %v298_v49, %v302_v50  ;;  %v5262_v21 = vcombine.high %v300_v15, %v304_v16  ;;  %v308_v23 = vld [vmem:[%s7633_s1 + $0x250] sm:$0xff]  ;;  %v5261_v27 = vcombine.low %v300_v15, %v304_v16 }
  0x19   : > { %v310_v58 = vld [vmem:[%s7633_s1 + $0x260] sm:$0xff]  ;;  %v316_v31 = vld [vmem:[%s7633_s1 + $0x290] sm:$0xff] }
  0x1a   : > { %1819 = vmatpush1.bf16.msra.mxu1 %v5225_v24  ;;  %v5266_v62 = vcombine.high %v306_v57, %v310_v58  ;;  %v314_v1 = vld [vmem:[%s7633_s1 + $0x280] sm:$0xff]  ;;  %2031 = vmatpush1.bf16.msra.mxu0 %v5229_v59  ;;  %v5265_v4 = vcombine.low %v306_v57, %v310_v58  ;;  %v312_v24 = vld [vmem:[%s7633_s1 + $0x270] sm:$0xff] }
  0x1b   : > { %1820 = vmatprep.subr.bf16.mxu1 %v5234_v29  ;;  %v318_v2 = vld [vmem:[%s7633_s1 + $0x2a0] sm:$0xff]  ;;  %2032 = vmatprep.subr.bf16.mxu0 %v5238_v61  ;;  %v5270_v29 = vcombine.high %v308_v23, %v312_v24  ;;  %v320_v32 = vld [vmem:[%s7633_s1 + $0x2b0] sm:$0xff]  ;;  %v5269_v35 = vcombine.low %v308_v23, %v312_v24 }
  0x1c   : > { %v5274_v6 = vcombine.high %v314_v1, %v318_v2  ;;  %v322_v9 = vld [vmem:[%s7633_s1 + $0x2c0] sm:$0xff]  ;;  %v5273_v12 = vcombine.low %v314_v1, %v318_v2  ;;  %v324_v41 = vld [vmem:[%s7633_s1 + $0x2d0] sm:$0xff]  ;;  %v5277_v43 = vcombine.low %v316_v31, %v320_v32 }
  0x1d   : > { %v326_v10 = vld [vmem:[%s7633_s1 + $0x2e0] sm:$0xff]  ;;  %v328_v42 = vld [vmem:[%s7633_s1 + $0x2f0] sm:$0xff] }
  0x1e   : > { %1821 = vmatpush1.bf16.msra.mxu1 %v5233_v36  ;;  %2033 = vmatpush1.bf16.msra.mxu0 %v5237_v3  ;;  %v5282_v14 = vcombine.high %v322_v9, %v326_v10  ;;  %v330_v17 = vld [vmem:[%s7633_s1 + $0x300] sm:$0xff]  ;;  %v5281_v20 = vcombine.low %v322_v9, %v326_v10  ;;  %v5286_v47 = vcombine.high %v324_v41, %v328_v42  ;;  %v332_v49 = vld [vmem:[%s7633_s1 + $0x310] sm:$0xff] }
  0x1f   : > { %1822 = vmatprep.subr.bf16.mxu1 %v5242_v38  ;;  %2034 = vmatprep.subr.bf16.mxu0 %v5246_v5  ;;  %v334_v18 = vld [vmem:[%s7633_s1 + $0x320] sm:$0xff]  ;;  %v5278_v38 = vcombine.high %v316_v31, %v320_v32  ;;  %v336_v50 = vld [vmem:[%s7633_s1 + $0x330] sm:$0xff]  ;;  %v5285_v51 = vcombine.low %v324_v41, %v328_v42 }
  0x20   : > { %v5290_v22 = vcombine.high %v330_v17, %v334_v18  ;;  %v338_v25 = vld [vmem:[%s7633_s1 + $0x340] sm:$0xff]  ;;  %v5289_v28 = vcombine.low %v330_v17, %v334_v18  ;;  %v5294_v55 = vcombine.high %v332_v49, %v336_v50  ;;  %v340_v58 = vld [vmem:[%s7633_s1 + $0x350] sm:$0xff]  ;;  %v6444_v18 = vld [vmem:[%s6231_s14 + $0xc] ss:$16 sps:$4 sm:$0xff]  }
  0x21   : > { %v342_v26 = vld [vmem:[%s7633_s1 + $0x360] sm:$0xff]  ;;  %v344_v59 = vld [vmem:[%s7633_s1 + $0x370] sm:$0xff] }
  0x22   : > { %1823 = vmatpush1.bf16.msra.mxu1 %v5241_v44  ;;  %2035 = vmatpush1.bf16.msra.mxu0 %v5245_v11  ;;  %v5298_v30 = vcombine.high %v338_v25, %v342_v26  ;;  %v346_v33 = vld [vmem:[%s7633_s1 + $0x380] sm:$0xff]  ;;  %v5297_v36 = vcombine.low %v338_v25, %v342_v26  ;;  %v5302_v2 = vcombine.high %v340_v58, %v344_v59  ;;  %v348_v3 = vld [vmem:[%s7633_s1 + $0x390] sm:$0xff] }
  0x23   : > { %1824 = vmatprep.subr.bf16.mxu1 %v5250_v46  ;;  %2036 = vmatprep.subr.bf16.mxu0 %v5254_v13  ;;  %v350_v34 = vld [vmem:[%s7633_s1 + $0x3a0] sm:$0xff]  ;;  %v5301_v5 = vcombine.low %v340_v58, %v344_v59  ;;  %v360_v13 = vld [vmem:[%s7633_s1 + $0x3f0] sm:$0xff] }
  0x24   : > { %v354_v37 = vld [vmem:[%s7633_s1 + $0x3c0] sm:$0xff]  ;;  %v5306_v39 = vcombine.high %v346_v33, %v350_v34  ;;  %v5305_v44 = vcombine.low %v346_v33, %v350_v34 }
  0x25   : > { %v358_v40 = vld [vmem:[%s7633_s1 + $0x3e0] sm:$0xff] }
  0x26   : > { %1825 = vmatpush1.bf16.msra.mxu1 %v5249_v52  ;;  %2037 = vmatpush1.bf16.msra.mxu0 %v5253_v19  ;;  %v362_v45 = vld [vmem:[%s7633_s1 + $0x400] sm:$0xff]  ;;  %v5314_v48 = vcombine.high %v354_v37, %v358_v40  ;;  %v5313_v52 = vcombine.low %v354_v37, %v358_v40  ;;  %v384_v37 = vld [vmem:[%s7633_s1 + $0x4b0] sm:$0xff] }
  0x27   : > { %1826 = vmatprep.subr.bf16.mxu1 %v5258_v54  ;;  %2038 = vmatprep.subr.bf16.mxu0 %v5262_v21  ;;  %v366_v46 = vld [vmem:[%s7633_s1 + $0x420] sm:$0xff]  ;;  %v364_v21 = vld [vmem:[%s7633_s1 + $0x410] sm:$0xff] }
  0x28   : > { %v370_v53 = vld [vmem:[%s7633_s1 + $0x440] sm:$0xff]  ;;  %v5322_v56 = vcombine.high %v362_v45, %v366_v46  ;;  %v5321_v61 = vcombine.low %v362_v45, %v366_v46  ;;  %v392_v45 = vld [vmem:[%s7633_s1 + $0x4f0] sm:$0xff] }
  0x29   : > { %v374_v54 = vld [vmem:[%s7633_s1 + $0x460] sm:$0xff] }
  0x2a   : > { %1827 = vmatpush1.bf16.msra.mxu1 %v5257_v60  ;;  %2039 = vmatpush1.bf16.msra.mxu0 %v5261_v27  ;;  %v6397_v57 = vld [vmem:[%s6231_s14] ss:$16 sps:$4 sm:$0xff]   ;;  %v5293_v60 = vcombine.low %v332_v49, %v336_v50  ;;  %v6412_v0 = vld [vmem:[%s6231_s14 + $0x24] ss:$16 sps:$4 sm:$0xff]   ;;  %v5330_v1 = vcombine.high %v370_v53, %v374_v54 }
  0x2b   : > { %1828 = vmatprep.subr.bf16.mxu1 %v5266_v62  ;;  %2040 = vmatprep.subr.bf16.mxu0 %v5270_v29  ;;  %v378_v62 = vld [vmem:[%s7633_s1 + $0x480] sm:$0xff]  ;;  %v376_v29 = vld [vmem:[%s7633_s1 + $0x470] sm:$0xff] }
  0x2c   : > { %v382_v63 = vld [vmem:[%s7633_s1 + $0x4a0] sm:$0xff] }
  0x2d   : > { %v386_v7 = vld [vmem:[%s7633_s1 + $0x4c0] sm:$0xff]  ;;  %v5338_v10 = vcombine.high %v378_v62, %v382_v63  ;;  %v5337_v15 = vcombine.low %v378_v62, %v382_v63  ;;  %v408_v62 = vld [vmem:[%s7633_s1 + $0x570] sm:$0xff] }
  0x2e   : > { %1829 = vmatpush1.bf16.msra.mxu1 %v5265_v4  ;;  %2041 = vmatpush1.bf16.msra.mxu0 %v5269_v35  ;;  %v352_v4 = vld [vmem:[%s7633_s1 + $0x3b0] sm:$0xff]  ;;  %v390_v8 = vld [vmem:[%s7633_s1 + $0x4e0] sm:$0xff] }
  0x2f   : > { %1830 = vmatprep.subr.bf16.mxu1 %v5274_v6  ;;  %2042 = vmatprep.subr.bf16.mxu0 %v5278_v38  ;;  %v5329_v6 = vcombine.low %v370_v53, %v374_v54  ;;  %v5310_v9 = vcombine.high %v348_v3, %v352_v4  ;;  %v6429_v11 = vld [vmem:[%s6231_s14 + $0x20] ss:$16 sps:$4 sm:$0xff]   ;;  %v5346_v19 = vcombine.high %v386_v7, %v390_v8 }
  0x30   : > { %v394_v16 = vld [vmem:[%s7633_s1 + $0x500] sm:$0xff]  ;;  %v5345_v24 = vcombine.low %v386_v7, %v390_v8  ;;  %v400_v53 = vld [vmem:[%s7633_s1 + $0x530] sm:$0xff] }
  0x31   : > { %v398_v17 = vld [vmem:[%s7633_s1 + $0x520] sm:$0xff]  ;;  %v416_v7 = vld [vmem:[%s7633_s1 + $0x5b0] sm:$0xff] }
  0x32   : > { %1831 = vmatpush1.bf16.msra.mxu1 %v5273_v12  ;;  %2043 = vmatpush1.bf16.msra.mxu0 %v5277_v43  ;;  %v356_v12 = vld [vmem:[%s7633_s1 + $0x3d0] sm:$0xff]  ;;  %v402_v25 = vld [vmem:[%s7633_s1 + $0x540] sm:$0xff]  ;;  %v5353_v32 = vcombine.low %v394_v16, %v398_v17 }
  0x33   : > { %1832 = vmatprep.subr.bf16.mxu1 %v5282_v14  ;;  %2044 = vmatprep.subr.bf16.mxu0 %v5286_v47  ;;  %v5309_v14 = vcombine.low %v348_v3, %v352_v4  ;;  %v5317_v23 = vcombine.low %v356_v12, %v360_v13  ;;  %v406_v26 = vld [vmem:[%s7633_s1 + $0x560] sm:$0xff] }
  0x34   : > { %v410_v33 = vld [vmem:[%s7633_s1 + $0x580] sm:$0xff]  ;;  %v5362_v38 = vcombine.high %v402_v25, %v406_v26  ;;  %v5361_v40 = vcombine.low %v402_v25, %v406_v26  ;;  %v432_v25 = vld [vmem:[%s7633_s1 + $0x630] sm:$0xff] }
  0x35   : > { %v414_v34 = vld [vmem:[%s7633_s1 + $0x5a0] sm:$0xff] }
  0x36   : > { %1833 = vmatpush1.bf16.msra.mxu1 %v5281_v20  ;;  %2045 = vmatpush1.bf16.msra.mxu0 %v5285_v51  ;;  %v5318_v20 = vcombine.high %v356_v12, %v360_v13  ;;  %v418_v41 = vld [vmem:[%s7633_s1 + $0x5c0] sm:$0xff]  ;;  %v5370_v46 = vcombine.high %v410_v33, %v414_v34 }
  0x37   : > { %1834 = vmatprep.subr.bf16.mxu1 %v5290_v22  ;;  %2046 = vmatprep.subr.bf16.mxu0 %v5294_v55  ;;  %v368_v22 = vld [vmem:[%s7633_s1 + $0x430] sm:$0xff]  ;;  %v422_v42 = vld [vmem:[%s7633_s1 + $0x5e0] sm:$0xff] }
  0x38   : > { %v5326_v27 = vcombine.high %v364_v21, %v368_v22  ;;  %v5325_v31 = vcombine.low %v364_v21, %v368_v22  ;;  %v426_v49 = vld [vmem:[%s7633_s1 + $0x600] sm:$0xff]  ;;  %v5378_v54 = vcombine.high %v418_v41, %v422_v42 }
  0x39   : > { %v430_v50 = vld [vmem:[%s7633_s1 + $0x620] sm:$0xff] }
  0x3a   : > { %1835 = vmatpush1.bf16.msra.mxu1 %v5289_v28  ;;  %2047 = vmatpush1.bf16.msra.mxu0 %v5293_v60  ;;  %v372_v28 = vld [vmem:[%s7633_s1 + $0x450] sm:$0xff]  ;;  %v434_v58 = vld [vmem:[%s7633_s1 + $0x640] sm:$0xff]  ;;  %v5386_v63 = vcombine.high %v426_v49, %v430_v50 }
  0x3b   : > { %1836 = vmatprep.subr.bf16.mxu1 %v5298_v30  ;;  %2048 = vmatprep.subr.bf16.mxu0 %v5302_v2  ;;  %v5354_v30 = vcombine.high %v394_v16, %v398_v17  ;;  %v5334_v35 = vcombine.high %v372_v28, %v376_v29  ;;  %v438_v59 = vld [vmem:[%s7633_s1 + $0x660] sm:$0xff]  ;;  %v5385_v2 = vcombine.low %v426_v49, %v430_v50  ;;  %v424_v16 = vld [vmem:[%s7633_s1 + $0x5f0] sm:$0xff] }
  0x3c   : > { %v442_v3 = vld [vmem:[%s7633_s1 + $0x680] sm:$0xff]  ;;  %v5394_v8 = vcombine.high %v434_v58, %v438_v59  ;;  %v456_v49 = vld [vmem:[%s7633_s1 + $0x6f0] sm:$0xff] }
  0x3d   : > { %v446_v4 = vld [vmem:[%s7633_s1 + $0x6a0] sm:$0xff] }
  0x3e   : > { %1837 = vmatpush1.bf16.msra.mxu1 %v5297_v36  ;;  %2049 = vmatpush1.bf16.msra.mxu0 %v5301_v5  ;;  %v380_v36 = vld [vmem:[%s7633_s1 + $0x490] sm:$0xff]  ;;  %v450_v12 = vld [vmem:[%s7633_s1 + $0x6c0] sm:$0xff]  ;;  %v5402_v17 = vcombine.high %v442_v3, %v446_v4 }
  0x3f   : > { %1838 = vmatprep.subr.bf16.mxu1 %v5306_v39  ;;  %2050 = vmatprep.subr.bf16.mxu0 %v5310_v9  ;;  %v5333_v39 = vcombine.low %v372_v28, %v376_v29  ;;  %v5342_v43 = vcombine.high %v380_v36, %v384_v37  ;;  %v5341_v47 = vcombine.low %v380_v36, %v384_v37  ;;  %v454_v13 = vld [vmem:[%s7633_s1 + $0x6e0] sm:$0xff] }
  0x40   : > { %v458_v21 = vld [vmem:[%s7633_s1 + $0x700] sm:$0xff]  ;;  %v5410_v26 = vcombine.high %v450_v12, %v454_v13  ;;  %v5409_v28 = vcombine.low %v450_v12, %v454_v13  ;;  %v476_v12 = vld [vmem:[%s7633_s1 + $0x790] sm:$0xff] }
  0x41   : > { %v462_v22 = vld [vmem:[%s7633_s1 + $0x720] sm:$0xff]  ;;  %v480_v13 = vld [vmem:[%s7633_s1 + $0x7b0] sm:$0xff] }
  0x42   : > { %1839 = vmatpush1.bf16.msra.mxu1 %v5305_v44  ;;  %2051 = vmatpush1.bf16.msra.mxu0 %v5309_v14  ;;  %v388_v44 = vld [vmem:[%s7633_s1 + $0x4d0] sm:$0xff]  ;;  %v466_v29 = vld [vmem:[%s7633_s1 + $0x740] sm:$0xff]  ;;  %v5417_v36 = vcombine.low %v458_v21, %v462_v22 }
  0x43   : > { %1840 = vmatprep.subr.bf16.mxu1 %v5314_v48  ;;  %2052 = vmatprep.subr.bf16.mxu0 %v5318_v20  ;;  %v5369_v48 = vcombine.low %v410_v33, %v414_v34  ;;  %v5350_v51 = vcombine.high %v388_v44, %v392_v45  ;;  %v5349_v55 = vcombine.low %v388_v44, %v392_v45  ;;  %v440_v33 = vld [vmem:[%s7633_s1 + $0x670] sm:$0xff]  ;;  %v474_v37 = vld [vmem:[%s7633_s1 + $0x780] sm:$0xff] }
  0x44   : > { %v5401_v20 = vcombine.low %v442_v3, %v446_v4  ;;  %v5418_v34 = vcombine.high %v458_v21, %v462_v22  ;;  %v482_v45 = vld [vmem:[%s7633_s1 + $0x7c0] sm:$0xff]  ;;  %v472_v3 = vld [vmem:[%s7633_s1 + $0x770] sm:$0xff]  ;;  %v6615_v4 = vld [vmem:[%s6231_s14 + $0x8] ss:$16 sps:$4 sm:$0xff]  }
  0x45   : > { %v259_v21 = vld [vmem:[%s7633_s1 + $0xc8] sm:$0xff] }
  0x46   : > { %1841 = vmatpush1.bf16.msra.mxu1 %v5313_v52  ;;  %2053 = vmatpush1.bf16.msra.mxu0 %v5317_v23  ;;  %v396_v52 = vld [vmem:[%s7633_s1 + $0x510] sm:$0xff]  ;;  %v263_v22 = vld [vmem:[%s7633_s1 + $0xe8] sm:$0xff] }
  0x47   : > { %1863 = vmatprep.subr.bf16.mxu1 %v5322_v56  ;;  %2075 = vmatprep.subr.bf16.mxu0 %v5326_v27  ;;  %v5377_v56 = vcombine.low %v418_v41, %v422_v42  ;;  %v5358_v60 = vcombine.high %v396_v52, %v400_v53  ;;  %v448_v41 = vld [vmem:[%s7633_s1 + $0x6b0] sm:$0xff] }
  0x49   : > { %1843 = vmatmul.mubr.bf16.vlgmr.msra.gmra.mrb[0].mxu1 %v6397_v57  ;;  %2055 = vmatmul.mubr.bf16.vlgmr.msra.gmra.mrb[0].mxu0 %v6397_v57 }
  0x4a   : > { %1864 = vmatpush1.bf16.msra.mxu1 %v5321_v61  ;;  %1852 = vmatprep.mubr.bf16.mxu1 %v6412_v0  ;;  %v404_v61 = vld [vmem:[%s7633_s1 + $0x550] sm:$0xff] }
  0x4b   : > { %1865 = vmatprep.subr.bf16.mxu1 %v5330_v1  ;;  %2076 = vmatpush1.bf16.msra.mxu0 %v5325_v31  ;;  %v5357_v1 = vcombine.low %v396_v52, %v400_v53  ;;  %v5366_v5 = vcombine.high %v404_v61, %v408_v62  ;;  %v5365_v9 = vcombine.low %v404_v61, %v408_v62  ;;  %v235_v53 = vld [vmem:[%s7633_s1 + $0x8] sm:$0xff] }
  0x4c   : > { %2064 = vmatprep.mubr.bf16.mxu0 %v6412_v0  ;;  %2077 = vmatprep.subr.bf16.mxu0 %v5334_v35  ;;  %v243_v62 = vld [vmem:[%s7633_s1 + $0x48] sm:$0xff] }
  0x4e   : > { %1866 = vmatpush1.bf16.msra.mxu1 %v5329_v6  ;;  %v412_v6 = vld [vmem:[%s7633_s1 + $0x590] sm:$0xff] }
  0x4f   : > { %1867 = vmatprep.subr.bf16.mxu1 %v5338_v10  ;;  %2078 = vmatpush1.bf16.msra.mxu0 %v5333_v39  ;;  %v5393_v10 = vcombine.low %v434_v58, %v438_v59  ;;  %v5374_v14 = vcombine.high %v412_v6, %v416_v7  ;;  %v464_v58 = vld [vmem:[%s7633_s1 + $0x730] sm:$0xff] }
  0x50   : > { %2079 = vmatprep.subr.bf16.mxu0 %v5342_v43 }
  0x51   : > { %1853 = vmatmul.mubr.bf16.gmra.mrb[4].mxu1 %v6429_v11  ;;  %2065 = vmatmul.mubr.bf16.gmra.mrb[4].mxu0 %v6429_v11 }
  0x52   : > { %1868 = vmatpush1.bf16.msra.mxu1 %v5337_v15  ;;  %1895 = vmatprep.mubr.bf16.mxu1 %v6444_v18  ;;  %v420_v15 = vld [vmem:[%s7633_s1 + $0x5d0] sm:$0xff] }
  0x53   : > { %1869 = vmatprep.subr.bf16.mxu1 %v5346_v19  ;;  %2080 = vmatpush1.bf16.msra.mxu0 %v5341_v47  ;;  %v5373_v19 = vcombine.low %v412_v6, %v416_v7  ;;  %v5382_v23 = vcombine.high %v420_v15, %v424_v16  ;;  %v5381_v27 = vcombine.low %v420_v15, %v424_v16  ;;  %v255_v15 = vld [vmem:[%s7633_s1 + $0xa8] sm:$0xff] }
  0x54   : > { %2107 = vmatprep.mubr.bf16.mxu0 %v6444_v18  ;;  %2081 = vmatprep.subr.bf16.mxu0 %v5350_v51 }
  0x56   : > { %1870 = vmatpush1.bf16.msra.mxu1 %v5345_v24  ;;  %v428_v24 = vld [vmem:[%s7633_s1 + $0x610] sm:$0xff] }
  0x57   : > { %1871 = vmatprep.subr.bf16.mxu1 %v5354_v30  ;;  %2082 = vmatpush1.bf16.msra.mxu0 %v5349_v55  ;;  %v470_v30 = vld [vmem:[%s7633_s1 + $0x760] sm:$0xff]  ;;  %v5390_v31 = vcombine.high %v428_v24, %v432_v25  ;;  %v5389_v35 = vcombine.low %v428_v24, %v432_v25  ;;  %v488_v24 = vld [vmem:[%s7633_s1 + $0x7f0] sm:$0xff]  ;;  %v6647_v25 = vld [vmem:[%s6231_s14 + $0x28] ss:$16 sps:$4 sm:$0xff]  }
  0x58   : > { %2083 = vmatprep.subr.bf16.mxu0 %v5358_v60  ;;  %v5426_v42 = vcombine.high %v466_v29, %v470_v30  ;;  %v5425_v44 = vcombine.low %v466_v29, %v470_v30  ;;  %v267_v30 = vld [vmem:[%s7633_s1 + $0x108] sm:$0xff] }
  0x5a   : > { %1872 = vmatpush1.bf16.msra.mxu1 %v5353_v32  ;;  %v436_v32 = vld [vmem:[%s7633_s1 + $0x650] sm:$0xff] }
  0x5b   : > { %1873 = vmatprep.subr.bf16.mxu1 %v5362_v38  ;;  %2084 = vmatpush1.bf16.msra.mxu0 %v5357_v1  ;;  %v478_v38 = vld [vmem:[%s7633_s1 + $0x7a0] sm:$0xff]  ;;  %v5398_v39 = vcombine.high %v436_v32, %v440_v33  ;;  %v5397_v43 = vcombine.low %v436_v32, %v440_v33  ;;  %v5219_v33 = vcombine.low %v259_v21, %v263_v22 }
  0x5c   : > { %2085 = vmatprep.subr.bf16.mxu0 %v5366_v5  ;;  %v5434_v50 = vcombine.high %v474_v37, %v478_v38  ;;  %v5433_v52 = vcombine.low %v474_v37, %v478_v38  ;;  %v279_v37 = vld [vmem:[%s7633_s1 + $0x168] sm:$0xff] }
  0x5e   : > { %1874 = vmatpush1.bf16.msra.mxu1 %v5361_v40  ;;  %v444_v40 = vld [vmem:[%s7633_s1 + $0x690] sm:$0xff] }
  0x5f   : > { %1875 = vmatprep.subr.bf16.mxu1 %v5370_v46  ;;  %2086 = vmatpush1.bf16.msra.mxu0 %v5365_v9  ;;  %v486_v46 = vld [vmem:[%s7633_s1 + $0x7e0] sm:$0xff]  ;;  %v5406_v47 = vcombine.high %v444_v40, %v448_v41  ;;  %v5405_v51 = vcombine.low %v444_v40, %v448_v41  ;;  %v283_v40 = vld [vmem:[%s7633_s1 + $0x188] sm:$0xff] }
  0x60   : > { %2087 = vmatprep.subr.bf16.mxu0 %v5374_v14  ;;  %v5442_v59 = vcombine.high %v482_v45, %v486_v46  ;;  %v5441_v61 = vcombine.low %v482_v45, %v486_v46  ;;  %v251_v14 = vld [vmem:[%s7633_s1 + $0x88] sm:$0xff] }
  0x61   : > { %v287_v41 = vld [vmem:[%s7633_s1 + $0x1a8] sm:$0xff] }
  0x62   : > { %1876 = vmatpush1.bf16.msra.mxu1 %v5369_v48  ;;  %v452_v48 = vld [vmem:[%s7633_s1 + $0x6d0] sm:$0xff]  ;;  %v295_v45 = vld [vmem:[%s7633_s1 + $0x1e8] sm:$0xff]  ;;  %v5243_v46 = vcombine.low %v283_v40, %v287_v41 }
  0x63   : > { %1877 = vmatprep.subr.bf16.mxu1 %v5378_v54  ;;  %2088 = vmatpush1.bf16.msra.mxu0 %v5373_v19  ;;  %v239_v54 = vld [vmem:[%s7633_s1 + $0x28] sm:$0xff]  ;;  %v5414_v55 = vcombine.high %v452_v48, %v456_v49  ;;  %v5413_v60 = vcombine.low %v452_v48, %v456_v49  ;;  %v5438_v19 = vcombine.high %v476_v12, %v480_v13 }
  0x64   : > { %2089 = vmatprep.subr.bf16.mxu0 %v5382_v23  ;;  %v5196_v5 = vcombine.high %v235_v53, %v239_v54  ;;  %v5195_v7 = vcombine.low %v235_v53, %v239_v54  ;;  %v484_v23 = vld [vmem:[%s7633_s1 + $0x7d0] sm:$0xff]  ;;  %v299_v48 = vld [vmem:[%s7633_s1 + $0x208] sm:$0xff] }
  0x65   : > { %v5446_v29 = vcombine.high %v484_v23, %v488_v24  ;;  %v5445_v32 = vcombine.low %v484_v23, %v488_v24  ;;  %v303_v49 = vld [vmem:[%s7633_s1 + $0x228] sm:$0xff] }
  0x66   : > { %1878 = vmatpush1.bf16.msra.mxu1 %v5377_v56  ;;  %v460_v56 = vld [vmem:[%s7633_s1 + $0x710] sm:$0xff]  ;;  %v311_v53 = vld [vmem:[%s7633_s1 + $0x268] sm:$0xff]  ;;  %v5259_v54 = vcombine.low %v299_v48, %v303_v49 }
  0x67   : > { %1879 = vmatprep.subr.bf16.mxu1 %v5386_v63  ;;  %2090 = vmatpush1.bf16.msra.mxu0 %v5381_v27  ;;  %v247_v63 = vld [vmem:[%s7633_s1 + $0x68] sm:$0xff]  ;;  %v5422_v1 = vcombine.high %v460_v56, %v464_v58  ;;  %v5421_v6 = vcombine.low %v460_v56, %v464_v58  ;;  %v5211_v27 = vcombine.low %v251_v14, %v255_v15 }
  0x68   : > { %2091 = vmatprep.subr.bf16.mxu0 %v5390_v31  ;;  %v5204_v9 = vcombine.high %v243_v62, %v247_v63  ;;  %v271_v31 = vld [vmem:[%s7633_s1 + $0x128] sm:$0xff] }
  0x69   : > { %v5227_v38 = vcombine.low %v267_v30, %v271_v31  ;;  %v315_v56 = vld [vmem:[%s7633_s1 + $0x288] sm:$0xff] }
  0x6a   : > { %1880 = vmatpush1.bf16.msra.mxu1 %v5385_v2  ;;  %v468_v2 = vld [vmem:[%s7633_s1 + $0x750] sm:$0xff]  ;;  %v319_v58 = vld [vmem:[%s7633_s1 + $0x2a8] sm:$0xff] }
  0x6b   : > { %1881 = vmatprep.subr.bf16.mxu1 %v5394_v8  ;;  %2092 = vmatpush1.bf16.msra.mxu0 %v5389_v35  ;;  %v6618_v8 = vld [vmem:[%s6231_s14 + $0x2c] ss:$16 sps:$4 sm:$0xff]   ;;  %v5429_v16 = vcombine.low %v468_v2, %v472_v3  ;;  %v5228_v35 = vcombine.high %v267_v30, %v271_v31 }
  0x6c   : > { %2093 = vmatprep.subr.bf16.mxu0 %v5398_v39  ;;  %v367_v23 = vld [vmem:[%s7633_s1 + $0x428] sm:$0xff] }
  0x6d   : > { %v379_v31 = vld [vmem:[%s7633_s1 + $0x488] sm:$0xff] }
  0x6e   : > { %1882 = vmatpush1.bf16.msra.mxu1 %v5393_v10  ;;  %v5430_v10 = vcombine.high %v468_v2, %v472_v3  ;;  %v331_v2 = vld [vmem:[%s7633_s1 + $0x308] sm:$0xff] }
  0x6f   : > { %1883 = vmatprep.subr.bf16.mxu1 %v5402_v17  ;;  %2094 = vmatpush1.bf16.msra.mxu0 %v5397_v43  ;;  %v5203_v17 = vcombine.low %v243_v62, %v247_v63  ;;  %v5244_v43 = vcombine.high %v283_v40, %v287_v41  ;;  %v327_v62 = vld [vmem:[%s7633_s1 + $0x2e8] sm:$0xff]  ;;  %v5275_v63 = vcombine.low %v315_v56, %v319_v58  ;;  %v5930_v40 = vld [vmem:[%s7634_s2 + $0x10] ss:$8 sps:$4 sm:$0xff]  }
  0x70   : > { %2095 = vmatprep.subr.bf16.mxu0 %v5406_v47  ;;  %v335_v3 = vld [vmem:[%s7633_s1 + $0x328] sm:$0xff] }
  0x72   : > { %1884 = vmatpush1.bf16.msra.mxu1 %v5401_v20  ;;  %v5212_v20 = vcombine.high %v251_v14, %v255_v15  ;;  %v351_v14 = vld [vmem:[%s7633_s1 + $0x3a8] sm:$0xff] }
  0x73   : > { %1885 = vmatprep.subr.bf16.mxu1 %v5410_v26  ;;  %2096 = vmatpush1.bf16.msra.mxu0 %v5405_v51  ;;  %v5437_v26 = vcombine.low %v476_v12, %v480_v13  ;;  %v5260_v51 = vcombine.high %v299_v48, %v303_v49  ;;  %v347_v13 = vld [vmem:[%s7633_s1 + $0x388] sm:$0xff] }
  0x74   : > { %2097 = vmatprep.subr.bf16.mxu0 %v5414_v55  ;;  %v403_v48 = vld [vmem:[%s7633_s1 + $0x548] sm:$0xff] }
  0x76   : > { %1886 = vmatpush1.bf16.msra.mxu1 %v5409_v28  ;;  %v5220_v28 = vcombine.high %v259_v21, %v263_v22  ;;  %v363_v22 = vld [vmem:[%s7633_s1 + $0x408] sm:$0xff] }
  0x77   : > { %1887 = vmatprep.subr.bf16.mxu1 %v5418_v34  ;;  %2098 = vmatpush1.bf16.msra.mxu0 %v5413_v60  ;;  %v6657_v34 = vld [vmem:[%s6231_s14 + $0x4] ss:$16 sps:$4 sm:$0xff]   ;;  %v5276_v60 = vcombine.high %v315_v56, %v319_v58  ;;  %v5939_v56 = vld [vmem:[%s7634_s2 + $0x40] ss:$8 sps:$4 sm:$0xff]  }
  0x78   : > { %2099 = vmatprep.subr.bf16.mxu0 %v5422_v1 }
  0x7a   : > { %1888 = vmatpush1.bf16.msra.mxu1 %v5417_v36  ;;  %v275_v36 = vld [vmem:[%s7633_s1 + $0x148] sm:$0xff] }
  0x7b   : > { %1889 = vmatprep.subr.bf16.mxu1 %v5426_v42  ;;  %2100 = vmatpush1.bf16.msra.mxu0 %v5421_v6  ;;  %v5236_v39 = vcombine.high %v275_v36, %v279_v37  ;;  %v5235_v42 = vcombine.low %v275_v36, %v279_v37  ;;  %v5292_v6 = vcombine.high %v331_v2, %v335_v3  ;;  %v5927_v36 = vld [vmem:[%s7634_s2] ss:$8 sps:$4 sm:$0xff]  }
  0x7c   : > { %2101 = vmatprep.subr.bf16.mxu0 %v5430_v10  ;;  %v5291_v10 = vcombine.low %v331_v2, %v335_v3  ;;  %v431_v2 = vld [vmem:[%s7633_s1 + $0x628] sm:$0xff]  ;;  %v5942_v3 = vld [vmem:[%s7634_s2 + $0x50] ss:$8 sps:$4 sm:$0xff]  }
  0x7e   : > { %1890 = vmatpush1.bf16.msra.mxu1 %v5425_v44  ;;  %v291_v44 = vld [vmem:[%s7633_s1 + $0x1c8] sm:$0xff] }
  0x7f   : > { %1891 = vmatprep.subr.bf16.mxu1 %v5434_v50  ;;  %2102 = vmatpush1.bf16.msra.mxu0 %v5429_v16  ;;  %v5252_v47 = vcombine.high %v291_v44, %v295_v45  ;;  %v5251_v50 = vcombine.low %v291_v44, %v295_v45  ;;  %v5308_v16 = vcombine.high %v347_v13, %v351_v14  ;;  %v5935_v44 = vld [vmem:[%s7634_s2 + $0x24] ss:$8 sps:$4 sm:$0xff]  }
  0x80   : > { %2103 = vmatprep.subr.bf16.mxu0 %v5438_v19  ;;  %v359_v19 = vld [vmem:[%s7633_s1 + $0x3e8] sm:$0xff] }
  0x82   : > { %1892 = vmatpush1.bf16.msra.mxu1 %v5433_v52  ;;  %v307_v52 = vld [vmem:[%s7633_s1 + $0x248] sm:$0xff] }
  0x83   : > { %1893 = vmatprep.subr.bf16.mxu1 %v5442_v59  ;;  %2104 = vmatpush1.bf16.msra.mxu0 %v5437_v26  ;;  %v5268_v55 = vcombine.high %v307_v52, %v311_v53  ;;  %v5267_v59 = vcombine.low %v307_v52, %v311_v53  ;;  %v5324_v26 = vcombine.high %v363_v22, %v367_v23  ;;  %v411_v52 = vld [vmem:[%s7633_s1 + $0x588] sm:$0xff] }
  0x84   : > { %2105 = vmatprep.subr.bf16.mxu0 %v5446_v29  ;;  %v5323_v29 = vcombine.low %v363_v22, %v367_v23  ;;  %v415_v53 = vld [vmem:[%s7633_s1 + $0x5a8] sm:$0xff] }
  0x85   : > { %v5372_v58 = vcombine.high %v411_v52, %v415_v53  ;;  %v5953_v22 = vld [vmem:[%s7634_s2 + $0x84] ss:$8 sps:$4 sm:$0xff]  }
  0x86   : > { %1894 = vmatpush1.bf16.msra.mxu1 %v5441_v61  ;;  %v323_v61 = vld [vmem:[%s7633_s1 + $0x2c8] sm:$0xff] }
  0x87   : > { %1916 = vmatprep.subr.bf16.mxu1 %v5196_v5  ;;  %2106 = vmatpush1.bf16.msra.mxu0 %v5445_v32  ;;  %v5284_v1 = vcombine.high %v323_v61, %v327_v62  ;;  %v5283_v5 = vcombine.low %v323_v61, %v327_v62  ;;  %v383_v32 = vld [vmem:[%s7633_s1 + $0x4a8] sm:$0xff]  ;;  %v5371_v61 = vcombine.low %v411_v52, %v415_v53  ;;  %v237_v52 = vld [vmem:[%s7633_s1 + $0x18] sm:$0xff] }
  0x88   : > { %v5340_v37 = vcombine.high %v379_v31, %v383_v32  ;;  %v451_v23 = vld [vmem:[%s7633_s1 + $0x6c8] sm:$0xff]  ;;  %v241_v53 = vld [vmem:[%s7633_s1 + $0x38] sm:$0xff] }
  0x89   : > { %1896 = vmatmul.mubr.bf16.vlgmr.msra.gmra.mrb[0].mxu1 %v6615_v4 }
  0x8a   : > { %1917 = vmatpush1.bf16.msra.mxu1 %v5195_v7  ;;  %1905 = vmatprep.mubr.bf16.mxu1 %v6618_v8  ;;  %v339_v7 = vld [vmem:[%s7633_s1 + $0x348] sm:$0xff] }
  0x8b   : > { %1918 = vmatprep.subr.bf16.mxu1 %v5204_v9  ;;  %2108 = vmatmul.mubr.bf16.vlgmr.msra.gmra.mrb[0].mxu0 %v6615_v4  ;;  %v343_v9 = vld [vmem:[%s7633_s1 + $0x368] sm:$0xff] }
  0x8c   : > { %2117 = vmatprep.mubr.bf16.mxu0 %v6618_v8  ;;  %v5300_v12 = vcombine.high %v339_v7, %v343_v9  ;;  %v5299_v15 = vcombine.low %v339_v7, %v343_v9  ;;  %v5947_v7 = vld [vmem:[%s7634_s2 + $0x64] ss:$8 sps:$4 sm:$0xff]  }
  0x8d   : > { %v435_v9 = vld [vmem:[%s7633_s1 + $0x648] sm:$0xff] }
  0x8e   : > { %1919 = vmatpush1.bf16.msra.mxu1 %v5203_v17  ;;  %v355_v17 = vld [vmem:[%s7633_s1 + $0x3c8] sm:$0xff] }
  0x8f   : > { %1920 = vmatprep.subr.bf16.mxu1 %v5212_v20  ;;  %v5307_v20 = vcombine.low %v347_v13, %v351_v14  ;;  %v5316_v21 = vcombine.high %v355_v17, %v359_v19  ;;  %v5315_v24 = vcombine.low %v355_v17, %v359_v19  ;;  %v447_v17 = vld [vmem:[%s7633_s1 + $0x6a8] sm:$0xff]  ;;  %v5948_v19 = vld [vmem:[%s7634_s2 + $0x70] ss:$8 sps:$4 sm:$0xff]  }
  0x91   : > { %1906 = vmatmul.mubr.bf16.gmra.mrb[4].mxu1 %v6647_v25 }
  0x92   : > { %1921 = vmatpush1.bf16.msra.mxu1 %v5211_v27  ;;  %1948 = vmatprep.mubr.bf16.mxu1 %v6657_v34  ;;  %v371_v27 = vld [vmem:[%s7633_s1 + $0x448] sm:$0xff] }
  0x93   : > { %1922 = vmatprep.subr.bf16.mxu1 %v5220_v28  ;;  %2118 = vmatmul.mubr.bf16.gmra.mrb[4].mxu0 %v6647_v25  ;;  %v375_v28 = vld [vmem:[%s7633_s1 + $0x468] sm:$0xff] }
  0x94   : > { %v5332_v30 = vcombine.high %v371_v27, %v375_v28 }
  0x96   : > { %1923 = vmatpush1.bf16.msra.mxu1 %v5219_v33  ;;  %v5929_v33 = vld [vmem:[%s7634_s2 + $0x4] ss:$8 sps:$4 sm:$0xff]  }
  0x97   : > { %1924 = vmatprep.subr.bf16.mxu1 %v5228_v35  ;;  %v5331_v35 = vcombine.low %v371_v27, %v375_v28  ;;  %4142 = vmatprep.subr.bf16.mxu0 %v5929_v33  ;;  %v6161_v28 = vmov 0   ;;  %v5954_v33 = vld [vmem:[%s7634_s2 + $0x90] ss:$8 sps:$4 sm:$0xff]  }
  0x98   : > { %4143 = vmatpush1.bf16.msra.mxu0 %v5927_v36  ;;  %2266 = vst [vmem:[#allocation3] sm:$0x33] %v6161_v28  ;;  %2267 = vst [vmem:[#allocation3 + $0x8] sm:$0x33] %v6161_v28 }
  0x99   : > { %2268 = vst [vmem:[#allocation3 + $0x10] sm:$0x33] %v6161_v28  ;;  %2269 = vst [vmem:[#allocation3 + $0x18] sm:$0x33] %v6161_v28 }
  0x9a   : > { %1925 = vmatpush1.bf16.msra.mxu1 %v5227_v38  ;;  %v387_v38 = vld [vmem:[%s7633_s1 + $0x4c8] sm:$0xff]  ;;  %4791 = vst [vmem:[#allocation7] sm:$0x3] %v6161_v28  ;;  %v301_v28 = vld [vmem:[%s7633_s1 + $0x218] sm:$0xff] }
  0x9b   : > { %1926 = vmatprep.subr.bf16.mxu1 %v5236_v39  ;;  %v5339_v39 = vcombine.low %v379_v31, %v383_v32  ;;  %v459_v31 = vld [vmem:[%s7633_s1 + $0x708] sm:$0xff] }
  0x9c   : > { %v463_v32 = vld [vmem:[%s7633_s1 + $0x728] sm:$0xff] }
  0x9d   : > { %v5420_v36 = vcombine.high %v459_v31, %v463_v32 }
  0x9e   : > { %1927 = vmatpush1.bf16.msra.mxu1 %v5235_v42  ;;  %v395_v42 = vld [vmem:[%s7633_s1 + $0x508] sm:$0xff] }
  0x9f   : > { %1928 = vmatprep.subr.bf16.mxu1 %v5244_v43  ;;  %v399_v43 = vld [vmem:[%s7633_s1 + $0x528] sm:$0xff] }
  0xa0   : > { %v5355_v49 = vcombine.low %v395_v42, %v399_v43 }
  0xa2   : > { %1929 = vmatpush1.bf16.msra.mxu1 %v5243_v46  ;;  %v5933_v46 = vld [vmem:[%s7634_s2 + $0x20] ss:$8 sps:$4 sm:$0xff]  }
  0xa3   : > { %1930 = vmatprep.subr.bf16.mxu1 %v5252_v47  ;;  %v5356_v47 = vcombine.high %v395_v42, %v399_v43  ;;  %v475_v42 = vld [vmem:[%s7633_s1 + $0x788] sm:$0xff] }
  0xa4   : > { %v479_v43 = vld [vmem:[%s7633_s1 + $0x7a8] sm:$0xff] }
  0xa6   : > { %1931 = vmatpush1.bf16.msra.mxu1 %v5251_v50  ;;  %v5936_v50 = vld [vmem:[%s7634_s2 + $0x30] ss:$8 sps:$4 sm:$0xff]  }
  0xa7   : > { %1932 = vmatprep.subr.bf16.mxu1 %v5260_v51 }
  0xaa   : > { %1933 = vmatpush1.bf16.msra.mxu1 %v5259_v54  ;;  %v5941_v54 = vld [vmem:[%s7634_s2 + $0x44] ss:$8 sps:$4 sm:$0xff]  }
  0xab   : > { %1934 = vmatprep.subr.bf16.mxu1 %v5268_v55 }
  0xae   : > { %1935 = vmatpush1.bf16.msra.mxu1 %v5267_v59  ;;  %v419_v59 = vld [vmem:[%s7633_s1 + $0x5c8] sm:$0xff] }
  0xaf   : > { %1936 = vmatprep.subr.bf16.mxu1 %v5276_v60  ;;  %v423_v60 = vld [vmem:[%s7633_s1 + $0x5e8] sm:$0xff] }
  0xb0   : > { %v5380_v62 = vcombine.high %v419_v59, %v423_v60 }
  0xb2   : > { %1937 = vmatpush1.bf16.msra.mxu1 %v5275_v63  ;;  %v5944_v63 = vld [vmem:[%s7634_s2 + $0x54] ss:$8 sps:$4 sm:$0xff]  }
  0xb3   : > { %1938 = vmatprep.subr.bf16.mxu1 %v5284_v1  ;;  %v427_v1 = vld [vmem:[%s7633_s1 + $0x608] sm:$0xff] }
  0xb4   : > { %v5387_v13 = vcombine.low %v427_v1, %v431_v2 }
  0xb6   : > { %1939 = vmatpush1.bf16.msra.mxu1 %v5283_v5  ;;  %v5379_v5 = vcombine.low %v419_v59, %v423_v60  ;;  %v245_v59 = vld [vmem:[%s7633_s1 + $0x58] sm:$0xff] }
  0xb7   : > { %1940 = vmatprep.subr.bf16.mxu1 %v5292_v6  ;;  %v5388_v6 = vcombine.high %v427_v1, %v431_v2  ;;  %v249_v60 = vld [vmem:[%s7633_s1 + $0x78] sm:$0xff] }
  0xb8   : > { %v5974_v1 = vld [vmem:[%s7634_s2 + $0xf4] ss:$8 sps:$4 sm:$0xff]  }
  0xb9   : > { %v253_v2 = vld [vmem:[%s7633_s1 + $0x98] sm:$0xff] }
  0xba   : > { %1941 = vmatpush1.bf16.msra.mxu1 %v5291_v10  ;;  %v439_v10 = vld [vmem:[%s7633_s1 + $0x668] sm:$0xff] }
  0xbb   : > { %1942 = vmatprep.subr.bf16.mxu1 %v5300_v12  ;;  %v5945_v12 = vld [vmem:[%s7634_s2 + $0x60] ss:$8 sps:$4 sm:$0xff]   ;;  %v5396_v14 = vcombine.high %v435_v9, %v439_v10 }
  0xbe   : > { %1943 = vmatpush1.bf16.msra.mxu1 %v5299_v15  ;;  %v5950_v15 = vld [vmem:[%s7634_s2 + $0x74] ss:$8 sps:$4 sm:$0xff]  }
  0xbf   : > { %1944 = vmatprep.subr.bf16.mxu1 %v5308_v16  ;;  %v443_v16 = vld [vmem:[%s7633_s1 + $0x688] sm:$0xff] }
  0xc0   : > { %v5403_v27 = vcombine.low %v443_v16, %v447_v17 }
  0xc2   : > { %1945 = vmatpush1.bf16.msra.mxu1 %v5307_v20  ;;  %v5395_v20 = vcombine.low %v435_v9, %v439_v10  ;;  %v261_v9 = vld [vmem:[%s7633_s1 + $0xd8] sm:$0xff] }
  0xc3   : > { %1946 = vmatprep.subr.bf16.mxu1 %v5316_v21  ;;  %v5404_v21 = vcombine.high %v443_v16, %v447_v17  ;;  %v265_v10 = vld [vmem:[%s7633_s1 + $0xf8] sm:$0xff] }
  0xc4   : > { %v277_v16 = vld [vmem:[%s7633_s1 + $0x158] sm:$0xff] }
  0xc5   : > { %v281_v17 = vld [vmem:[%s7633_s1 + $0x178] sm:$0xff] }
  0xc6   : > { %1947 = vmatpush1.bf16.msra.mxu1 %v5315_v24  ;;  %v455_v24 = vld [vmem:[%s7633_s1 + $0x6e8] sm:$0xff] }
  0xc7   : > { %1969 = vmatprep.subr.bf16.mxu1 %v5324_v26  ;;  %v5951_v26 = vld [vmem:[%s7634_s2 + $0x80] ss:$8 sps:$4 sm:$0xff]  }
  0xc9   : > { %1949 = vmatmul.mubr.bf16.vlgmr.msra.gmra.mrb[8].mxu1 %v6397_v57  ;;  %v391_v57 = vld [vmem:[%s7633_s1 + $0x4e8] sm:$0xff] }
  0xca   : > { %1970 = vmatpush1.bf16.msra.mxu1 %v5323_v29  ;;  %1958 = vmatprep.mubr.bf16.mxu1 %v6412_v0  ;;  %v5932_v0 = vld [vmem:[%s7634_s2 + $0x14] ss:$8 sps:$4 sm:$0xff]   ;;  %v5348_v41 = vcombine.high %v387_v38, %v391_v57  ;;  %v5347_v45 = vcombine.low %v387_v38, %v391_v57  ;;  %v5412_v29 = vcombine.high %v451_v23, %v455_v24  ;;  %v467_v38 = vld [vmem:[%s7633_s1 + $0x748] sm:$0xff] }
  0xcb   : > { %1971 = vmatprep.subr.bf16.mxu1 %v5332_v30  ;;  %4144 = vmatprep.subr.bf16.mxu0 %v5932_v0  ;;  %v5956_v30 = vld [vmem:[%s7634_s2 + $0x94] ss:$8 sps:$4 sm:$0xff]   ;;  %v471_v57 = vld [vmem:[%s7633_s1 + $0x768] sm:$0xff] }
  0xcc   : > { %4145 = vmatpush1.bf16.msra.mxu0 %v5930_v40  ;;  %v5957_v0 = vld [vmem:[%s7634_s2 + $0xa0] ss:$8 sps:$4 sm:$0xff]   ;;  %v5428_v40 = vcombine.high %v467_v38, %v471_v57 }
  0xcd   : > { %4146 = vmatprep.subr.bf16.mxu0 %v5935_v44  ;;  %v5960_v44 = vld [vmem:[%s7634_s2 + $0xb0] ss:$8 sps:$4 sm:$0xff]  }
  0xce   : > { %1972 = vmatpush1.bf16.msra.mxu1 %v5331_v35  ;;  %v5411_v35 = vcombine.low %v451_v23, %v455_v24  ;;  %v293_v23 = vld [vmem:[%s7633_s1 + $0x1d8] sm:$0xff] }
  0xcf   : > { %1973 = vmatprep.subr.bf16.mxu1 %v5340_v37  ;;  %v5959_v37 = vld [vmem:[%s7634_s2 + $0xa4] ss:$8 sps:$4 sm:$0xff]   ;;  %v297_v24 = vld [vmem:[%s7633_s1 + $0x1f8] sm:$0xff] }
  0xd0   : > { %4147 = vmatpush1.bf16.msra.mxu0 %v5933_v46  ;;  %v5436_v46 = vcombine.high %v475_v42, %v479_v43 }
  0xd1   : > { %1959 = vmatmul.mubr.bf16.gmra.mrb[12].mxu1 %v6429_v11  ;;  %v407_v11 = vld [vmem:[%s7633_s1 + $0x568] sm:$0xff] }
  0xd2   : > { %1974 = vmatpush1.bf16.msra.mxu1 %v5339_v39  ;;  %2001 = vmatprep.mubr.bf16.mxu1 %v6444_v18  ;;  %v5938_v18 = vld [vmem:[%s7634_s2 + $0x34] ss:$8 sps:$4 sm:$0xff]   ;;  %v5364_v51 = vcombine.high %v403_v48, %v407_v11  ;;  %v5363_v55 = vcombine.low %v403_v48, %v407_v11  ;;  %v5419_v39 = vcombine.low %v459_v31, %v463_v32  ;;  %v483_v48 = vld [vmem:[%s7633_s1 + $0x7c8] sm:$0xff] }
  0xd3   : > { %1975 = vmatprep.subr.bf16.mxu1 %v5348_v41  ;;  %4148 = vmatprep.subr.bf16.mxu0 %v5938_v18  ;;  %v5962_v41 = vld [vmem:[%s7634_s2 + $0xb4] ss:$8 sps:$4 sm:$0xff]   ;;  %v487_v11 = vld [vmem:[%s7633_s1 + $0x7e8] sm:$0xff] }
  0xd4   : > { %4149 = vmatpush1.bf16.msra.mxu0 %v5936_v50  ;;  %v5963_v18 = vld [vmem:[%s7634_s2 + $0xc0] ss:$8 sps:$4 sm:$0xff]   ;;  %v5444_v50 = vcombine.high %v483_v48, %v487_v11  ;;  %v309_v32 = vld [vmem:[%s7633_s1 + $0x258] sm:$0xff] }
  0xd5   : > { %4150 = vmatprep.subr.bf16.mxu0 %v5941_v54  ;;  %v5966_v54 = vld [vmem:[%s7634_s2 + $0xd0] ss:$8 sps:$4 sm:$0xff]  }
  0xd6   : > { %1976 = vmatpush1.bf16.msra.mxu1 %v5347_v45  ;;  %v5427_v45 = vcombine.low %v467_v38, %v471_v57  ;;  %v321_v38 = vld [vmem:[%s7633_s1 + $0x2b8] sm:$0xff] }
  0xd7   : > { %1977 = vmatprep.subr.bf16.mxu1 %v5356_v47  ;;  %v5965_v47 = vld [vmem:[%s7634_s2 + $0xc4] ss:$8 sps:$4 sm:$0xff]  }
  0xd8   : > { %4151 = vmatpush1.bf16.msra.mxu0 %v5939_v56  ;;  %v5200_v56 = vcombine.high %v237_v52, %v241_v53 }
  0xd9   : > { %4152 = vmatprep.subr.bf16.mxu0 %v5944_v63  ;;  %v5208_v63 = vcombine.high %v245_v59, %v249_v60 }
  0xda   : > { %1978 = vmatpush1.bf16.msra.mxu1 %v5355_v49  ;;  %v5435_v49 = vcombine.low %v475_v42, %v479_v43  ;;  %v333_v43 = vld [vmem:[%s7633_s1 + $0x318] sm:$0xff] }
  0xdb   : > { %1979 = vmatprep.subr.bf16.mxu1 %v5364_v51  ;;  %v5968_v51 = vld [vmem:[%s7634_s2 + $0xd4] ss:$8 sps:$4 sm:$0xff]  }
  0xdc   : > { %4153 = vmatpush1.bf16.msra.mxu0 %v5942_v3  ;;  %v257_v3 = vld [vmem:[%s7633_s1 + $0xb8] sm:$0xff] }
  0xdd   : > { %4154 = vmatprep.subr.bf16.mxu0 %v5947_v7  ;;  %v5216_v7 = vcombine.high %v253_v2, %v257_v3 }
  0xde   : > { %1980 = vmatpush1.bf16.msra.mxu1 %v5363_v55  ;;  %v5443_v55 = vcombine.low %v483_v48, %v487_v11  ;;  %v341_v48 = vld [vmem:[%s7633_s1 + $0x358] sm:$0xff] }
  0xdf   : > { %1981 = vmatprep.subr.bf16.mxu1 %v5372_v58  ;;  %v5971_v58 = vld [vmem:[%s7634_s2 + $0xe4] ss:$8 sps:$4 sm:$0xff]   ;;  %v345_v11 = vld [vmem:[%s7633_s1 + $0x378] sm:$0xff] }
  0xe0   : > { %4155 = vmatpush1.bf16.msra.mxu0 %v5945_v12  ;;  %v5215_v12 = vcombine.low %v253_v2, %v257_v3 }
  0xe1   : > { %4156 = vmatprep.subr.bf16.mxu0 %v5950_v15 }
  0xe2   : > { %1982 = vmatpush1.bf16.msra.mxu1 %v5371_v61  ;;  %v5969_v61 = vld [vmem:[%s7634_s2 + $0xe0] ss:$8 sps:$4 sm:$0xff]  }
  0xe3   : > { %1983 = vmatprep.subr.bf16.mxu1 %v5380_v62  ;;  %v5199_v62 = vcombine.low %v237_v52, %v241_v53  ;;  %v5303_v52 = vcombine.low %v341_v48, %v345_v11 }
  0xe4   : > { %4157 = vmatpush1.bf16.msra.mxu0 %v5948_v19 }
  0xe5   : > { %4158 = vmatprep.subr.bf16.mxu0 %v5953_v22 }
  0xe6   : > { %1984 = vmatpush1.bf16.msra.mxu1 %v5379_v5  ;;  %v5972_v5 = vld [vmem:[%s7634_s2 + $0xf0] ss:$8 sps:$4 sm:$0xff]  }
  0xe7   : > { %1985 = vmatprep.subr.bf16.mxu1 %v5388_v6  ;;  %v5207_v6 = vcombine.low %v245_v59, %v249_v60  ;;  %v365_v59 = vld [vmem:[%s7633_s1 + $0x418] sm:$0xff] }
  0xe8   : > { %4159 = vmatpush1.bf16.msra.mxu0 %v5951_v26  ;;  %v369_v60 = vld [vmem:[%s7633_s1 + $0x438] sm:$0xff] }
  0xe9   : > { %4160 = vmatprep.subr.bf16.mxu0 %v5956_v30  ;;  %v5255_v30 = vcombine.low %v293_v23, %v297_v24  ;;  %v5327_v2 = vcombine.low %v365_v59, %v369_v60 }
  0xea   : > { %1986 = vmatpush1.bf16.msra.mxu1 %v5387_v13  ;;  %v269_v13 = vld [vmem:[%s7633_s1 + $0x118] sm:$0xff] }
  0xeb   : > { %1987 = vmatprep.subr.bf16.mxu1 %v5396_v14  ;;  %v5223_v14 = vcombine.low %v261_v9, %v265_v10 }
  0xec   : > { %4161 = vmatpush1.bf16.msra.mxu0 %v5954_v33  ;;  %v313_v33 = vld [vmem:[%s7633_s1 + $0x278] sm:$0xff] }
  0xed   : > { %4162 = vmatprep.subr.bf16.mxu0 %v5959_v37  ;;  %v317_v37 = vld [vmem:[%s7633_s1 + $0x298] sm:$0xff]  ;;  %v5271_v57 = vcombine.low %v309_v32, %v313_v33 }
  0xee   : > { %1988 = vmatpush1.bf16.msra.mxu1 %v5395_v20  ;;  %v5240_v20 = vcombine.high %v277_v16, %v281_v17 }
  0xef   : > { %1989 = vmatprep.subr.bf16.mxu1 %v5404_v21  ;;  %v5239_v21 = vcombine.low %v277_v16, %v281_v17  ;;  %v401_v16 = vld [vmem:[%s7633_s1 + $0x538] sm:$0xff]  ;;  %v6148_v17 = vld [vmem:[%s6231_s14 + $0x20] ss:$16 sps:$4 sm:$0xff]  }
  0xf0   : > { %4163 = vmatpush1.bf16.msra.mxu0 %v5957_v0  ;;  %v5280_v0 = vcombine.high %v317_v37, %v321_v38 }
  0xf1   : > { %4164 = vmatprep.subr.bf16.mxu0 %v5962_v41  ;;  %v5279_v41 = vcombine.low %v317_v37, %v321_v38  ;;  %v429_v38 = vld [vmem:[%s7633_s1 + $0x618] sm:$0xff] }
  0xf2   : > { %1990 = vmatpush1.bf16.msra.mxu1 %v5403_v27  ;;  %v5256_v27 = vcombine.high %v293_v23, %v297_v24  ;;  %v413_v24 = vld [vmem:[%s7633_s1 + $0x598] sm:$0xff] }
  0xf3   : > { %1991 = vmatprep.subr.bf16.mxu1 %v5412_v29  ;;  %v305_v29 = vld [vmem:[%s7633_s1 + $0x238] sm:$0xff] }
  0xf4   : > { %4165 = vmatpush1.bf16.msra.mxu0 %v5960_v44  ;;  %v5264_v31 = vcombine.high %v301_v28, %v305_v29  ;;  %v337_v44 = vld [vmem:[%s7633_s1 + $0x338] sm:$0xff] }
  0xf5   : > { %4166 = vmatprep.subr.bf16.mxu0 %v5965_v47  ;;  %v5977_v47 = vld [vmem:[%s7634_s2 + $0x104] ss:$8 sps:$4 sm:$0xff]  }
  0xf6   : > { %1992 = vmatpush1.bf16.msra.mxu1 %v5411_v35  ;;  %v5263_v35 = vcombine.low %v301_v28, %v305_v29 }
  0xf7   : > { %1993 = vmatprep.subr.bf16.mxu1 %v5420_v36  ;;  %v5272_v36 = vcombine.high %v309_v32, %v313_v33 }
  0xf8   : > { %4167 = vmatpush1.bf16.msra.mxu0 %v5963_v18  ;;  %v5295_v18 = vcombine.low %v333_v43, %v337_v44 }
  0xf9   : > { %4168 = vmatprep.subr.bf16.mxu0 %v5968_v51  ;;  %v353_v51 = vld [vmem:[%s7633_s1 + $0x3b8] sm:$0xff] }
  0xfa   : > { %1994 = vmatpush1.bf16.msra.mxu1 %v5419_v39  ;;  %v325_v39 = vld [vmem:[%s7633_s1 + $0x2d8] sm:$0xff] }
  0xfb   : > { %1995 = vmatprep.subr.bf16.mxu1 %v5428_v40  ;;  %v329_v40 = vld [vmem:[%s7633_s1 + $0x2f8] sm:$0xff] }
  0xfc   : > { %4169 = vmatpush1.bf16.msra.mxu0 %v5966_v54  ;;  %v5288_v42 = vcombine.high %v325_v39, %v329_v40  ;;  %v357_v54 = vld [vmem:[%s7633_s1 + $0x3d8] sm:$0xff] }
  0xfd   : > { %4170 = vmatprep.subr.bf16.mxu0 %v5971_v58 }
  0xfe   : > { %1996 = vmatpush1.bf16.msra.mxu1 %v5427_v45  ;;  %v5287_v45 = vcombine.low %v325_v39, %v329_v40  ;;  %v437_v40 = vld [vmem:[%s7633_s1 + $0x658] sm:$0xff] }
  0xff   : > { %1997 = vmatprep.subr.bf16.mxu1 %v5436_v46  ;;  %v5296_v46 = vcombine.high %v333_v43, %v337_v44  ;;  %v441_v44 = vld [vmem:[%s7633_s1 + $0x678] sm:$0xff] }
 0x100   : > { %4171 = vmatpush1.bf16.msra.mxu0 %v5969_v61 }
 0x101   : > { %4172 = vmatprep.subr.bf16.mxu0 %v5974_v1  ;;  %v377_v1 = vld [vmem:[%s7633_s1 + $0x478] sm:$0xff] }
 0x102   : > { %1998 = vmatpush1.bf16.msra.mxu1 %v5435_v49  ;;  %v5304_v49 = vcombine.high %v341_v48, %v345_v11  ;;  %v6162_v11 = vmov 0.0  }
 0x103   : > { %1999 = vmatprep.subr.bf16.mxu1 %v5444_v50  ;;  %v349_v50 = vld [vmem:[%s7633_s1 + $0x398] sm:$0xff] }
 0x104   : > { %4173 = vmatpush1.bf16.msra.mxu0 %v5972_v5  ;;  %v5312_v53 = vcombine.high %v349_v50, %v353_v51  ;;  %v381_v5 = vld [vmem:[%s7633_s1 + $0x498] sm:$0xff] }
 0x105   : > { %4195 = vmatprep.subr.bf16.mxu0 %v5977_v47 }
 0x106   : > { %2000 = vmatpush1.bf16.msra.mxu1 %v5443_v55  ;;  %v361_v55 = vld [vmem:[%s7633_s1 + $0x3f8] sm:$0xff] }
 0x107   : > { %2128 = vmatprep.subr.bf16.mxu1 %v5200_v56  ;;  %v5311_v56 = vcombine.low %v349_v50, %v353_v51  ;;  %v5320_v58 = vcombine.high %v357_v54, %v361_v55  ;;  %v5319_v61 = vcombine.low %v357_v54, %v361_v55 }
 0x109   : > { %2002 = vmatmul.mubr.bf16.vlgmr.msra.gmra.mrb[8].mxu1 %v6615_v4  ;;  %v5224_v4 = vcombine.high %v261_v9, %v265_v10  ;;  %v6147_v10 = vld [vmem:[%s6231_s14 + $0x24] ss:$16 sps:$4 sm:$0xff]  }
 0x10a   : > { %2129 = vmatpush1.bf16.msra.mxu1 %v5199_v62  ;;  %2011 = vmatprep.mubr.bf16.mxu1 %v6618_v8  ;;  %v273_v8 = vld [vmem:[%s7633_s1 + $0x138] sm:$0xff]  ;;  %v5328_v62 = vcombine.high %v365_v59, %v369_v60 }
 0x10b   : > { %2130 = vmatprep.subr.bf16.mxu1 %v5208_v63  ;;  %v5232_v15 = vcombine.high %v269_v13, %v273_v8  ;;  %v5231_v19 = vcombine.low %v269_v13, %v273_v8  ;;  %v373_v63 = vld [vmem:[%s7633_s1 + $0x458] sm:$0xff] }
 0x10c   : > { %v5336_v3 = vcombine.high %v373_v63, %v377_v1  ;;  %v5335_v9 = vcombine.low %v373_v63, %v377_v1  ;;  %v393_v13 = vld [vmem:[%s7633_s1 + $0x4f8] sm:$0xff] }
 0x10d   : > { %v449_v63 = vld [vmem:[%s7633_s1 + $0x6b8] sm:$0xff] }
 0x10e   : > { %2131 = vmatpush1.bf16.msra.mxu1 %v5207_v6  ;;  %v385_v6 = vld [vmem:[%s7633_s1 + $0x4b8] sm:$0xff] }
 0x10f   : > { %2132 = vmatprep.subr.bf16.mxu1 %v5216_v7  ;;  %v6146_v7 = vld [vmem:[%s6231_s14] ss:$16 sps:$4 sm:$0xff]   ;;  %v5343_v8 = vcombine.low %v381_v5, %v385_v6 }
 0x111   : > { %2012 = vmatmul.mubr.bf16.gmra.mrb[12].mxu1 %v6647_v25  ;;  %v285_v25 = vld [vmem:[%s7633_s1 + $0x198] sm:$0xff] }
 0x112   : > { %2133 = vmatpush1.bf16.msra.mxu1 %v5215_v12  ;;  %2160 = vmatprep.mubr.bf16.mxu1 %v6657_v34  ;;  %v289_v34 = vld [vmem:[%s7633_s1 + $0x1b8] sm:$0xff]  ;;  %v5344_v12 = vcombine.high %v381_v5, %v385_v6  ;;  %v5399_v5 = vcombine.low %v437_v40, %v441_v44 }
 0x113   : > { %2134 = vmatprep.subr.bf16.mxu1 %v5224_v4  ;;  %v5248_v22 = vcombine.high %v285_v25, %v289_v34  ;;  %v5247_v26 = vcombine.low %v285_v25, %v289_v34  ;;  %v389_v4 = vld [vmem:[%s7633_s1 + $0x4d8] sm:$0xff] }
 0x114   : > { %v405_v34 = vld [vmem:[%s7633_s1 + $0x558] sm:$0xff] }
 0x116   : > { %2135 = vmatpush1.bf16.msra.mxu1 %v5223_v14  ;;  %v5352_v14 = vcombine.high %v389_v4, %v393_v13 }
 0x117   : > { %2136 = vmatprep.subr.bf16.mxu1 %v5232_v15  ;;  %v397_v15 = vld [vmem:[%s7633_s1 + $0x518] sm:$0xff] }
 0x118   : > { %v5360_v25 = vcombine.high %v397_v15, %v401_v16 }
 0x11a   : > { %2137 = vmatpush1.bf16.msra.mxu1 %v5231_v19  ;;  %v5351_v19 = vcombine.low %v389_v4, %v393_v13  ;;  %v453_v13 = vld [vmem:[%s7633_s1 + $0x6d8] sm:$0xff] }
 0x11b   : > { %2138 = vmatprep.subr.bf16.mxu1 %v5240_v20  ;;  %v6149_v20 = vld [vmem:[%s6231_s14 + $0xc] ss:$16 sps:$4 sm:$0xff]  }
 0x11e   : > { %2139 = vmatpush1.bf16.msra.mxu1 %v5239_v21  ;;  %v409_v21 = vld [vmem:[%s7633_s1 + $0x578] sm:$0xff] }
 0x11f   : > { %2140 = vmatprep.subr.bf16.mxu1 %v5248_v22  ;;  %v5359_v22 = vcombine.low %v397_v15, %v401_v16  ;;  %v5368_v23 = vcombine.high %v405_v34, %v409_v21 }
 0x122   : > { %2141 = vmatpush1.bf16.msra.mxu1 %v5247_v26  ;;  %v417_v26 = vld [vmem:[%s7633_s1 + $0x5b8] sm:$0xff] }
 0x123   : > { %2142 = vmatprep.subr.bf16.mxu1 %v5256_v27  ;;  %v5367_v27 = vcombine.low %v405_v34, %v409_v21  ;;  %v5376_v28 = vcombine.high %v413_v24, %v417_v26 }
 0x126   : > { %2143 = vmatpush1.bf16.msra.mxu1 %v5255_v30  ;;  %v421_v30 = vld [vmem:[%s7633_s1 + $0x5d8] sm:$0xff] }
 0x127   : > { %2144 = vmatprep.subr.bf16.mxu1 %v5264_v31  ;;  %v425_v31 = vld [vmem:[%s7633_s1 + $0x5f8] sm:$0xff] }
 0x128   : > { %v5384_v37 = vcombine.high %v421_v30, %v425_v31 }
 0x12a   : > { %2145 = vmatpush1.bf16.msra.mxu1 %v5263_v35  ;;  %v5375_v35 = vcombine.low %v413_v24, %v417_v26 }
 0x12b   : > { %2146 = vmatprep.subr.bf16.mxu1 %v5272_v36 }
 0x12e   : > { %2147 = vmatpush1.bf16.msra.mxu1 %v5271_v57  ;;  %v433_v57 = vld [vmem:[%s7633_s1 + $0x638] sm:$0xff] }
 0x12f   : > { %2148 = vmatprep.subr.bf16.mxu1 %v5280_v0  ;;  %v5383_v0 = vcombine.low %v421_v30, %v425_v31  ;;  %v5392_v39 = vcombine.high %v429_v38, %v433_v57  ;;  %v5391_v51 = vcombine.low %v429_v38, %v433_v57 }
 0x132   : > { %2149 = vmatpush1.bf16.msra.mxu1 %v5279_v41 }
 0x133   : > { %2150 = vmatprep.subr.bf16.mxu1 %v5288_v42 }
 0x136   : > { %2151 = vmatpush1.bf16.msra.mxu1 %v5287_v45 }
 0x137   : > { %2152 = vmatprep.subr.bf16.mxu1 %v5296_v46 }
 0x13a   : > { %2153 = vmatpush1.bf16.msra.mxu1 %v5295_v18 }
 0x13b   : > { %2154 = vmatprep.subr.bf16.mxu1 %v5304_v49 }
 0x13e   : > { %2155 = vmatpush1.bf16.msra.mxu1 %v5303_v52 }
 0x13f   : > { %2156 = vmatprep.subr.bf16.mxu1 %v5312_v53 }
 0x142   : > { %2157 = vmatpush1.bf16.msra.mxu1 %v5311_v56  ;;  %v5400_v56 = vcombine.high %v437_v40, %v441_v44 }
 0x143   : > { %2158 = vmatprep.subr.bf16.mxu1 %v5320_v58 }
 0x146   : > { %2159 = vmatpush1.bf16.msra.mxu1 %v5319_v61 }
 0x147   : > { %2181 = vmatprep.subr.bf16.mxu1 %v5328_v62  ;;  %v445_v62 = vld [vmem:[%s7633_s1 + $0x698] sm:$0xff] }
 0x149   : > { %2161 = vmatmul.mubr.bf16.vlgmr.msra.gmra.mrb[16].mxu1 %v6146_v7 }
 0x14a   : > { %2182 = vmatpush1.bf16.msra.mxu1 %v5327_v2  ;;  %2170 = vmatprep.mubr.bf16.mxu1 %v6147_v10 }
 0x14b   : > { %2183 = vmatprep.subr.bf16.mxu1 %v5336_v3 }
 0x14e   : > { %2184 = vmatpush1.bf16.msra.mxu1 %v5335_v9  ;;  %v5408_v9 = vcombine.high %v445_v62, %v449_v63 }
 0x14f   : > { %2185 = vmatprep.subr.bf16.mxu1 %v5344_v12 }
 0x151   : > { %2171 = vmatmul.mubr.bf16.gmra.mrb[20].mxu1 %v6148_v17  ;;  %v5407_v17 = vcombine.low %v445_v62, %v449_v63 }
 0x152   : > { %2186 = vmatpush1.bf16.msra.mxu1 %v5343_v8  ;;  %2213 = vmatprep.mubr.bf16.mxu1 %v6149_v20  ;;  %v457_v8 = vld [vmem:[%s7633_s1 + $0x6f8] sm:$0xff] }
 0x153   : > { %2187 = vmatprep.subr.bf16.mxu1 %v5352_v14 }
 0x156   : > { %2188 = vmatpush1.bf16.msra.mxu1 %v5351_v19 }
 0x157   : > { %2189 = vmatprep.subr.bf16.mxu1 %v5360_v25  ;;  %v5416_v25 = vcombine.high %v453_v13, %v457_v8 }
 0x15a   : > { %2190 = vmatpush1.bf16.msra.mxu1 %v5359_v22  ;;  %v7110_v22 = vld [vmem:[%s7633_s1 + $0x718] sm:$0xff] }
 0x15b   : > { %2191 = vmatprep.subr.bf16.mxu1 %v5368_v23  ;;  %v7115_v23 = vld [vmem:[%s7633_s1 + $0x738] sm:$0xff] }
 0x15c   : > { %v1897_v29 = vpop.f32.mrb[0].mxu1  ;;  %v5423_v57 = vcombine.low %v7110_v22, %v7115_v23 }
 0x15d   : > { %2234 = vst [vmem:[#allocation2] sm:$0xff] %v1897_v29  ;;  %v1899_v32 = vpop.f32.mrb[1].mxu1  ;;  %v7121_v29 = vld [vmem:[%s7633_s1 + $0x758] sm:$0xff] }
 0x15e   : > { %2235 = vst [vmem:[#allocation2 + $0x8] sm:$0xff] %v1899_v32  ;;  %v1901_v33 = vpop.f32.mrb[2].mxu1  ;;  %2192 = vmatpush1.bf16.msra.mxu1 %v5367_v27  ;;  %v2109_v10 = vpop.f32.mrb[0].mxu0  ;;  %v5415_v32 = vcombine.low %v453_v13, %v457_v8 }
 0x15f   : > { %2242 = vst [vmem:[#allocation2 + $0x40] sm:$0xff] %v1901_v33  ;;  %v1903_v36 = vpop.f32.mrb[3].mxu1  ;;  %2193 = vmatprep.subr.bf16.mxu1 %v5376_v28  ;;  %2238 = vst [vmem:[#allocation2 + $0x20] sm:$0xff] %v2109_v10  ;;  %v2111_v19 = vpop.f32.mrb[1].mxu0  ;;  %v7126_v33 = vld [vmem:[%s7633_s1 + $0x778] sm:$0xff] }
 0x160   : > { %2243 = vst [vmem:[#allocation2 + $0x48] sm:$0xff] %v1903_v36  ;;  %2239 = vst [vmem:[#allocation2 + $0x28] sm:$0xff] %v2111_v19  ;;  %v2113_v34 = vpop.f32.mrb[2].mxu0 }
 0x161   : > { %2246 = vst [vmem:[#allocation2 + $0x60] sm:$0xff] %v2113_v34  ;;  %v2115_v24 = vpop.f32.mrb[3].mxu0 }
 0x162   : > { %2194 = vmatpush1.bf16.msra.mxu1 %v5375_v35  ;;  %2247 = vst [vmem:[#allocation2 + $0x68] sm:$0xff] %v2115_v24  ;;  %v7131_v35 = vld [vmem:[%s7633_s1 + $0x798] sm:$0xff] }
 0x163   : > { %2195 = vmatprep.subr.bf16.mxu1 %v5384_v37 }
 0x164   : > { %v2270_v41 = vld [vmem:[#allocation2] sm:$0xf]  ;;  %v2382_v42 = vld [vmem:[#allocation2] sm:$0xf0]  ;;  %v1907_v43 = vpop.f32.mrb[4].mxu1 }
 0x165   : > { %vm2294_vm0 = vcmp.ge.f32.partialorder %v2270_v41, 1.25  ;;  %v2374_v45 = vmul.f32 0.75, %v2270_v41  ;;  %v2398_v46 = vrot.slane %v2382_v42, 4  ;;  %v2271_v47 = vld [vmem:[#allocation2 + $0x8] sm:$0xf]  ;;  %2250 = vst [vmem:[#allocation2 + $0x80] sm:$0xff] %v1907_v43 }
 0x166   : > { %v1909_v48 = vpop.f32.mrb[5].mxu1  ;;  %v5449_v18 = vsel %vm2294_vm0, 1.0, %v6162_v11  ;;  %vm2295_vm1 = vcmp.ge.f32.partialorder %v2271_v47, 1.25  ;;  %v2383_v49 = vld [vmem:[#allocation2 + $0x8] sm:$0xf0]  ;;  %2196 = vmatpush1.bf16.msra.mxu1 %v5383_v0  ;;  %v2375_v60 = vmul.f32 0.75, %v2271_v47  ;;  %v5424_v0 = vcombine.high %v7110_v22, %v7115_v23 }
 0x167   : > { %2251 = vst [vmem:[#allocation2 + $0x88] sm:$0xff] %v1909_v48  ;;  %v1911_v50 = vpop.f32.mrb[6].mxu1  ;;  %v2358_v52 = vsub.f32 1.0, %v5449_v18  ;;  %v2414_v53 = vadd.f32 %v2398_v46, %v2374_v45  ;;  %v5450_v54 = vsel %vm2295_vm1, 1.0, %v6162_v11  ;;  %2197 = vmatprep.subr.bf16.mxu1 %v5392_v39  ;;  %v2399_v61 = vrot.slane %v2383_v49, 4  ;;  %v7140_v39 = vld [vmem:[%s7633_s1 + $0x7b8] sm:$0xff] }
 0x168   : > { %2258 = vst [vmem:[#allocation2 + $0xc0] sm:$0xff] %v1911_v50  ;;  %v1913_v55 = vpop.f32.mrb[7].mxu1  ;;  %v5755_v58 = vpack.c.bf16 %v5450_v54, %v5449_v18  ;;  %v2359_v59 = vsub.f32 1.0, %v5450_v54  ;;  %v2522_v16 = vld [vmem:[#allocation2 + $0x40] sm:$0xf]  ;;  %v2119_v46 = vpop.f32.mrb[4].mxu0 }
 0x169   : > { %2259 = vst [vmem:[#allocation2 + $0xc8] sm:$0xff] %v1913_v55  ;;  %v2366_v1 = vmul.f32 %v2358_v52, %v2270_v41  ;;  %v2514_v7 = vmul.f32 0.75, %v2414_v53  ;;  %v2415_v12 = vadd.f32 %v2399_v61, %v2375_v60  ;;  %v2642_v30 = vld [vmem:[#allocation2 + $0x40] sm:$0xf0]  ;;  %v2274_v40 = vld [vmem:[#allocation2 + $0x20] sm:$0xf]  ;;  %v5431_v52 = vcombine.low %v7121_v29, %v7126_v33 }
 0x16a   : > { %v2346_v2 = vrot.slane %v5755_v58, 6  ;;  %v2367_v3 = vmul.f32 %v2359_v59, %v2271_v47  ;;  %2198 = vmatpush1.bf16.msra.mxu1 %v5391_v51  ;;  %v2386_v41 = vld [vmem:[#allocation2 + $0x20] sm:$0xf0]  ;;  %v2523_v43 = vld [vmem:[#allocation2 + $0x48] sm:$0xf]  ;;  %vm2298_vm4 = vcmp.ge.f32.partialorder %v2274_v40, 1.25  ;;  %v5440_v60 = vcombine.high %v7131_v35, %v7140_v39 }
 0x16b   : > { %v2422_v6 = vmul.f32 0.97, %v2366_v1  ;;  %2199 = vmatprep.subr.bf16.mxu1 %v5400_v56  ;;  %v2530_v20 = vadd.f32 %v2522_v16, %v2514_v7  ;;  %v2515_v28 = vmul.f32 0.75, %v2415_v12  ;;  %v2378_v44 = vmul.f32 0.75, %v2274_v40  ;;  %2254 = vst [vmem:[#allocation2 + $0xa0] sm:$0xff] %v2119_v46  ;;  %v2121_v50 = vpop.f32.mrb[5].mxu0 }
 0x16c   : > { %v2423_v4 = vmul.f32 0.97, %v2367_v3  ;;  %2354 = vst [vmem:[#allocation3] sm:$0xcc] %v2346_v2  ;;  %v2402_v45 = vrot.slane %v2386_v41, 4  ;;  %v2658_v48 = vrot.slane %v2642_v30, 4 }
 0x16d   : > { %v2430_v14 = vadd.f32 %v2422_v6, %v2414_v53  ;;  %v2634_v38 = vmul.f32 0.75, %v2530_v20  ;;  %v2531_v18 = vadd.f32 %v2523_v43, %v2515_v28  ;;  %v5453_v49 = vsel %vm2298_vm4, 1.0, %v6162_v11  ;;  %v2275_v55 = vld [vmem:[#allocation2 + $0x28] sm:$0xf]  ;;  %2255 = vst [vmem:[#allocation2 + $0xa8] sm:$0xff] %v2121_v50  ;;  %v2123_v56 = vpop.f32.mrb[6].mxu0 }
 0x16e   : > { %v2431_v15 = vadd.f32 %v2423_v4, %v2415_v12  ;;  %2200 = vmatpush1.bf16.msra.mxu1 %v5399_v5  ;;  %v5432_v53 = vcombine.high %v7121_v29, %v7126_v33  ;;  %v2362_v54 = vsub.f32 1.0, %v5453_v49  ;;  %vm2299_vm5 = vcmp.ge.f32.partialorder %v2275_v55, 1.25  ;;  %2262 = vst [vmem:[#allocation2 + $0xe0] sm:$0xff] %v2123_v56  ;;  %v2643_v3 = vld [vmem:[#allocation2 + $0x48] sm:$0xf0]  ;;  %v7155_v6 = vld [vmem:[%s7633_s1 + $0x7d8] sm:$0xff] }
 0x16f   : > { %vm2438_vm2 = vcmp.ge.f32.partialorder %v2430_v14, 1.25  ;;  %2201 = vmatprep.subr.bf16.mxu1 %v5408_v9  ;;  %v2674_v59 = vadd.f32 %v2658_v48, %v2634_v38  ;;  %v2418_v63 = vadd.f32 %v2402_v45, %v2378_v44  ;;  %v5454_v1 = vsel %vm2299_vm5, 1.0, %v6162_v11  ;;  %v2125_v9 = vpop.f32.mrb[7].mxu0  ;;  %v489_v12 = vld [vmem:[%s7633_s1 + $0x7f8] sm:$0xff] }
 0x170   : > { %v5461_v21 = vsel %vm2438_vm2, 1.0, %v6162_v11  ;;  %vm2439_vm3 = vcmp.ge.f32.partialorder %v2431_v15, 1.25  ;;  %v2370_v62 = vmul.f32 %v2362_v54, %v2274_v40  ;;  %v2635_v2 = vmul.f32 0.75, %v2531_v18  ;;  %2263 = vst [vmem:[#allocation2 + $0xe8] sm:$0xff] %v2125_v9  ;;  %v2783_v54 = vld [vmem:[#allocation2 + $0x88] sm:$0xf] }
 0x171   : > { %v5462_v26 = vsel %vm2439_vm3, 1.0, %v6162_v11  ;;  %v2498_v27 = vsub.f32 1.0, %v5461_v21  ;;  %v5439_v5 = vcombine.low %v7131_v35, %v7140_v39  ;;  %v5757_v7 = vpack.c.bf16 %v5454_v1, %v5453_v49  ;;  %v2526_v35 = vld [vmem:[#allocation2 + $0x60] sm:$0xf] }
 0x172   : > { %v2499_v31 = vsub.f32 1.0, %v5462_v26  ;;  %2202 = vmatpush1.bf16.msra.mxu1 %v5407_v17  ;;  %v5759_v36 = vpack.c.bf16 %v5462_v26, %v5461_v21  ;;  %v2426_v4 = vmul.f32 0.97, %v2370_v62  ;;  %v2363_v13 = vsub.f32 1.0, %v5454_v1  ;;  %v2387_v17 = vld [vmem:[#allocation2 + $0x28] sm:$0xf0] }
 0x173   : > { %v2506_v37 = vmul.f32 %v2498_v27, %v2430_v14  ;;  %2203 = vmatprep.subr.bf16.mxu1 %v5416_v25  ;;  %v2379_v16 = vmul.f32 0.75, %v2275_v55  ;;  %v2348_v34 = vrot.slane %v5757_v7, 6  ;;  %v2659_v22 = vrot.slane %v2643_v3, 4  ;;  %v2782_v27 = vld [vmem:[#allocation2 + $0x80] sm:$0xf] }
 0x174   : > { %v2507_v42 = vmul.f32 %v2499_v31, %v2431_v15  ;;  %2494 = vst [vmem:[#allocation3 + $0x20] sm:$0x33] %v5759_v36  ;;  %v2774_v15 = vmul.f32 0.75, %v2674_v59  ;;  %v2434_v25 = vadd.f32 %v2426_v4, %v2418_v63  ;;  %v5448_v23 = vcombine.high %v7155_v6, %v489_v12  ;;  %v3278_v62 = vld [vmem:[#allocation3] sm:$0xff]  ;;  %v2903_v7 = vld [vmem:[#allocation2 + $0x88] sm:$0xf0] }
 0x175   : > { %v2538_v47 = vmul.f32 0.97, %v2506_v37  ;;  %v2371_v24 = vmul.f32 %v2363_v13, %v2275_v55  ;;  %v2403_v29 = vrot.slane %v2387_v17, 4  ;;  %2356 = vst [vmem:[#allocation3 + $0x10] sm:$0xcc] %v2348_v34  ;;  %v2675_v31 = vadd.f32 %v2659_v22, %v2635_v2 }
 0x176   : > { %v2539_v51 = vmul.f32 0.97, %v2507_v42  ;;  %2204 = vmatpush1.bf16.msra.mxu1 %v5415_v32  ;;  %vm2442_vm8 = vcmp.ge.f32.partialorder %v2434_v25, 1.25  ;;  %v7163_v32 = vadd.f32 %v2782_v27, %v2774_v15  ;;  %v2518_v39 = vmul.f32 0.75, %v2418_v63  ;;  %v5975_v3 = vld [vmem:[%s7634_s2 + $0x100] ss:$8 sps:$4 sm:$0xff]  }
 0x177   : > { %v2546_v58 = vadd.f32 %v2538_v47, %v2530_v20  ;;  %2205 = vmatprep.subr.bf16.mxu1 %v5424_v0  ;;  %v7166_v33 = vsel %vm2442_vm8, 1.0, %v6162_v11  ;;  %v2419_v37 = vadd.f32 %v2403_v29, %v2379_v16  ;;  %v2427_v38 = vmul.f32 0.97, %v2371_v24  ;;  %v2646_v47 = vld [vmem:[#allocation2 + $0x60] sm:$0xf0] }
 0x178   : > { %v2547_v61 = vadd.f32 %v2539_v51, %v2531_v18  ;;  %v5447_v41 = vcombine.low %v7155_v6, %v489_v12  ;;  %v2894_v44 = vmul.f32 0.75, %v7163_v32  ;;  %v2775_v45 = vmul.f32 0.75, %v2675_v31  ;;  %v6150_v4 = vld [vmem:[%s6231_s14 + $0x8] ss:$16 sps:$4 sm:$0xff]   ;;  %v5980_v15 = vld [vmem:[%s7634_s2 + $0x114] ss:$8 sps:$4 sm:$0xff]  }
 0x179   : > { %vm2554_vm6 = vcmp.ge.f32.partialorder %v2546_v58, 1.25  ;;  %v2435_v42 = vadd.f32 %v2427_v38, %v2419_v37  ;;  %v2534_v46 = vadd.f32 %v2526_v35, %v2518_v39  ;;  %v2662_v2 = vrot.slane %v2646_v47, 4  ;;  %v6151_v17 = vld [vmem:[%s6231_s14 + $0x2c] ss:$16 sps:$4 sm:$0xff]   ;;  %v5978_v27 = vld [vmem:[%s7634_s2 + $0x110] ss:$8 sps:$4 sm:$0xff]  }
 0x17a   : > { %v5473_v10 = vsel %vm2554_vm6, 1.0, %v6162_v11  ;;  %vm2555_vm7 = vcmp.ge.f32.partialorder %v2547_v61, 1.25  ;;  %2206 = vmatpush1.bf16.msra.mxu1 %v5423_v57  ;;  %v2502_v57 = vsub.f32 1.0, %v7166_v33  ;;  %v2919_v34 = vrot.slane %v2903_v7, 4  ;;  %v2647_v22 = vld [vmem:[#allocation2 + $0x68] sm:$0xf0] }
 0x17b   : > { %v2618_v8 = vsub.f32 1.0, %v5473_v10  ;;  %v5474_v14 = vsel %vm2555_vm7, 1.0, %v6162_v11  ;;  %2207 = vmatprep.subr.bf16.mxu1 %v5432_v53  ;;  %vm2443_vm11 = vcmp.ge.f32.partialorder %v2435_v42, 1.25  ;;  %v2638_v1 = vmul.f32 0.75, %v2534_v46 }
 0x17c   : > { %v2619_v19 = vsub.f32 1.0, %v5474_v14  ;;  %v5763_v20 = vpack.c.bf16 %v5474_v14, %v5473_v10  ;;  %v2510_v43 = vmul.f32 %v2502_v57, %v2434_v25  ;;  %v5466_v51 = vsel %vm2443_vm11, 1.0, %v6162_v11 }
 0x17d   : > { %v2626_v21 = vmul.f32 %v2618_v8, %v2546_v58  ;;  %v2503_v58 = vsub.f32 1.0, %v5466_v51 }
 0x17e   : > { %v2627_v26 = vmul.f32 %v2619_v19, %v2547_v61  ;;  %2208 = vmatpush1.bf16.msra.mxu1 %v5431_v52  ;;  %v2606_v28 = vrot.slane %v5763_v20, 6  ;;  %v2542_v18 = vmul.f32 0.97, %v2510_v43  ;;  %v2519_v52 = vmul.f32 0.75, %v2419_v37 }
 0x17f   : > { %v2682_v30 = vmul.f32 0.97, %v2626_v21  ;;  %2209 = vmatprep.subr.bf16.mxu1 %v5440_v60  ;;  %v2791_v61 = vadd.f32 %v2783_v54, %v2775_v45  ;;  %v2511_v8 = vmul.f32 %v2503_v58, %v2435_v42  ;;  %v2663_v37 = vrot.slane %v2647_v22, 4  ;;  %v5981_v42 = vld [vmem:[%s7634_s2 + $0x120] ss:$8 sps:$4 sm:$0xff]  }
 0x180   : > { %v2683_v36 = vmul.f32 0.97, %v2627_v26  ;;  %2614 = vst [vmem:[#allocation3 + $0x20] sm:$0xcc] %v2606_v28  ;;  %v2550_v56 = vadd.f32 %v2542_v18, %v2534_v46  ;;  %v2678_v26 = vadd.f32 %v2662_v2, %v2638_v1  ;;  %v5761_v28 = vpack.c.bf16 %v5466_v51, %v7166_v33  ;;  %v6152_v45 = vld [vmem:[%s6231_s14 + $0x28] ss:$16 sps:$4 sm:$0xff]  }
 0x181   : > { %v2690_v0 = vadd.f32 %v2682_v30, %v2674_v59  ;;  %v2527_v59 = vld [vmem:[#allocation2 + $0x68] sm:$0xf]  ;;  %v2543_v21 = vmul.f32 0.97, %v2511_v8  ;;  %v2895_v30 = vmul.f32 0.75, %v2791_v61 }
 0x182   : > { %v2691_v40 = vadd.f32 %v2683_v36, %v2675_v31  ;;  %2210 = vmatpush1.bf16.msra.mxu1 %v5439_v5  ;;  %v2902_v5 = vld [vmem:[#allocation2 + $0x80] sm:$0xf0]  ;;  %vm2558_vm12 = vcmp.ge.f32.partialorder %v2550_v56, 1.25  ;;  %v2535_v14 = vadd.f32 %v2527_v59, %v2519_v52  ;;  %2496 = vst [vmem:[#allocation3 + $0x30] sm:$0x33] %v5761_v28  ;;  %v2778_v47 = vmul.f32 0.75, %v2678_v26 }
 0x183   : > { %vm2698_vm9 = vcmp.ge.f32.partialorder %v2690_v0, 1.25  ;;  %2211 = vmatprep.subr.bf16.mxu1 %v5448_v23  ;;  %v7179_v13 = vsel %vm2558_vm12, 1.0, %v6162_v11  ;;  %v2918_v25 = vrot.slane %v2902_v5, 4  ;;  %v5989_v1 = vld [vmem:[%s7634_s2 + $0x144] ss:$8 sps:$4 sm:$0xff]  }
 0x184   : > { %v5485_v48 = vsel %vm2698_vm9, 1.0, %v6162_v11  ;;  %vm2699_vm10 = vcmp.ge.f32.partialorder %v2691_v40, 1.25  ;;  %v2622_v19 = vsub.f32 1.0, %v7179_v13  ;;  %v2551_v31 = vadd.f32 %v2543_v21, %v2535_v14  ;;  %v2906_v8 = vld [vmem:[#allocation2 + $0xa0] sm:$0xf0] }
 0x185   : > { %v5486_v49 = vsel %vm2699_vm10, 1.0, %v6162_v11  ;;  %v2758_v50 = vsub.f32 1.0, %v5485_v48  ;;  %v2934_v29 = vadd.f32 %v2918_v25, %v2894_v44  ;;  %v2639_v33 = vmul.f32 0.75, %v2535_v14  ;;  %v2787_v21 = vld [vmem:[#allocation2 + $0xa8] sm:$0xf] }
 0x186   : > { %v2759_v53 = vsub.f32 1.0, %v5486_v49  ;;  %2212 = vmatpush1.bf16.msra.mxu1 %v5447_v41  ;;  %v5767_v55 = vpack.c.bf16 %v5486_v49, %v5485_v48  ;;  %v2630_v24 = vmul.f32 %v2622_v19, %v2550_v56  ;;  %vm2559_vm15 = vcmp.ge.f32.partialorder %v2551_v31, 1.25  ;;  %v5986_v48 = vld [vmem:[%s7634_s2 + $0x134] ss:$8 sps:$4 sm:$0xff]   ;;  %v2786_v56 = vld [vmem:[#allocation2 + $0xa0] sm:$0xf] }
 0x187   : > { %v2766_v60 = vmul.f32 %v2758_v50, %v2690_v0  ;;  %v3282_v63 = vld [vmem:[#allocation3 + $0x20] sm:$0xff]  ;;  %v5478_v41 = vsel %vm2559_vm15, 1.0, %v6162_v11  ;;  %v2935_v44 = vadd.f32 %v2919_v34, %v2895_v30  ;;  %v5984_v50 = vld [vmem:[%s7634_s2 + $0x130] ss:$8 sps:$4 sm:$0xff]   ;;  %v3034_v59 = vmul.f32 0.75, %v2934_v29 }
 0x188   : > { %v2767_v6 = vmul.f32 %v2759_v53, %v2691_v40  ;;  %v5545_v9 = vcombine.low %v3278_v62, %v3282_v63  ;;  %v5546_v10 = vcombine.high %v3278_v62, %v3282_v63  ;;  %2754 = vst [vmem:[#allocation3 + $0x40] sm:$0x33] %v5767_v55  ;;  %v2686_v36 = vmul.f32 0.97, %v2630_v24 }
 0x189   : > { %v2798_v12 = vmul.f32 0.97, %v2766_v60  ;;  %2214 = vmatmul.mubr.bf16.vlgmr.msra.gmra.mrb[16].mxu1 %v6150_v4  ;;  %v2623_v46 = vsub.f32 1.0, %v5478_v41  ;;  %v5765_v51 = vpack.c.bf16 %v5478_v41, %v7179_v13  ;;  %v2679_v55 = vadd.f32 %v2663_v37, %v2639_v33 }
 0x18a   : > { %v2799_v16 = vmul.f32 0.97, %v2767_v6  ;;  %4174 = vmatprep.mubr.bf16.mxu0 %v5546_v10  ;;  %2223 = vmatprep.mubr.bf16.mxu1 %v6151_v17  ;;  %v2694_v40 = vadd.f32 %v2686_v36, %v2678_v26  ;;  %v2794_v5 = vadd.f32 %v2786_v56, %v2778_v47  ;;  %v3042_v6 = vld [vmem:[#allocation2 + $0xc0] sm:$0xf]  ;;  %v3035_v7 = vmul.f32 0.75, %v2935_v44 }
 0x18b   : > { %v2806_v20 = vadd.f32 %v2798_v12, %v7163_v32  ;;  %4175 = vmatmul.mubr.bf16.vlgmr.msra.gmra.mrb[8].mxu0 %v5545_v9  ;;  %v5983_v32 = vld [vmem:[%s7634_s2 + $0x124] ss:$8 sps:$4 sm:$0xff]   ;;  %v2631_v54 = vmul.f32 %v2623_v46, %v2551_v31  ;;  %v5987_v10 = vld [vmem:[%s7634_s2 + $0x140] ss:$8 sps:$4 sm:$0xff]   ;;  %v3050_v4 = vadd.f32 %v3042_v6, %v3034_v59  ;;  %v5992_v17 = vld [vmem:[%s7634_s2 + $0x154] ss:$8 sps:$4 sm:$0xff]  }
 0x18c   : > { %v2807_v23 = vadd.f32 %v2799_v16, %v2791_v61  ;;  %4196 = vmatpush1.bf16.msra.mxu0 %v5975_v3  ;;  %vm2702_vm0 = vcmp.ge.f32.partialorder %v2694_v40, 1.25  ;;  %v2608_v61 = vrot.slane %v5765_v51, 6  ;;  %v2779_v16 = vmul.f32 0.75, %v2679_v55  ;;  %v5990_v26 = vld [vmem:[%s7634_s2 + $0x150] ss:$8 sps:$4 sm:$0xff]  }
 0x18d   : > { %vm2814_vm13 = vcmp.ge.f32.partialorder %v2806_v20, 1.25  ;;  %4197 = vmatprep.subr.bf16.mxu0 %v5980_v15  ;;  %v5489_v53 = vsel %vm2702_vm0, 1.0, %v6162_v11  ;;  %v2687_v63 = vmul.f32 0.97, %v2631_v54  ;;  %v2898_v30 = vmul.f32 0.75, %v2794_v5 }
 0x18e   : > { %v5497_v35 = vsel %vm2814_vm13, 1.0, %v6162_v11  ;;  %vm2815_vm14 = vcmp.ge.f32.partialorder %v2807_v23, 1.25  ;;  %v2762_v60 = vsub.f32 1.0, %v5489_v53  ;;  %2616 = vst [vmem:[#allocation3 + $0x30] sm:$0xcc] %v2608_v61  ;;  %v2795_v37 = vadd.f32 %v2787_v21, %v2779_v16 }
 0x18f   : > { %v2878_v38 = vsub.f32 1.0, %v5497_v35  ;;  %v5498_v57 = vsel %vm2815_vm14, 1.0, %v6162_v11  ;;  %v2695_v9 = vadd.f32 %v2687_v63, %v2679_v55  ;;  %v5996_v54 = vld [vmem:[%s7634_s2 + $0x170] ss:$8 sps:$4 sm:$0xff]  }
 0x190   : > { %v2879_v0 = vsub.f32 1.0, %v5498_v57  ;;  %v5771_v39 = vpack.c.bf16 %v5498_v57, %v5497_v35  ;;  %4198 = vmatpush1.bf16.msra.mxu0 %v5978_v27  ;;  %v2770_v3 = vmul.f32 %v2762_v60, %v2694_v40  ;;  %v5995_v27 = vld [vmem:[%s7634_s2 + $0x164] ss:$8 sps:$4 sm:$0xff]   ;;  %v2899_v46 = vmul.f32 0.75, %v2795_v37 }
 0x191   : > { %v2886_v43 = vmul.f32 %v2878_v38, %v2806_v20  ;;  %2224 = vmatmul.mubr.bf16.gmra.mrb[20].mxu1 %v6152_v45  ;;  %4199 = vmatprep.subr.bf16.mxu0 %v5983_v32  ;;  %vm2703_vm3 = vcmp.ge.f32.partialorder %v2695_v9, 1.25 }
 0x192   : > { %v2887_v18 = vmul.f32 %v2879_v0, %v2807_v23  ;;  %v2866_v49 = vrot.slane %v5771_v39, 6  ;;  %v2802_v13 = vmul.f32 0.97, %v2770_v3  ;;  %v5490_v25 = vsel %vm2703_vm3, 1.0, %v6162_v11  ;;  %v2907_v0 = vld [vmem:[#allocation2 + $0xa8] sm:$0xf0] }
 0x193   : > { %v2942_v52 = vmul.f32 0.97, %v2886_v43  ;;  %v2922_v23 = vrot.slane %v2906_v8, 4  ;;  %v2763_v24 = vsub.f32 1.0, %v5490_v25  ;;  %v5769_v31 = vpack.c.bf16 %v5490_v25, %v5489_v53  ;;  %v6007_v8 = vld [vmem:[%s7634_s2 + $0x1a4] ss:$8 sps:$4 sm:$0xff]  }
 0x194   : > { %v2943_v58 = vmul.f32 0.97, %v2887_v18  ;;  %2874 = vst [vmem:[#allocation3 + $0x40] sm:$0xcc] %v2866_v49  ;;  %4200 = vmatpush1.bf16.msra.mxu0 %v5981_v42  ;;  %v2810_v34 = vadd.f32 %v2802_v13, %v2794_v5  ;;  %v2923_v47 = vrot.slane %v2907_v0, 4 }
 0x195   : > { %v2950_v62 = vadd.f32 %v2942_v52, %v2934_v29  ;;  %4201 = vmatprep.subr.bf16.mxu0 %v5986_v48  ;;  %v3043_v29 = vld [vmem:[#allocation2 + $0xc8] sm:$0xf]  ;;  %v2771_v36 = vmul.f32 %v2763_v24, %v2695_v9  ;;  %2756 = vst [vmem:[#allocation3 + $0x50] sm:$0x33] %v5769_v31  ;;  %v2938_v43 = vadd.f32 %v2922_v23, %v2898_v30  ;;  %v5998_v48 = vld [vmem:[%s7634_s2 + $0x174] ss:$8 sps:$4 sm:$0xff]  }
 0x196   : > { %v2951_v2 = vadd.f32 %v2943_v58, %v2935_v44  ;;  %vm2818_vm4 = vcmp.ge.f32.partialorder %v2810_v34, 1.25  ;;  %v3051_v38 = vadd.f32 %v3043_v29, %v3035_v7  ;;  %v5993_v44 = vld [vmem:[%s7634_s2 + $0x160] ss:$8 sps:$4 sm:$0xff]   ;;  %v2939_v56 = vadd.f32 %v2923_v47, %v2899_v46  ;;  %v6001_v58 = vld [vmem:[%s7634_s2 + $0x184] ss:$8 sps:$4 sm:$0xff]  }
 0x197   : > { %vm2958_vm1 = vcmp.ge.f32.partialorder %v2950_v62, 1.25  ;;  %v5501_v35 = vsel %vm2818_vm4, 1.0, %v6162_v11  ;;  %v2803_v40 = vmul.f32 0.97, %v2771_v36  ;;  %v3038_v61 = vmul.f32 0.75, %v2938_v43 }
 0x198   : > { %v5509_v12 = vsel %vm2958_vm1, 1.0, %v6162_v11  ;;  %vm2959_vm2 = vcmp.ge.f32.partialorder %v2951_v2, 1.25  ;;  %4202 = vmatpush1.bf16.msra.mxu0 %v5984_v50  ;;  %v2882_v33 = vsub.f32 1.0, %v5501_v35  ;;  %v5999_v5 = vld [vmem:[%s7634_s2 + $0x180] ss:$8 sps:$4 sm:$0xff]  }
 0x199   : > { %v5510_v14 = vsel %vm2959_vm2, 1.0, %v6162_v11  ;;  %v3018_v15 = vsub.f32 1.0, %v5509_v12  ;;  %4203 = vmatprep.subr.bf16.mxu0 %v5989_v1  ;;  %v2811_v45 = vadd.f32 %v2803_v40, %v2795_v37  ;;  %v3046_v1 = vld [vmem:[#allocation2 + $0xe0] sm:$0xf]  ;;  %v6004_v7 = vld [vmem:[%s7634_s2 + $0x194] ss:$8 sps:$4 sm:$0xff]  }
 0x19a   : > { %v3019_v19 = vsub.f32 1.0, %v5510_v14  ;;  %v5775_v20 = vpack.c.bf16 %v5510_v14, %v5509_v12  ;;  %v2890_v42 = vmul.f32 %v2882_v33, %v2810_v34  ;;  %v3039_v14 = vmul.f32 0.75, %v2939_v56  ;;  %v6005_v23 = vld [vmem:[%s7634_s2 + $0x1a0] ss:$8 sps:$4 sm:$0xff]   ;;  %v6008_v30 = vld [vmem:[%s7634_s2 + $0x1b0] ss:$8 sps:$4 sm:$0xff]  }
 0x19b   : > { %v3026_v22 = vmul.f32 %v3018_v15, %v2950_v62  ;;  %vm2819_vm7 = vcmp.ge.f32.partialorder %v2811_v45, 1.25  ;;  %v6011_v36 = vld [vmem:[%s7634_s2 + $0x1c0] ss:$8 sps:$4 sm:$0xff]   ;;  %v6016_v37 = vld [vmem:[%s7634_s2 + $0x1d4] ss:$8 sps:$4 sm:$0xff]  }
 0x19c   : > { %v3027_v28 = vmul.f32 %v3019_v19, %v2951_v2  ;;  %3014 = vst [vmem:[#allocation3 + $0x60] sm:$0x33] %v5775_v20  ;;  %4204 = vmatpush1.bf16.msra.mxu0 %v5987_v10  ;;  %v2946_v49 = vmul.f32 0.97, %v2890_v42  ;;  %v5502_v53 = vsel %vm2819_vm7, 1.0, %v6162_v11  ;;  %v3054_v10 = vadd.f32 %v3046_v1, %v3038_v61  ;;  %v3286_v19 = vld [vmem:[#allocation3 + $0x40] sm:$0xff] }
 0x19d   : > { %v3058_v32 = vmul.f32 0.97, %v3026_v22  ;;  %4205 = vmatprep.subr.bf16.mxu0 %v5992_v17  ;;  %v2883_v55 = vsub.f32 1.0, %v5502_v53  ;;  %v5773_v59 = vpack.c.bf16 %v5502_v53, %v5501_v35  ;;  %v3047_v17 = vld [vmem:[#allocation2 + $0xe8] sm:$0xf] }
 0x19e   : > { %v3059_v57 = vmul.f32 0.97, %v3027_v28  ;;  %v2954_v52 = vadd.f32 %v2946_v49, %v2938_v43  ;;  %v6010_v28 = vld [vmem:[%s7634_s2 + $0x1b4] ss:$8 sps:$4 sm:$0xff]   ;;  %v6014_v33 = vld [vmem:[%s7634_s2 + $0x1d0] ss:$8 sps:$4 sm:$0xff]  }
 0x19f   : > { %v3066_v39 = vadd.f32 %v3058_v32, %v3050_v4  ;;  %v2891_v63 = vmul.f32 %v2883_v55, %v2811_v45  ;;  %v2868_v2 = vrot.slane %v5773_v59, 6  ;;  %v6002_v4 = vld [vmem:[%s7634_s2 + $0x190] ss:$8 sps:$4 sm:$0xff]   ;;  %v6013_v32 = vld [vmem:[%s7634_s2 + $0x1c4] ss:$8 sps:$4 sm:$0xff]  }
 0x1a0   : > { %v3067_v41 = vadd.f32 %v3059_v57, %v3051_v38  ;;  %4206 = vmatpush1.bf16.msra.mxu0 %v5990_v26  ;;  %vm2962_vm8 = vcmp.ge.f32.partialorder %v2954_v52, 1.25  ;;  %v6019_v0 = vld [vmem:[%s7634_s2 + $0x1e4] ss:$8 sps:$4 sm:$0xff]   ;;  %v6022_v40 = vld [vmem:[%s7634_s2 + $0x1f4] ss:$8 sps:$4 sm:$0xff]  }
 0x1a1   : > { %vm3074_vm5 = vcmp.ge.f32.partialorder %v3066_v39, 1.25  ;;  %4207 = vmatprep.subr.bf16.mxu0 %v5995_v27  ;;  %v5513_v62 = vsel %vm2962_vm8, 1.0, %v6162_v11  ;;  %v2947_v6 = vmul.f32 0.97, %v2891_v63  ;;  %2876 = vst [vmem:[#allocation3 + $0x50] sm:$0xcc] %v2868_v2  ;;  %v3055_v27 = vadd.f32 %v3047_v17, %v3039_v14 }
 0x1a2   : > { %v5521_v18 = vsel %vm3074_vm5, 1.0, %v6162_v11  ;;  %vm3075_vm6 = vcmp.ge.f32.partialorder %v3067_v41, 1.25  ;;  %v3022_v3 = vsub.f32 1.0, %v5513_v62  ;;  %v6017_v39 = vld [vmem:[%s7634_s2 + $0x1e0] ss:$8 sps:$4 sm:$0xff]  }
 0x1a3   : > { %v5522_v50 = vsel %vm3075_vm6, 1.0, %v6162_v11  ;;  %v2955_v12 = vadd.f32 %v2947_v6, %v2939_v56  ;;  %v6020_v41 = vld [vmem:[%s7634_s2 + $0x1f0] ss:$8 sps:$4 sm:$0xff]   ;;  %v6025_v42 = vld [vmem:[%s7634_s2 + $0x204] ss:$8 sps:$4 sm:$0xff]  }
 0x1a4   : > { %v5779_v51 = vpack.c.bf16 %v5522_v50, %v5521_v18  ;;  %4208 = vmatpush1.bf16.msra.mxu0 %v5993_v44  ;;  %v3030_v9 = vmul.f32 %v3022_v3, %v2954_v52 }
 0x1a5   : > { %4209 = vmatprep.subr.bf16.mxu0 %v5998_v48  ;;  %vm2963_vm9 = vcmp.ge.f32.partialorder %v2955_v12, 1.25 }
 0x1a6   : > { %v3126_v60 = vrot.slane %v5779_v51, 6  ;;  %v3062_v13 = vmul.f32 0.97, %v3030_v9  ;;  %v5514_v15 = vsel %vm2963_vm9, 1.0, %v6162_v11 }
 0x1a7   : > { %v3023_v25 = vsub.f32 1.0, %v5514_v15  ;;  %v5777_v34 = vpack.c.bf16 %v5514_v15, %v5513_v62 }
 0x1a8   : > { %3134 = vst [vmem:[#allocation3 + $0x60] sm:$0xcc] %v3126_v60  ;;  %4210 = vmatpush1.bf16.msra.mxu0 %v5996_v54  ;;  %v3070_v16 = vadd.f32 %v3062_v13, %v3054_v10 }
 0x1a9   : > { %4211 = vmatprep.subr.bf16.mxu0 %v6001_v58  ;;  %v3031_v26 = vmul.f32 %v3023_v25, %v2955_v12  ;;  %3016 = vst [vmem:[#allocation3 + $0x70] sm:$0x33] %v5777_v34 }
 0x1aa   : > { %vm3078_vm10 = vcmp.ge.f32.partialorder %v3070_v16, 1.25 }
 0x1ab   : > { %v5525_v24 = vsel %vm3078_vm10, 1.0, %v6162_v11  ;;  %v3063_v29 = vmul.f32 0.97, %v3031_v26 }
 0x1ac   : > { %4212 = vmatpush1.bf16.msra.mxu0 %v5999_v5 }
 0x1ad   : > { %4213 = vmatprep.subr.bf16.mxu0 %v6004_v7  ;;  %v3071_v31 = vadd.f32 %v3063_v29, %v3055_v27 }
 0x1af   : > { %v3290_v20 = vld [vmem:[#allocation3 + $0x60] sm:$0xff]  ;;  %vm3079_vm11 = vcmp.ge.f32.partialorder %v3071_v31, 1.25 }
 0x1b0   : > { %v5554_v21 = vcombine.high %v3286_v19, %v3290_v20  ;;  %v5553_v22 = vcombine.low %v3286_v19, %v3290_v20  ;;  %4214 = vmatpush1.bf16.msra.mxu0 %v6002_v4  ;;  %v5526_v35 = vsel %vm3079_vm11, 1.0, %v6162_v11 }
 0x1b1   : > { %4215 = vmatprep.subr.bf16.mxu0 %v6007_v8  ;;  %v5781_v38 = vpack.c.bf16 %v5526_v35, %v5525_v24 }
 0x1b2   : > { %4184 = vmatprep.mubr.bf16.mxu0 %v5554_v21 }
 0x1b3   : > { %4185 = vmatmul.mubr.bf16.gmra.mrb[12].mxu0 %v5553_v22  ;;  %v3128_v57 = vrot.slane %v5781_v38, 6 }
 0x1b4   : > { %4216 = vmatpush1.bf16.msra.mxu0 %v6005_v23 }
 0x1b5   : > { %4217 = vmatprep.subr.bf16.mxu0 %v6010_v28  ;;  %3136 = vst [vmem:[#allocation3 + $0x70] sm:$0xcc] %v3128_v57 }
 0x1b8   : > { %4218 = vmatpush1.bf16.msra.mxu0 %v6008_v30 }
 0x1b9   : > { %4219 = vmatprep.subr.bf16.mxu0 %v6013_v32 }
 0x1bc   : > { %4220 = vmatpush1.bf16.msra.mxu0 %v6011_v36 }
 0x1bd   : > { %4221 = vmatprep.subr.bf16.mxu0 %v6016_v37 }
 0x1c0   : > { %4222 = vmatpush1.bf16.msra.mxu0 %v6014_v33 }
 0x1c1   : > { %4223 = vmatprep.subr.bf16.mxu0 %v6019_v0 }
 0x1c4   : > { %4224 = vmatpush1.bf16.msra.mxu0 %v6017_v39 }
 0x1c5   : > { %4225 = vmatprep.subr.bf16.mxu0 %v6022_v40 }
 0x1c8   : > { %4226 = vmatpush1.bf16.msra.mxu0 %v6020_v41 }
 0x1c9   : > { %4248 = vmatprep.subr.bf16.mxu0 %v6025_v42 }
 0x1dc   : > { %v2003_v43 = vpop.f32.mrb[8].mxu1 }
 0x1dd   : > { %2236 = vst [vmem:[#allocation2 + $0x10] sm:$0xff] %v2003_v43  ;;  %v2005_v44 = vpop.f32.mrb[9].mxu1 }
 0x1de   : > { %2237 = vst [vmem:[#allocation2 + $0x18] sm:$0xff] %v2005_v44  ;;  %v2007_v45 = vpop.f32.mrb[10].mxu1 }
 0x1df   : > { %2244 = vst [vmem:[#allocation2 + $0x50] sm:$0xff] %v2007_v45  ;;  %v2009_v46 = vpop.f32.mrb[11].mxu1 }
 0x1e0   : > { %2245 = vst [vmem:[#allocation2 + $0x58] sm:$0xff] %v2009_v46 }
 0x1e4   : > { %v2272_v47 = vld [vmem:[#allocation2 + $0x10] sm:$0xf]  ;;  %v2384_v48 = vld [vmem:[#allocation2 + $0x10] sm:$0xf0]  ;;  %v2013_v18 = vpop.f32.mrb[12].mxu1 }
 0x1e5   : > { %vm2296_vm12 = vcmp.ge.f32.partialorder %v2272_v47, 1.25  ;;  %v2273_v49 = vld [vmem:[#allocation2 + $0x18] sm:$0xf]  ;;  %2252 = vst [vmem:[#allocation2 + $0x90] sm:$0xff] %v2013_v18  ;;  %v2015_v50 = vpop.f32.mrb[13].mxu1  ;;  %v2376_v55 = vmul.f32 0.75, %v2272_v47 }
 0x1e6   : > { %v5451_v51 = vsel %vm2296_vm12, 1.0, %v6162_v11  ;;  %vm2297_vm13 = vcmp.ge.f32.partialorder %v2273_v49, 1.25  ;;  %v2385_v52 = vld [vmem:[#allocation2 + $0x18] sm:$0xf0]  ;;  %2253 = vst [vmem:[#allocation2 + $0x98] sm:$0xff] %v2015_v50  ;;  %v2017_v53 = vpop.f32.mrb[14].mxu1 }
 0x1e7   : > { %v2360_v54 = vsub.f32 1.0, %v5451_v51  ;;  %v2400_v56 = vrot.slane %v2384_v48, 4  ;;  %v5452_v58 = vsel %vm2297_vm13, 1.0, %v6162_v11  ;;  %2260 = vst [vmem:[#allocation2 + $0xd0] sm:$0xff] %v2017_v53  ;;  %v2019_v59 = vpop.f32.mrb[15].mxu1  ;;  %v2377_v62 = vmul.f32 0.75, %v2273_v49 }
 0x1e8   : > { %v5756_v60 = vpack.c.bf16 %v5452_v58, %v5451_v51  ;;  %v2361_v61 = vsub.f32 1.0, %v5452_v58  ;;  %v2401_v63 = vrot.slane %v2385_v52, 4  ;;  %2261 = vst [vmem:[#allocation2 + $0xd8] sm:$0xff] %v2019_v59  ;;  %v2524_v20 = vld [vmem:[#allocation2 + $0x50] sm:$0xf] }
 0x1e9   : > { %v2368_v1 = vmul.f32 %v2360_v54, %v2272_v47  ;;  %v2416_v5 = vadd.f32 %v2400_v56, %v2376_v55  ;;  %v2525_v22 = vld [vmem:[#allocation2 + $0x58] sm:$0xf]  ;;  %v2644_v29 = vld [vmem:[#allocation2 + $0x50] sm:$0xf0]  ;;  %v2645_v35 = vld [vmem:[#allocation2 + $0x58] sm:$0xf0] }
 0x1ea   : > { %v2347_v2 = vrot.slane %v5756_v60, 6  ;;  %v2369_v3 = vmul.f32 %v2361_v61, %v2273_v49  ;;  %v2417_v7 = vadd.f32 %v2401_v63, %v2377_v62  ;;  %v2660_v33 = vrot.slane %v2644_v29, 4  ;;  %v6023_v61 = vld [vmem:[%s7634_s2 + $0x200] ss:$8 sps:$4 sm:$0xff]  }
 0x1eb   : > { %v2424_v6 = vmul.f32 0.97, %v2368_v1  ;;  %v2516_v14 = vmul.f32 0.75, %v2416_v5  ;;  %v2661_v39 = vrot.slane %v2645_v35, 4 }
 0x1ec   : > { %v2425_v9 = vmul.f32 0.97, %v2369_v3  ;;  %2355 = vst [vmem:[#allocation3 + $0x8] sm:$0xcc] %v2347_v2  ;;  %v2517_v16 = vmul.f32 0.75, %v2417_v7 }
 0x1ed   : > { %v2432_v10 = vadd.f32 %v2424_v6, %v2416_v5  ;;  %v2532_v34 = vadd.f32 %v2524_v20, %v2516_v14  ;;  %v2784_v56 = vld [vmem:[#allocation2 + $0x90] sm:$0xf]  ;;  %v2785_v1 = vld [vmem:[#allocation2 + $0x98] sm:$0xf]  ;;  %v6028_v2 = vld [vmem:[%s7634_s2 + $0x214] ss:$8 sps:$4 sm:$0xff]  }
 0x1ee   : > { %v2433_v12 = vadd.f32 %v2425_v9, %v2417_v7  ;;  %v2533_v23 = vadd.f32 %v2525_v22, %v2517_v16  ;;  %v6026_v9 = vld [vmem:[%s7634_s2 + $0x210] ss:$8 sps:$4 sm:$0xff]  }
 0x1ef   : > { %vm2440_vm14 = vcmp.ge.f32.partialorder %v2432_v10, 1.25  ;;  %v2636_v31 = vmul.f32 0.75, %v2532_v34 }
 0x1f0   : > { %v5463_v4 = vsel %vm2440_vm14, 1.0, %v6162_v11  ;;  %vm2441_vm15 = vcmp.ge.f32.partialorder %v2433_v12, 1.25  ;;  %v2637_v37 = vmul.f32 0.75, %v2533_v23 }
 0x1f1   : > { %v5464_v13 = vsel %vm2441_vm15, 1.0, %v6162_v11  ;;  %v2500_v8 = vsub.f32 1.0, %v5463_v4  ;;  %v2676_v41 = vadd.f32 %v2660_v33, %v2636_v31 }
 0x1f2   : > { %v2501_v15 = vsub.f32 1.0, %v5464_v13  ;;  %v5760_v17 = vpack.c.bf16 %v5464_v13, %v5463_v4  ;;  %v2677_v43 = vadd.f32 %v2661_v39, %v2637_v37  ;;  %v2904_v4 = vld [vmem:[#allocation2 + $0x90] sm:$0xf0]  ;;  %v6035_v37 = vld [vmem:[%s7634_s2 + $0x240] ss:$8 sps:$4 sm:$0xff]  }
 0x1f3   : > { %v2508_v19 = vmul.f32 %v2500_v8, %v2432_v10  ;;  %v2776_v49 = vmul.f32 0.75, %v2676_v41  ;;  %v3279_v54 = vld [vmem:[#allocation3 + $0x8] sm:$0xff] }
 0x1f4   : > { %v2509_v25 = vmul.f32 %v2501_v15, %v2433_v12  ;;  %2495 = vst [vmem:[#allocation3 + $0x28] sm:$0x33] %v5760_v17  ;;  %v2777_v51 = vmul.f32 0.75, %v2677_v43  ;;  %v6031_v10 = vld [vmem:[%s7634_s2 + $0x224] ss:$8 sps:$4 sm:$0xff]  }
 0x1f5   : > { %v2540_v21 = vmul.f32 0.97, %v2508_v19  ;;  %v2792_v62 = vadd.f32 %v2784_v56, %v2776_v49  ;;  %v2905_v15 = vld [vmem:[#allocation2 + $0x98] sm:$0xf0]  ;;  %v6029_v19 = vld [vmem:[%s7634_s2 + $0x220] ss:$8 sps:$4 sm:$0xff]  }
 0x1f6   : > { %v2541_v24 = vmul.f32 0.97, %v2509_v25  ;;  %v2793_v3 = vadd.f32 %v2785_v1, %v2777_v51  ;;  %v6050_v1 = vld [vmem:[%s7634_s2 + $0x290] ss:$8 sps:$4 sm:$0xff]  }
 0x1f7   : > { %v2548_v26 = vadd.f32 %v2540_v21, %v2532_v34  ;;  %v2896_v8 = vmul.f32 0.75, %v2792_v62  ;;  %v2920_v34 = vrot.slane %v2904_v4, 4  ;;  %v6034_v21 = vld [vmem:[%s7634_s2 + $0x234] ss:$8 sps:$4 sm:$0xff]  }
 0x1f8   : > { %v2549_v27 = vadd.f32 %v2541_v24, %v2533_v23  ;;  %v2897_v17 = vmul.f32 0.75, %v2793_v3  ;;  %v2921_v23 = vrot.slane %v2905_v15, 4  ;;  %v6058_v4 = vld [vmem:[%s7634_s2 + $0x2b4] ss:$8 sps:$4 sm:$0xff]   ;;  %v6059_v15 = vld [vmem:[%s7634_s2 + $0x2c0] ss:$8 sps:$4 sm:$0xff]  }
 0x1f9   : > { %vm2556_vm0 = vcmp.ge.f32.partialorder %v2548_v26, 1.25 }
 0x1fa   : > { %v5475_v28 = vsel %vm2556_vm0, 1.0, %v6162_v11  ;;  %vm2557_vm1 = vcmp.ge.f32.partialorder %v2549_v27, 1.25 }
 0x1fb   : > { %v2620_v30 = vsub.f32 1.0, %v5475_v28  ;;  %v5476_v32 = vsel %vm2557_vm1, 1.0, %v6162_v11 }
 0x1fc   : > { %v2621_v36 = vsub.f32 1.0, %v5476_v32  ;;  %v5764_v38 = vpack.c.bf16 %v5476_v32, %v5475_v28  ;;  %v2937_v28 = vadd.f32 %v2921_v23, %v2897_v17  ;;  %v6037_v32 = vld [vmem:[%s7634_s2 + $0x244] ss:$8 sps:$4 sm:$0xff]   ;;  %v6062_v17 = vld [vmem:[%s7634_s2 + $0x2d0] ss:$8 sps:$4 sm:$0xff]  }
 0x1fd   : > { %v2628_v57 = vmul.f32 %v2620_v30, %v2548_v26  ;;  %v2936_v26 = vadd.f32 %v2920_v34, %v2896_v8  ;;  %v6032_v30 = vld [vmem:[%s7634_s2 + $0x230] ss:$8 sps:$4 sm:$0xff]  }
 0x1fe   : > { %v2629_v0 = vmul.f32 %v2621_v36, %v2549_v27  ;;  %v2607_v40 = vrot.slane %v5764_v38, 6  ;;  %v6056_v8 = vld [vmem:[%s7634_s2 + $0x2b0] ss:$8 sps:$4 sm:$0xff]  }
 0x1ff   : > { %v2684_v42 = vmul.f32 0.97, %v2628_v57  ;;  %v3036_v33 = vmul.f32 0.75, %v2936_v26  ;;  %v6068_v34 = vld [vmem:[%s7634_s2 + $0x2f0] ss:$8 sps:$4 sm:$0xff]  }
 0x200   : > { %v2685_v44 = vmul.f32 0.97, %v2629_v0  ;;  %2615 = vst [vmem:[#allocation3 + $0x28] sm:$0xcc] %v2607_v40  ;;  %v6040_v0 = vld [vmem:[%s7634_s2 + $0x254] ss:$8 sps:$4 sm:$0xff]  }
 0x201   : > { %v2692_v45 = vadd.f32 %v2684_v42, %v2676_v41  ;;  %v3037_v40 = vmul.f32 0.75, %v2937_v28  ;;  %v3292_v23 = vld [vmem:[#allocation3 + $0x70] sm:$0xff] }
 0x202   : > { %v2693_v46 = vadd.f32 %v2685_v44, %v2677_v43  ;;  %v3044_v43 = vld [vmem:[#allocation2 + $0xd0] sm:$0xf] }
 0x203   : > { %vm2700_vm2 = vcmp.ge.f32.partialorder %v2692_v45, 1.25 }
 0x204   : > { %v5487_v47 = vsel %vm2700_vm2, 1.0, %v6162_v11  ;;  %vm2701_vm3 = vcmp.ge.f32.partialorder %v2693_v46, 1.25 }
 0x205   : > { %v5488_v48 = vsel %vm2701_vm3, 1.0, %v6162_v11  ;;  %v2760_v18 = vsub.f32 1.0, %v5487_v47 }
 0x206   : > { %v2761_v50 = vsub.f32 1.0, %v5488_v48  ;;  %v5768_v52 = vpack.c.bf16 %v5488_v48, %v5487_v47  ;;  %v3045_v48 = vld [vmem:[#allocation2 + $0xd8] sm:$0xf] }
 0x207   : > { %v2768_v53 = vmul.f32 %v2760_v18, %v2692_v45  ;;  %v3283_v55 = vld [vmem:[#allocation3 + $0x28] sm:$0xff]  ;;  %v6038_v45 = vld [vmem:[%s7634_s2 + $0x250] ss:$8 sps:$4 sm:$0xff]   ;;  %v3053_v49 = vadd.f32 %v3045_v48, %v3037_v40 }
 0x208   : > { %v2769_v58 = vmul.f32 %v2761_v50, %v2693_v46  ;;  %v5547_v59 = vcombine.low %v3279_v54, %v3283_v55  ;;  %v5548_v60 = vcombine.high %v3279_v54, %v3283_v55  ;;  %2755 = vst [vmem:[#allocation3 + $0x48] sm:$0x33] %v5768_v52  ;;  %v3052_v46 = vadd.f32 %v3044_v43, %v3036_v33  ;;  %v6043_v18 = vld [vmem:[%s7634_s2 + $0x264] ss:$8 sps:$4 sm:$0xff]   ;;  %v6046_v54 = vld [vmem:[%s7634_s2 + $0x274] ss:$8 sps:$4 sm:$0xff]  }
 0x209   : > { %v2800_v63 = vmul.f32 0.97, %v2768_v53  ;;  %v6041_v53 = vld [vmem:[%s7634_s2 + $0x260] ss:$8 sps:$4 sm:$0xff]   ;;  %v6091_v40 = vld [vmem:[%s7634_s2 + $0x364] ss:$8 sps:$4 sm:$0xff]  }
 0x20a   : > { %v2801_v5 = vmul.f32 0.97, %v2769_v58  ;;  %4227 = vmatprep.mubr.bf16.mxu0 %v5548_v60  ;;  %v6044_v58 = vld [vmem:[%s7634_s2 + $0x270] ss:$8 sps:$4 sm:$0xff]   ;;  %v6049_v60 = vld [vmem:[%s7634_s2 + $0x284] ss:$8 sps:$4 sm:$0xff]  }
 0x20b   : > { %v2808_v6 = vadd.f32 %v2800_v63, %v2792_v62  ;;  %4228 = vmatmul.mubr.bf16.vlgmr.msra.gmra.mrb[8].mxu0 %v5547_v59  ;;  %v6047_v62 = vld [vmem:[%s7634_s2 + $0x280] ss:$8 sps:$4 sm:$0xff]   ;;  %v6052_v63 = vld [vmem:[%s7634_s2 + $0x294] ss:$8 sps:$4 sm:$0xff]  }
 0x20c   : > { %v2809_v7 = vadd.f32 %v2801_v5, %v2793_v3  ;;  %4249 = vmatpush1.bf16.msra.mxu0 %v6023_v61  ;;  %v3280_v3 = vld [vmem:[#allocation3 + $0x10] sm:$0xff]  ;;  %v6089_v43 = vld [vmem:[%s7634_s2 + $0x360] ss:$8 sps:$4 sm:$0xff]  }
 0x20d   : > { %vm2816_vm4 = vcmp.ge.f32.partialorder %v2808_v6, 1.25  ;;  %4250 = vmatprep.subr.bf16.mxu0 %v6028_v2  ;;  %v6055_v2 = vld [vmem:[%s7634_s2 + $0x2a4] ss:$8 sps:$4 sm:$0xff]  }
 0x20e   : > { %v5499_v12 = vsel %vm2816_vm4, 1.0, %v6162_v11  ;;  %vm2817_vm5 = vcmp.ge.f32.partialorder %v2809_v7, 1.25 }
 0x20f   : > { %v2880_v13 = vsub.f32 1.0, %v5499_v12  ;;  %v5500_v14 = vsel %vm2817_vm5, 1.0, %v6162_v11 }
 0x210   : > { %v2881_v16 = vsub.f32 1.0, %v5500_v14  ;;  %4251 = vmatpush1.bf16.msra.mxu0 %v6026_v9  ;;  %v5772_v20 = vpack.c.bf16 %v5500_v14, %v5499_v12  ;;  %v6061_v14 = vld [vmem:[%s7634_s2 + $0x2c4] ss:$8 sps:$4 sm:$0xff]  }
 0x211   : > { %v2888_v25 = vmul.f32 %v2880_v13, %v2808_v6  ;;  %4252 = vmatprep.subr.bf16.mxu0 %v6031_v10  ;;  %v6053_v10 = vld [vmem:[%s7634_s2 + $0x2a0] ss:$8 sps:$4 sm:$0xff]  }
 0x212   : > { %v2889_v22 = vmul.f32 %v2881_v16, %v2809_v7  ;;  %v2867_v24 = vrot.slane %v5772_v20, 6  ;;  %v3284_v7 = vld [vmem:[#allocation3 + $0x30] sm:$0xff]  ;;  %v6065_v20 = vld [vmem:[%s7634_s2 + $0x2e0] ss:$8 sps:$4 sm:$0xff]  }
 0x213   : > { %v2944_v27 = vmul.f32 0.97, %v2888_v25  ;;  %v5550_v13 = vcombine.high %v3280_v3, %v3284_v7  ;;  %v6064_v16 = vld [vmem:[%s7634_s2 + $0x2d4] ss:$8 sps:$4 sm:$0xff]  }
 0x214   : > { %v2945_v29 = vmul.f32 0.97, %v2889_v22  ;;  %4253 = vmatpush1.bf16.msra.mxu0 %v6029_v19  ;;  %2875 = vst [vmem:[#allocation3 + $0x48] sm:$0xcc] %v2867_v24  ;;  %v6067_v19 = vld [vmem:[%s7634_s2 + $0x2e4] ss:$8 sps:$4 sm:$0xff]  }
 0x215   : > { %v2952_v31 = vadd.f32 %v2944_v27, %v2936_v26  ;;  %4254 = vmatprep.subr.bf16.mxu0 %v6034_v21  ;;  %v6070_v25 = vld [vmem:[%s7634_s2 + $0x2f4] ss:$8 sps:$4 sm:$0xff]   ;;  %v6073_v21 = vld [vmem:[%s7634_s2 + $0x304] ss:$8 sps:$4 sm:$0xff]   ;;  %v6071_v24 = vld [vmem:[%s7634_s2 + $0x300] ss:$8 sps:$4 sm:$0xff]   ;;  %v5549_v26 = vcombine.low %v3280_v3, %v3284_v7 }
 0x216   : > { %v2953_v35 = vadd.f32 %v2945_v29, %v2937_v28  ;;  %v3288_v22 = vld [vmem:[#allocation3 + $0x50] sm:$0xff] }
 0x217   : > { %vm2960_vm6 = vcmp.ge.f32.partialorder %v2952_v31, 1.25  ;;  %v6076_v27 = vld [vmem:[%s7634_s2 + $0x314] ss:$8 sps:$4 sm:$0xff]   ;;  %v5558_v28 = vcombine.high %v3288_v22, %v3292_v23  ;;  %v6074_v29 = vld [vmem:[%s7634_s2 + $0x310] ss:$8 sps:$4 sm:$0xff]  }
 0x218   : > { %v5511_v36 = vsel %vm2960_vm6, 1.0, %v6162_v11  ;;  %vm2961_vm7 = vcmp.ge.f32.partialorder %v2953_v35, 1.25  ;;  %4255 = vmatpush1.bf16.msra.mxu0 %v6032_v30  ;;  %v6079_v30 = vld [vmem:[%s7634_s2 + $0x324] ss:$8 sps:$4 sm:$0xff]   ;;  %v6100_v3 = vld [vmem:[%s7634_s2 + $0x394] ss:$8 sps:$4 sm:$0xff]  }
 0x219   : > { %v5512_v38 = vsel %vm2961_vm7, 1.0, %v6162_v11  ;;  %v3020_v57 = vsub.f32 1.0, %v5511_v36  ;;  %4256 = vmatprep.subr.bf16.mxu0 %v6037_v32  ;;  %v5557_v32 = vcombine.low %v3288_v22, %v3292_v23 }
 0x21a   : > { %v3021_v39 = vsub.f32 1.0, %v5512_v38  ;;  %v5776_v41 = vpack.c.bf16 %v5512_v38, %v5511_v36  ;;  %v6080_v36 = vld [vmem:[%s7634_s2 + $0x330] ss:$8 sps:$4 sm:$0xff]   ;;  %v6083_v38 = vld [vmem:[%s7634_s2 + $0x340] ss:$8 sps:$4 sm:$0xff]  }
 0x21b   : > { %v3028_v42 = vmul.f32 %v3020_v57, %v2952_v31  ;;  %v3287_v5 = vld [vmem:[#allocation3 + $0x48] sm:$0xff]  ;;  %v6088_v57 = vld [vmem:[%s7634_s2 + $0x354] ss:$8 sps:$4 sm:$0xff]  }
 0x21c   : > { %v3029_v44 = vmul.f32 %v3021_v39, %v2953_v35  ;;  %4257 = vmatpush1.bf16.msra.mxu0 %v6035_v37  ;;  %3015 = vst [vmem:[#allocation3 + $0x68] sm:$0x33] %v5776_v41  ;;  %v6077_v31 = vld [vmem:[%s7634_s2 + $0x320] ss:$8 sps:$4 sm:$0xff]   ;;  %v6082_v35 = vld [vmem:[%s7634_s2 + $0x334] ss:$8 sps:$4 sm:$0xff]  }
 0x21d   : > { %v3060_v47 = vmul.f32 0.97, %v3028_v42  ;;  %4258 = vmatprep.subr.bf16.mxu0 %v6040_v0  ;;  %v6085_v37 = vld [vmem:[%s7634_s2 + $0x344] ss:$8 sps:$4 sm:$0xff]   ;;  %v6086_v0 = vld [vmem:[%s7634_s2 + $0x350] ss:$8 sps:$4 sm:$0xff]  }
 0x21e   : > { %v3061_v50 = vmul.f32 0.97, %v3029_v44  ;;  %v6094_v44 = vld [vmem:[%s7634_s2 + $0x374] ss:$8 sps:$4 sm:$0xff]  }
 0x21f   : > { %v3068_v51 = vadd.f32 %v3060_v47, %v3052_v46 }
 0x220   : > { %v3069_v52 = vadd.f32 %v3061_v50, %v3053_v49  ;;  %4259 = vmatpush1.bf16.msra.mxu0 %v6038_v45  ;;  %v6092_v45 = vld [vmem:[%s7634_s2 + $0x370] ss:$8 sps:$4 sm:$0xff]   ;;  %v6097_v50 = vld [vmem:[%s7634_s2 + $0x384] ss:$8 sps:$4 sm:$0xff]  }
 0x221   : > { %vm3076_vm8 = vcmp.ge.f32.partialorder %v3068_v51, 1.25  ;;  %4260 = vmatprep.subr.bf16.mxu0 %v6043_v18 }
 0x222   : > { %v5523_v55 = vsel %vm3076_vm8, 1.0, %v6162_v11  ;;  %vm3077_vm9 = vcmp.ge.f32.partialorder %v3069_v52, 1.25 }
 0x223   : > { %v5524_v56 = vsel %vm3077_vm9, 1.0, %v6162_v11 }
 0x224   : > { %4261 = vmatpush1.bf16.msra.mxu0 %v6041_v53  ;;  %v5780_v59 = vpack.c.bf16 %v5524_v56, %v5523_v55 }
 0x225   : > { %4262 = vmatprep.subr.bf16.mxu0 %v6046_v54 }
 0x226   : > { %v3127_v61 = vrot.slane %v5780_v59, 6 }
 0x228   : > { %4263 = vmatpush1.bf16.msra.mxu0 %v6044_v58  ;;  %3135 = vst [vmem:[#allocation3 + $0x68] sm:$0xcc] %v3127_v61 }
 0x229   : > { %4264 = vmatprep.subr.bf16.mxu0 %v6049_v60 }
 0x22c   : > { %4265 = vmatpush1.bf16.msra.mxu0 %v6047_v62 }
 0x22d   : > { %4266 = vmatprep.subr.bf16.mxu0 %v6052_v63 }
 0x22f   : > { %v3291_v6 = vld [vmem:[#allocation3 + $0x68] sm:$0xff] }
 0x230   : > { %4267 = vmatpush1.bf16.msra.mxu0 %v6050_v1  ;;  %v5556_v9 = vcombine.high %v3287_v5, %v3291_v6  ;;  %v5555_v12 = vcombine.low %v3287_v5, %v3291_v6  ;;  %v6095_v1 = vld [vmem:[%s7634_s2 + $0x380] ss:$8 sps:$4 sm:$0xff]  }
 0x231   : > { %4268 = vmatprep.subr.bf16.mxu0 %v6055_v2 }
 0x232   : > { %4237 = vmatprep.mubr.bf16.mxu0 %v5556_v9 }
 0x233   : > { %4238 = vmatmul.mubr.bf16.gmra.mrb[12].mxu0 %v5555_v12 }
 0x234   : > { %4269 = vmatpush1.bf16.msra.mxu0 %v6053_v10  ;;  %4280 = vmatprep.mubr.bf16.mxu0 %v5550_v13 }
 0x235   : > { %4270 = vmatprep.subr.bf16.mxu0 %v6058_v4  ;;  %v6098_v4 = vld [vmem:[%s7634_s2 + $0x390] ss:$8 sps:$4 sm:$0xff]  }
 0x238   : > { %4271 = vmatpush1.bf16.msra.mxu0 %v6056_v8  ;;  %v6103_v8 = vld [vmem:[%s7634_s2 + $0x3a4] ss:$8 sps:$4 sm:$0xff]  }
 0x239   : > { %4272 = vmatprep.subr.bf16.mxu0 %v6061_v14 }
 0x23c   : > { %4273 = vmatpush1.bf16.msra.mxu0 %v6059_v15 }
 0x23d   : > { %4274 = vmatprep.subr.bf16.mxu0 %v6064_v16  ;;  %v6101_v16 = vld [vmem:[%s7634_s2 + $0x3a0] ss:$8 sps:$4 sm:$0xff]  }
 0x240   : > { %4275 = vmatpush1.bf16.msra.mxu0 %v6062_v17 }
 0x241   : > { %4276 = vmatprep.subr.bf16.mxu0 %v6067_v19 }
 0x244   : > { %4277 = vmatpush1.bf16.msra.mxu0 %v6065_v20 }
 0x245   : > { %4278 = vmatprep.subr.bf16.mxu0 %v6070_v25  ;;  %v6106_v25 = vld [vmem:[%s7634_s2 + $0x3b4] ss:$8 sps:$4 sm:$0xff]  }
 0x248   : > { %4279 = vmatpush1.bf16.msra.mxu0 %v6068_v34 }
 0x249   : > { %4301 = vmatprep.subr.bf16.mxu0 %v6073_v21 }
 0x24b   : > { %4281 = vmatmul.mubr.bf16.vlgmr.msra.gmra.mrb[8].mxu0 %v5549_v26 }
 0x24c   : > { %4290 = vmatprep.mubr.bf16.mxu0 %v5558_v28  ;;  %4302 = vmatpush1.bf16.msra.mxu0 %v6071_v24 }
 0x24d   : > { %4303 = vmatprep.subr.bf16.mxu0 %v6076_v27  ;;  %v6104_v27 = vld [vmem:[%s7634_s2 + $0x3b0] ss:$8 sps:$4 sm:$0xff]  }
 0x250   : > { %4304 = vmatpush1.bf16.msra.mxu0 %v6074_v29 }
 0x251   : > { %4305 = vmatprep.subr.bf16.mxu0 %v6079_v30 }
 0x253   : > { %4291 = vmatmul.mubr.bf16.gmra.mrb[12].mxu0 %v5557_v32 }
 0x254   : > { %4306 = vmatpush1.bf16.msra.mxu0 %v6077_v31  ;;  %v6109_v31 = vld [vmem:[%s7634_s2 + $0x3c4] ss:$8 sps:$4 sm:$0xff]  }
 0x255   : > { %4307 = vmatprep.subr.bf16.mxu0 %v6082_v35 }
 0x258   : > { %4308 = vmatpush1.bf16.msra.mxu0 %v6080_v36 }
 0x259   : > { %4309 = vmatprep.subr.bf16.mxu0 %v6085_v37 }
 0x25c   : > { %v2215_v33 = vpop.f32.mrb[16].mxu1  ;;  %4310 = vmatpush1.bf16.msra.mxu0 %v6083_v38  ;;  %v6107_v38 = vld [vmem:[%s7634_s2 + $0x3c0] ss:$8 sps:$4 sm:$0xff]  }
 0x25d   : > { %2240 = vst [vmem:[#allocation2 + $0x30] sm:$0xff] %v2215_v33  ;;  %v2217_v39 = vpop.f32.mrb[17].mxu1  ;;  %4311 = vmatprep.subr.bf16.mxu0 %v6088_v57  ;;  %v6112_v57 = vld [vmem:[%s7634_s2 + $0x3d4] ss:$8 sps:$4 sm:$0xff]  }
 0x25e   : > { %2241 = vst [vmem:[#allocation2 + $0x38] sm:$0xff] %v2217_v39  ;;  %v2219_v41 = vpop.f32.mrb[18].mxu1 }
 0x25f   : > { %2248 = vst [vmem:[#allocation2 + $0x70] sm:$0xff] %v2219_v41  ;;  %v2221_v42 = vpop.f32.mrb[19].mxu1 }
 0x260   : > { %2249 = vst [vmem:[#allocation2 + $0x78] sm:$0xff] %v2221_v42  ;;  %4312 = vmatpush1.bf16.msra.mxu0 %v6086_v0 }
 0x261   : > { %4313 = vmatprep.subr.bf16.mxu0 %v6091_v40 }
 0x264   : > { %v2276_v46 = vld [vmem:[#allocation2 + $0x30] sm:$0xf]  ;;  %v2388_v47 = vld [vmem:[#allocation2 + $0x30] sm:$0xf0]  ;;  %v2225_v48 = vpop.f32.mrb[20].mxu1  ;;  %4314 = vmatpush1.bf16.msra.mxu0 %v6089_v43 }
 0x265   : > { %vm2300_vm10 = vcmp.ge.f32.partialorder %v2276_v46, 1.25  ;;  %v2277_v18 = vld [vmem:[#allocation2 + $0x38] sm:$0xf]  ;;  %2256 = vst [vmem:[#allocation2 + $0xb0] sm:$0xff] %v2225_v48  ;;  %v2227_v49 = vpop.f32.mrb[21].mxu1  ;;  %4315 = vmatprep.subr.bf16.mxu0 %v6094_v44  ;;  %v2380_v55 = vmul.f32 0.75, %v2276_v46 }
 0x266   : > { %v5455_v51 = vsel %vm2300_vm10, 1.0, %v6162_v11  ;;  %vm2301_vm11 = vcmp.ge.f32.partialorder %v2277_v18, 1.25  ;;  %v2389_v52 = vld [vmem:[#allocation2 + $0x38] sm:$0xf0]  ;;  %2257 = vst [vmem:[#allocation2 + $0xb8] sm:$0xff] %v2227_v49  ;;  %v2229_v53 = vpop.f32.mrb[22].mxu1 }
 0x267   : > { %v2364_v54 = vsub.f32 1.0, %v5455_v51  ;;  %v2404_v56 = vrot.slane %v2388_v47, 4  ;;  %v5456_v58 = vsel %vm2301_vm11, 1.0, %v6162_v11  ;;  %2264 = vst [vmem:[#allocation2 + $0xf0] sm:$0xff] %v2229_v53  ;;  %v2231_v59 = vpop.f32.mrb[23].mxu1  ;;  %v2381_v62 = vmul.f32 0.75, %v2277_v18 }
 0x268   : > { %v5758_v60 = vpack.c.bf16 %v5456_v58, %v5455_v51  ;;  %v2365_v61 = vsub.f32 1.0, %v5456_v58  ;;  %v2405_v63 = vrot.slane %v2389_v52, 4  ;;  %2265 = vst [vmem:[#allocation2 + $0xf8] sm:$0xff] %v2231_v59  ;;  %4316 = vmatpush1.bf16.msra.mxu0 %v6092_v45  ;;  %v2528_v24 = vld [vmem:[#allocation2 + $0x70] sm:$0xf] }
 0x269   : > { %v2372_v2 = vmul.f32 %v2364_v54, %v2276_v46  ;;  %4317 = vmatprep.subr.bf16.mxu0 %v6097_v50  ;;  %v2420_v7 = vadd.f32 %v2404_v56, %v2380_v55  ;;  %v2529_v30 = vld [vmem:[#allocation2 + $0x78] sm:$0xf]  ;;  %v2648_v0 = vld [vmem:[#allocation2 + $0x70] sm:$0xf0]  ;;  %v2649_v42 = vld [vmem:[#allocation2 + $0x78] sm:$0xf0] }
 0x26a   : > { %v2349_v5 = vrot.slane %v5758_v60, 6  ;;  %v2373_v6 = vmul.f32 %v2365_v61, %v2277_v18  ;;  %v2421_v10 = vadd.f32 %v2405_v63, %v2381_v62  ;;  %v6110_v45 = vld [vmem:[%s7634_s2 + $0x3d0] ss:$8 sps:$4 sm:$0xff]   ;;  %v2664_v48 = vrot.slane %v2648_v0, 4  ;;  %v6115_v18 = vld [vmem:[%s7634_s2 + $0x3e4] ss:$8 sps:$4 sm:$0xff]  }
 0x26b   : > { %v2428_v9 = vmul.f32 0.97, %v2372_v2  ;;  %v2520_v20 = vmul.f32 0.75, %v2420_v7  ;;  %v2665_v50 = vrot.slane %v2649_v42, 4  ;;  %v6113_v56 = vld [vmem:[%s7634_s2 + $0x3e0] ss:$8 sps:$4 sm:$0xff]  }
 0x26c   : > { %v2429_v12 = vmul.f32 0.97, %v2373_v6  ;;  %2357 = vst [vmem:[#allocation3 + $0x18] sm:$0xcc] %v2349_v5  ;;  %4318 = vmatpush1.bf16.msra.mxu0 %v6095_v1  ;;  %v2521_v21 = vmul.f32 0.75, %v2421_v10 }
 0x26d   : > { %v2436_v13 = vadd.f32 %v2428_v9, %v2420_v7  ;;  %4319 = vmatprep.subr.bf16.mxu0 %v6100_v3  ;;  %v2536_v28 = vadd.f32 %v2528_v24, %v2520_v20  ;;  %v6118_v59 = vld [vmem:[%s7634_s2 + $0x3f4] ss:$8 sps:$4 sm:$0xff]   ;;  %v6116_v62 = vld [vmem:[%s7634_s2 + $0x3f0] ss:$8 sps:$4 sm:$0xff]  }
 0x26e   : > { %v2437_v14 = vadd.f32 %v2429_v12, %v2421_v10  ;;  %v2537_v32 = vadd.f32 %v2529_v30, %v2521_v21  ;;  %v2788_v12 = vld [vmem:[#allocation2 + $0xb0] sm:$0xf]  ;;  %v2908_v21 = vld [vmem:[#allocation2 + $0xb0] sm:$0xf0] }
 0x26f   : > { %vm2444_vm12 = vcmp.ge.f32.partialorder %v2436_v13, 1.25  ;;  %v2640_v40 = vmul.f32 0.75, %v2536_v28 }
 0x270   : > { %v5467_v15 = vsel %vm2444_vm12, 1.0, %v6162_v11  ;;  %vm2445_vm13 = vcmp.ge.f32.partialorder %v2437_v14, 1.25  ;;  %4320 = vmatpush1.bf16.msra.mxu0 %v6098_v4  ;;  %v2641_v44 = vmul.f32 0.75, %v2537_v32 }
 0x271   : > { %v5468_v17 = vsel %vm2445_vm13, 1.0, %v6162_v11  ;;  %v2504_v19 = vsub.f32 1.0, %v5467_v15  ;;  %4321 = vmatprep.subr.bf16.mxu0 %v6103_v8  ;;  %v2680_v52 = vadd.f32 %v2664_v48, %v2640_v40  ;;  %v3048_v48 = vld [vmem:[#allocation2 + $0xf0] sm:$0xf] }
 0x272   : > { %v2505_v34 = vsub.f32 1.0, %v5468_v17  ;;  %v5762_v22 = vpack.c.bf16 %v5468_v17, %v5467_v15  ;;  %v2681_v54 = vadd.f32 %v2665_v50, %v2641_v44 }
 0x273   : > { %v2512_v23 = vmul.f32 %v2504_v19, %v2436_v13  ;;  %v2780_v2 = vmul.f32 0.75, %v2680_v52  ;;  %v3281_v9 = vld [vmem:[#allocation3 + $0x18] sm:$0xff] }
 0x274   : > { %v2513_v26 = vmul.f32 %v2505_v34, %v2437_v14  ;;  %4322 = vmatpush1.bf16.msra.mxu0 %v6101_v16  ;;  %2497 = vst [vmem:[#allocation3 + $0x38] sm:$0x33] %v5762_v22  ;;  %v2781_v5 = vmul.f32 0.75, %v2681_v54  ;;  %v2789_v16 = vld [vmem:[#allocation2 + $0xb8] sm:$0xf] }
 0x275   : > { %v2544_v29 = vmul.f32 0.97, %v2512_v23  ;;  %4323 = vmatprep.subr.bf16.mxu0 %v6106_v25  ;;  %v2796_v14 = vadd.f32 %v2788_v12, %v2780_v2  ;;  %v6119_v2 = vld [vmem:[%s7635_s3 + $0x40] sm:$0xff]   ;;  %v6126_v12 = vld [vmem:[%s7635_s3 + $0x18] sm:$0xff]  }
 0x276   : > { %v2545_v35 = vmul.f32 0.97, %v2513_v26  ;;  %v2797_v17 = vadd.f32 %v2789_v16, %v2781_v5  ;;  %v2909_v26 = vld [vmem:[#allocation2 + $0xb8] sm:$0xf0]  ;;  %v6121_v5 = vld [vmem:[%s7635_s3 + $0x48] sm:$0xff]   ;;  %v6132_v16 = vld [vmem:[%s7635_s3 + $0x30] sm:$0xff]  }
 0x277   : > { %v2552_v36 = vadd.f32 %v2544_v29, %v2536_v28  ;;  %v2900_v23 = vmul.f32 0.75, %v2796_v14 }
 0x278   : > { %v2553_v37 = vadd.f32 %v2545_v35, %v2537_v32  ;;  %4324 = vmatpush1.bf16.msra.mxu0 %v6104_v27  ;;  %v2901_v28 = vmul.f32 0.75, %v2797_v17  ;;  %v2925_v35 = vrot.slane %v2909_v26, 4 }
 0x279   : > { %vm2560_vm14 = vcmp.ge.f32.partialorder %v2552_v36, 1.25  ;;  %4325 = vmatprep.subr.bf16.mxu0 %v6109_v31  ;;  %v2924_v31 = vrot.slane %v2908_v21, 4 }
 0x27a   : > { %v5479_v33 = vsel %vm2560_vm14, 1.0, %v6162_v11  ;;  %vm2561_vm15 = vcmp.ge.f32.partialorder %v2553_v37, 1.25 }
 0x27b   : > { %v2624_v39 = vsub.f32 1.0, %v5479_v33  ;;  %v5480_v41 = vsel %vm2561_vm15, 1.0, %v6162_v11 }
 0x27c   : > { %v2625_v43 = vsub.f32 1.0, %v5480_v41  ;;  %4326 = vmatpush1.bf16.msra.mxu0 %v6107_v38  ;;  %v5766_v46 = vpack.c.bf16 %v5480_v41, %v5479_v33 }
 0x27d   : > { %v2632_v47 = vmul.f32 %v2624_v39, %v2552_v36  ;;  %4327 = vmatprep.subr.bf16.mxu0 %v6112_v57  ;;  %v2941_v57 = vadd.f32 %v2925_v35, %v2901_v28 }
 0x27e   : > { %v2633_v49 = vmul.f32 %v2625_v43, %v2553_v37  ;;  %v2609_v51 = vrot.slane %v5766_v46, 6  ;;  %v2940_v37 = vadd.f32 %v2924_v31, %v2900_v23 }
 0x27f   : > { %v2688_v53 = vmul.f32 0.97, %v2632_v47 }
 0x280   : > { %v2689_v55 = vmul.f32 0.97, %v2633_v49  ;;  %4328 = vmatpush1.bf16.msra.mxu0 %v6110_v45  ;;  %2617 = vst [vmem:[#allocation3 + $0x38] sm:$0xcc] %v2609_v51  ;;  %v3040_v43 = vmul.f32 0.75, %v2940_v37  ;;  %v3041_v45 = vmul.f32 0.75, %v2941_v57 }
 0x281   : > { %v2696_v58 = vadd.f32 %v2688_v53, %v2680_v52  ;;  %4329 = vmatprep.subr.bf16.mxu0 %v6115_v18  ;;  %v3049_v51 = vld [vmem:[#allocation2 + $0xf8] sm:$0xf] }
 0x282   : > { %v2697_v60 = vadd.f32 %v2689_v55, %v2681_v54  ;;  %v3056_v49 = vadd.f32 %v3048_v48, %v3040_v43  ;;  %v3057_v52 = vadd.f32 %v3049_v51, %v3041_v45 }
 0x283   : > { %vm2704_vm0 = vcmp.ge.f32.partialorder %v2696_v58, 1.25 }
 0x284   : > { %v5491_v61 = vsel %vm2704_vm0, 1.0, %v6162_v11  ;;  %vm2705_vm1 = vcmp.ge.f32.partialorder %v2697_v60, 1.25  ;;  %4330 = vmatpush1.bf16.msra.mxu0 %v6113_v56 }
 0x285   : > { %v5492_v63 = vsel %vm2705_vm1, 1.0, %v6162_v11  ;;  %v2764_v1 = vsub.f32 1.0, %v5491_v61  ;;  %4331 = vmatprep.subr.bf16.mxu0 %v6118_v59 }
 0x286   : > { %v2765_v3 = vsub.f32 1.0, %v5492_v63  ;;  %v5770_v6 = vpack.c.bf16 %v5492_v63, %v5491_v61 }
 0x287   : > { %v2772_v7 = vmul.f32 %v2764_v1, %v2696_v58  ;;  %v3285_v10 = vld [vmem:[#allocation3 + $0x38] sm:$0xff] }
 0x288   : > { %v2773_v4 = vmul.f32 %v2765_v3, %v2697_v60  ;;  %4332 = vmatpush1.bf16.msra.mxu0 %v6116_v62  ;;  %v5551_v13 = vcombine.low %v3281_v9, %v3285_v10  ;;  %v5552_v8 = vcombine.high %v3281_v9, %v3285_v10  ;;  %2757 = vst [vmem:[#allocation3 + $0x58] sm:$0x33] %v5770_v6  ;;  %v6120_v3 = vld [vmem:[%s7635_s3] sm:$0xff]   ;;  %v6122_v6 = vld [vmem:[%s7635_s3 + $0x8] sm:$0xff]   ;;  %v6124_v9 = vld [vmem:[%s7635_s3 + $0x10] sm:$0xff]  }
 0x289   : > { %v2804_v15 = vmul.f32 0.97, %v2772_v7  ;;  %5791 = vmatprep.subr.bf16.mxu0 %v6119_v2  ;;  %v6123_v7 = vld [vmem:[%s7635_s3 + $0x50] sm:$0xff]   ;;  %v6125_v10 = vld [vmem:[%s7635_s3 + $0x58] sm:$0xff]  }
 0x28a   : > { %v2805_v19 = vmul.f32 0.97, %v2773_v4  ;;  %4333 = vmatprep.mubr.bf16.mxu0 %v5552_v8  ;;  %v6127_v4 = vld [vmem:[%s7635_s3 + $0x60] sm:$0xff]   ;;  %v6129_v8 = vld [vmem:[%s7635_s3 + $0x68] sm:$0xff]  }
 0x28b   : > { %v2812_v20 = vadd.f32 %v2804_v15, %v2796_v14  ;;  %4334 = vmatmul.mubr.bf16.vlgmr.msra.gmra.mrb[8].mxu0 %v5551_v13  ;;  %v6128_v13 = vld [vmem:[%s7635_s3 + $0x20] sm:$0xff]   ;;  %v6130_v14 = vld [vmem:[%s7635_s3 + $0x28] sm:$0xff]   ;;  %v6131_v15 = vld [vmem:[%s7635_s3 + $0x70] sm:$0xff]  }
 0x28c   : > { %v2813_v25 = vadd.f32 %v2805_v19, %v2797_v17  ;;  %5792 = vmatpush3.bf16.msra.mxu0 %v6120_v3  ;;  %v6133_v17 = vld [vmem:[%s7635_s3 + $0x78] sm:$0xff]  }
 0x28d   : > { %vm2820_vm2 = vcmp.ge.f32.partialorder %v2812_v20, 1.25  ;;  %5793 = vmatprep.subr.bf16.mxu0 %v6121_v5  ;;  %v6134_v19 = vld [vmem:[%s7635_s3 + $0x38] sm:$0xff]  }
 0x28e   : > { %v5503_v34 = vsel %vm2820_vm2, 1.0, %v6162_v11  ;;  %vm2821_vm3 = vcmp.ge.f32.partialorder %v2813_v25, 1.25 }
 0x28f   : > { %v2884_v22 = vsub.f32 1.0, %v5503_v34  ;;  %v5504_v24 = vsel %vm2821_vm3, 1.0, %v6162_v11 }
 0x290   : > { %v2885_v27 = vsub.f32 1.0, %v5504_v24  ;;  %v5774_v29 = vpack.c.bf16 %v5504_v24, %v5503_v34  ;;  %5794 = vmatpush3.bf16.msra.mxu0 %v6122_v6 }
 0x291   : > { %v2892_v30 = vmul.f32 %v2884_v22, %v2812_v20  ;;  %5795 = vmatprep.subr.bf16.mxu0 %v6123_v7 }
 0x292   : > { %v2893_v32 = vmul.f32 %v2885_v27, %v2813_v25  ;;  %v2869_v36 = vrot.slane %v5774_v29, 6 }
 0x293   : > { %v2948_v38 = vmul.f32 0.97, %v2892_v30 }
 0x294   : > { %v2949_v33 = vmul.f32 0.97, %v2893_v32  ;;  %2877 = vst [vmem:[#allocation3 + $0x58] sm:$0xcc] %v2869_v36  ;;  %5796 = vmatpush3.bf16.msra.mxu0 %v6124_v9 }
 0x295   : > { %v2956_v0 = vadd.f32 %v2948_v38, %v2940_v37  ;;  %5797 = vmatprep.subr.bf16.mxu0 %v6125_v10 }
 0x296   : > { %v2957_v39 = vadd.f32 %v2949_v33, %v2941_v57 }
 0x297   : > { %vm2964_vm4 = vcmp.ge.f32.partialorder %v2956_v0, 1.25 }
 0x298   : > { %v5515_v40 = vsel %vm2964_vm4, 1.0, %v6162_v11  ;;  %vm2965_vm5 = vcmp.ge.f32.partialorder %v2957_v39, 1.25  ;;  %5798 = vmatpush3.bf16.msra.mxu0 %v6126_v12 }
 0x299   : > { %v5516_v41 = vsel %vm2965_vm5, 1.0, %v6162_v11  ;;  %v3024_v42 = vsub.f32 1.0, %v5515_v40  ;;  %5799 = vmatprep.subr.bf16.mxu0 %v6127_v4 }
 0x29a   : > { %v3025_v44 = vsub.f32 1.0, %v5516_v41  ;;  %v5778_v46 = vpack.c.bf16 %v5516_v41, %v5515_v40 }
 0x29b   : > { %v3032_v47 = vmul.f32 %v3024_v42, %v2956_v0  ;;  %v3289_v61 = vld [vmem:[#allocation3 + $0x58] sm:$0xff] }
 0x29c   : > { %v3033_v18 = vmul.f32 %v3025_v44, %v2957_v39  ;;  %3017 = vst [vmem:[#allocation3 + $0x78] sm:$0x33] %v5778_v46  ;;  %5800 = vmatpush3.bf16.msra.mxu0 %v6128_v13 }
 0x29d   : > { %v3064_v50 = vmul.f32 0.97, %v3032_v47  ;;  %5801 = vmatprep.subr.bf16.mxu0 %v6129_v8 }
 0x29e   : > { %v3065_v53 = vmul.f32 0.97, %v3033_v18 }
 0x29f   : > { %v3072_v54 = vadd.f32 %v3064_v50, %v3056_v49 }
 0x2a0   : > { %v3073_v55 = vadd.f32 %v3065_v53, %v3057_v52  ;;  %5802 = vmatpush3.bf16.msra.mxu0 %v6130_v14 }
 0x2a1   : > { %vm3080_vm6 = vcmp.ge.f32.partialorder %v3072_v54, 1.25  ;;  %5803 = vmatprep.subr.bf16.mxu0 %v6131_v15 }
 0x2a2   : > { %v5527_v56 = vsel %vm3080_vm6, 1.0, %v6162_v11  ;;  %vm3081_vm7 = vcmp.ge.f32.partialorder %v3073_v55, 1.25 }
 0x2a3   : > { %v5528_v58 = vsel %vm3081_vm7, 1.0, %v6162_v11 }
 0x2a4   : > { %v5782_v59 = vpack.c.bf16 %v5528_v58, %v5527_v56  ;;  %5804 = vmatpush3.bf16.msra.mxu0 %v6132_v16 }
 0x2a5   : > { %5805 = vmatprep.subr.bf16.mxu0 %v6133_v17 }
 0x2a6   : > { %v3129_v60 = vrot.slane %v5782_v59, 6 }
 0x2a8   : > { %3137 = vst [vmem:[#allocation3 + $0x78] sm:$0xcc] %v3129_v60  ;;  %5806 = vmatpush3.bf16.msra.mxu0 %v6134_v19 }
 0x2af   : > { %v3293_v62 = vld [vmem:[#allocation3 + $0x78] sm:$0xff] }
 0x2b0   : > { %v5560_v63 = vcombine.high %v3289_v61, %v3293_v62  ;;  %v5559_v1 = vcombine.low %v3289_v61, %v3293_v62 }
 0x2b2   : > { %4343 = vmatprep.mubr.bf16.mxu0 %v5560_v63 }
 0x2b3   : > { %4344 = vmatmul.mubr.bf16.gmra.mrb[12].mxu0 %v5559_v1 }
 0x35e   : > { %v4335_v20 = vpop.f32.mrb[8].mxu0 }
 0x35f   : > { %4354 = vst [vmem:[#allocation4] sm:$0xff] %v4335_v20  ;;  %v4337_v25 = vpop.f32.mrb[9].mxu0 }
 0x360   : > { %4355 = vst [vmem:[#allocation4 + $0x8] sm:$0xff] %v4337_v25  ;;  %v4339_v34 = vpop.f32.mrb[10].mxu0 }
 0x361   : > { %4356 = vst [vmem:[#allocation4 + $0x10] sm:$0xff] %v4339_v34  ;;  %v4341_v21 = vpop.f32.mrb[11].mxu0 }
 0x362   : > { %4357 = vst [vmem:[#allocation4 + $0x18] sm:$0xff] %v4341_v21 }
 0x366   : > { %v4362_v22 = vld [vmem:[#allocation4] sm:$0xf]  ;;  %v4384_v23 = vld [vmem:[#allocation4] sm:$0xf0] }
 0x367   : > { %vm4368_vm8 = vcmp.ge.f32.partialorder %v4362_v22, 1.25  ;;  %v4363_v24 = vld [vmem:[#allocation4 + $0x8] sm:$0xf]  ;;  %v4382_v27 = vmul.f32 0.75, %v4362_v22  ;;  %v4385_v28 = vld [vmem:[#allocation4 + $0x8] sm:$0xf0] }
 0x368   : > { %v5689_v26 = vsel %vm4368_vm8, 1.0, %v6162_v11  ;;  %vm4369_vm9 = vcmp.ge.f32.partialorder %v4363_v24, 1.25  ;;  %v4388_v31 = vrot.slane %v4384_v23, 4  ;;  %v4383_v36 = vmul.f32 0.75, %v4363_v24  ;;  %v4420_v53 = vld [vmem:[#allocation4 + $0x10] sm:$0xf] }
 0x369   : > { %v4374_v29 = vpack.c.bf16 %v5689_v26, %v5689_v26  ;;  %v4378_v30 = vsub.f32 1.0, %v5689_v26  ;;  %v5690_v32 = vsel %vm4369_vm9, 1.0, %v6162_v11  ;;  %v4389_v37 = vrot.slane %v4385_v28, 4  ;;  %v4421_v59 = vld [vmem:[#allocation4 + $0x18] sm:$0xf] }
 0x36a   : > { %v4379_v35 = vsub.f32 1.0, %v5690_v32  ;;  %v4375_v38 = vpack.c.bf16 %v5690_v32, %v5690_v32  ;;  %v4392_v0 = vadd.f32 %v4388_v31, %v4382_v27  ;;  %v4450_v2 = vld [vmem:[#allocation4 + $0x10] sm:$0xf0]  ;;  %v4451_v7 = vld [vmem:[#allocation4 + $0x18] sm:$0xf0] }
 0x36b   : > { %4376 = vst [vmem:[#allocation5] sm:$0x3] %v4374_v29  ;;  %v4380_v57 = vmul.f32 %v4378_v30, %v4362_v22  ;;  %v4393_v40 = vadd.f32 %v4389_v37, %v4383_v36  ;;  %v4454_v8 = vrot.slane %v4450_v2, 4  ;;  %v4455_v16 = vrot.slane %v4451_v7, 4 }
 0x36c   : > { %v4381_v33 = vmul.f32 %v4379_v35, %v4363_v24  ;;  %4377 = vst [vmem:[#allocation5 + $0x8] sm:$0x3] %v4375_v38  ;;  %v4418_v47 = vmul.f32 0.75, %v4392_v0 }
 0x36d   : > { %v4394_v39 = vmul.f32 0.97, %v4380_v57  ;;  %v4419_v49 = vmul.f32 0.75, %v4393_v40 }
 0x36e   : > { %v4395_v41 = vmul.f32 0.97, %v4381_v33  ;;  %v4422_v56 = vadd.f32 %v4420_v53, %v4418_v47 }
 0x36f   : > { %v4396_v42 = vadd.f32 %v4394_v39, %v4392_v0  ;;  %v4423_v60 = vadd.f32 %v4421_v59, %v4419_v49 }
 0x370   : > { %v4397_v43 = vadd.f32 %v4395_v41, %v4393_v40  ;;  %v4448_v5 = vmul.f32 0.75, %v4422_v56 }
 0x371   : > { %vm4398_vm10 = vcmp.ge.f32.partialorder %v4396_v42, 1.25  ;;  %v4449_v12 = vmul.f32 0.75, %v4423_v60 }
 0x372   : > { %v5691_v44 = vsel %vm4398_vm10, 1.0, %v6162_v11  ;;  %vm4399_vm11 = vcmp.ge.f32.partialorder %v4397_v43, 1.25  ;;  %v4458_v19 = vadd.f32 %v4454_v8, %v4448_v5 }
 0x373   : > { %v5692_v45 = vsel %vm4399_vm11, 1.0, %v6162_v11  ;;  %v4414_v46 = vsub.f32 1.0, %v5691_v44  ;;  %v4404_v48 = vpack.c.bf16 %v5691_v44, %v5691_v44  ;;  %v4459_v25 = vadd.f32 %v4455_v16, %v4449_v12 }
 0x374   : > { %v4415_v18 = vsub.f32 1.0, %v5692_v45  ;;  %v4405_v50 = vpack.c.bf16 %v5692_v45, %v5692_v45  ;;  %v4484_v33 = vmul.f32 0.75, %v4458_v19 }
 0x375   : > { %v4416_v51 = vmul.f32 %v4414_v46, %v4396_v42  ;;  %v4408_v52 = vrot.slane %v4404_v48, 6  ;;  %v4485_v39 = vmul.f32 0.75, %v4459_v25 }
 0x376   : > { %v4417_v54 = vmul.f32 %v4415_v18, %v4397_v43  ;;  %v4409_v55 = vrot.slane %v4405_v50, 6 }
 0x377   : > { %v4424_v58 = vmul.f32 0.97, %v4416_v51  ;;  %4412 = vst [vmem:[#allocation5] sm:$0xc] %v4408_v52 }
 0x378   : > { %v4425_v61 = vmul.f32 0.97, %v4417_v54  ;;  %4413 = vst [vmem:[#allocation5 + $0x8] sm:$0xc] %v4409_v55 }
 0x379   : > { %v4426_v62 = vadd.f32 %v4424_v58, %v4422_v56 }
 0x37a   : > { %v4427_v63 = vadd.f32 %v4425_v61, %v4423_v60 }
 0x37b   : > { %vm4428_vm12 = vcmp.ge.f32.partialorder %v4426_v62, 1.25 }
 0x37c   : > { %v5693_v1 = vsel %vm4428_vm12, 1.0, %v6162_v11  ;;  %vm4429_vm13 = vcmp.ge.f32.partialorder %v4427_v63, 1.25 }
 0x37d   : > { %v4444_v3 = vsub.f32 1.0, %v5693_v1  ;;  %v5694_v6 = vsel %vm4429_vm13, 1.0, %v6162_v11  ;;  %v4434_v9 = vpack.c.bf16 %v5693_v1, %v5693_v1 }
 0x37e   : > { %v4445_v10 = vsub.f32 1.0, %v5694_v6  ;;  %v4435_v4 = vpack.c.bf16 %v5694_v6, %v5694_v6 }
 0x37f   : > { %v4446_v13 = vmul.f32 %v4444_v3, %v4426_v62  ;;  %v4438_v14 = vrot.slane %v4434_v9, 4 }
 0x380   : > { %v4447_v15 = vmul.f32 %v4445_v10, %v4427_v63  ;;  %v4439_v17 = vrot.slane %v4435_v4, 4 }
 0x381   : > { %v4460_v20 = vmul.f32 0.97, %v4446_v13  ;;  %4442 = vst [vmem:[#allocation5] sm:$0x30] %v4438_v14 }
 0x382   : > { %v4461_v34 = vmul.f32 0.97, %v4447_v15  ;;  %4443 = vst [vmem:[#allocation5 + $0x8] sm:$0x30] %v4439_v17 }
 0x383   : > { %v4462_v21 = vadd.f32 %v4460_v20, %v4458_v19 }
 0x384   : > { %v4463_v22 = vadd.f32 %v4461_v34, %v4459_v25 }
 0x385   : > { %vm4464_vm14 = vcmp.ge.f32.partialorder %v4462_v21, 1.25 }
 0x386   : > { %v5695_v23 = vsel %vm4464_vm14, 1.0, %v6162_v11  ;;  %vm4465_vm15 = vcmp.ge.f32.partialorder %v4463_v22, 1.25  ;;  %v4345_v24 = vpop.f32.mrb[12].mxu0 }
 0x387   : > { %v5696_v26 = vsel %vm4465_vm15, 1.0, %v6162_v11  ;;  %4358 = vst [vmem:[#allocation4 + $0x20] sm:$0xff] %v4345_v24  ;;  %v4480_v27 = vsub.f32 1.0, %v5695_v23  ;;  %v4347_v28 = vpop.f32.mrb[13].mxu0  ;;  %v4470_v29 = vpack.c.bf16 %v5695_v23, %v5695_v23 }
 0x388   : > { %4359 = vst [vmem:[#allocation4 + $0x28] sm:$0xff] %v4347_v28  ;;  %v4481_v30 = vsub.f32 1.0, %v5696_v26  ;;  %v4349_v31 = vpop.f32.mrb[14].mxu0  ;;  %v4471_v32 = vpack.c.bf16 %v5696_v26, %v5696_v26 }
 0x389   : > { %4360 = vst [vmem:[#allocation4 + $0x30] sm:$0xff] %v4349_v31  ;;  %v4351_v35 = vpop.f32.mrb[15].mxu0  ;;  %v4474_v36 = vrot.slane %v4470_v29, 2  ;;  %v4482_v38 = vmul.f32 %v4480_v27, %v4462_v21 }
 0x38a   : > { %4361 = vst [vmem:[#allocation4 + $0x38] sm:$0xff] %v4351_v35  ;;  %v4475_v37 = vrot.slane %v4471_v32, 2  ;;  %v4483_v57 = vmul.f32 %v4481_v30, %v4463_v22 }
 0x38b   : > { %4478 = vst [vmem:[#allocation5] sm:$0xc0] %v4474_v36  ;;  %v4490_v41 = vmul.f32 0.97, %v4482_v38 }
 0x38c   : > { %4479 = vst [vmem:[#allocation5 + $0x8] sm:$0xc0] %v4475_v37  ;;  %v4491_v44 = vmul.f32 0.97, %v4483_v57 }
 0x38e   : > { %v4486_v0 = vld [vmem:[#allocation4 + $0x20] sm:$0xf]  ;;  %v4510_v48 = vld [vmem:[#allocation4 + $0x20] sm:$0xf0] }
 0x38f   : > { %v4488_v40 = vadd.f32 %v4486_v0, %v4484_v33  ;;  %v4487_v42 = vld [vmem:[#allocation4 + $0x28] sm:$0xf]  ;;  %v4511_v51 = vld [vmem:[#allocation4 + $0x28] sm:$0xf0]  ;;  %v4514_v59 = vrot.slane %v4510_v48, 4 }
 0x390   : > { %v4489_v43 = vadd.f32 %v4487_v42, %v4485_v39  ;;  %v4515_v61 = vrot.slane %v4511_v51, 4  ;;  %v4546_v17 = vld [vmem:[#allocation4 + $0x30] sm:$0xf]  ;;  %v4576_v27 = vld [vmem:[#allocation4 + $0x30] sm:$0xf0] }
 0x391   : > { %v4492_v45 = vadd.f32 %v4490_v41, %v4488_v40  ;;  %v4508_v50 = vmul.f32 0.75, %v4488_v40  ;;  %v4547_v34 = vld [vmem:[#allocation4 + $0x38] sm:$0xf]  ;;  %v4577_v30 = vld [vmem:[#allocation4 + $0x38] sm:$0xf0]  ;;  %v4580_v57 = vrot.slane %v4576_v27, 4 }
 0x392   : > { %v4493_v46 = vadd.f32 %v4491_v44, %v4489_v43  ;;  %v4606_v18 = vld [vmem:[#allocation5] sm:$0xff]  ;;  %v4509_v55 = vmul.f32 0.75, %v4489_v43  ;;  %v4581_v39 = vrot.slane %v4577_v30, 4 }
 0x393   : > { %v4607_v47 = vld [vmem:[#allocation5 + $0x8] sm:$0xff]  ;;  %vm4494_vm0 = vcmp.ge.f32.partialorder %v4492_v45, 1.25  ;;  %v4518_v63 = vadd.f32 %v4514_v59, %v4508_v50  ;;  %v6139_v59 = vld [vmem:[%s7636_s4 + $0x18] sm:$0xff]  }
 0x394   : > { %4770 = vmatprep.mubr.bf16.mxu0 %v4607_v47  ;;  %vm4495_vm1 = vcmp.ge.f32.partialorder %v4493_v46, 1.25  ;;  %v5697_v49 = vsel %vm4494_vm0, 1.0, %v6162_v11  ;;  %v4519_v2 = vadd.f32 %v4515_v61, %v4509_v55  ;;  %v6136_v55 = vld [vmem:[%s7636_s4] sm:$0xff]   ;;  %v6141_v61 = vld [vmem:[%s7636_s4 + $0x28] sm:$0xff]  }
 0x395   : > { %4771 = vmatmul.mubr.bf16.vlgmr.msra.gmra.mrb[16].mxu0 %v4606_v18  ;;  %v5698_v52 = vsel %vm4495_vm1, 1.0, %v6162_v11  ;;  %v4500_v53 = vpack.c.bf16 %v5697_v49, %v5697_v49  ;;  %v4504_v54 = vsub.f32 1.0, %v5697_v49  ;;  %v4544_v9 = vmul.f32 0.75, %v4518_v63  ;;  %5829 = vmatprep.subr.bf16.mxu1 %v6136_v55 }
 0x396   : > { %v4501_v56 = vpack.c.bf16 %v5698_v52, %v5698_v52  ;;  %v4505_v58 = vsub.f32 1.0, %v5698_v52  ;;  %v4545_v13 = vmul.f32 0.75, %v4519_v2  ;;  %5830 = vmatpush3.bf16.msra.mxu1 %v6136_v55 }
 0x397   : > { %4502 = vst [vmem:[#allocation5 + $0x10] sm:$0x3] %v4500_v53  ;;  %v4506_v60 = vmul.f32 %v4504_v54, %v4492_v45  ;;  %v4548_v25 = vadd.f32 %v4546_v17, %v4544_v9 }
 0x398   : > { %4503 = vst [vmem:[#allocation5 + $0x18] sm:$0x3] %v4501_v56  ;;  %v4507_v62 = vmul.f32 %v4505_v58, %v4493_v46  ;;  %v4549_v22 = vadd.f32 %v4547_v34, %v4545_v13  ;;  %v6137_v56 = vld [vmem:[%s7636_s4 + $0x8] sm:$0xff]   ;;  %v6138_v58 = vld [vmem:[%s7636_s4 + $0x10] sm:$0xff]  }
 0x399   : > { %v4520_v1 = vmul.f32 0.97, %v4506_v60  ;;  %v4574_v29 = vmul.f32 0.75, %v4548_v25  ;;  %5831 = vmatprep.subr.bf16.mxu1 %v6137_v56  ;;  %v6140_v60 = vld [vmem:[%s7636_s4 + $0x20] sm:$0xff]  }
 0x39a   : > { %v4521_v3 = vmul.f32 0.97, %v4507_v62  ;;  %v4575_v36 = vmul.f32 0.75, %v4549_v22  ;;  %5832 = vmatpush3.bf16.msra.mxu1 %v6137_v56  ;;  %v6142_v62 = vld [vmem:[%s7636_s4 + $0x30] sm:$0xff]  }
 0x39b   : > { %v4522_v5 = vadd.f32 %v4520_v1, %v4518_v63  ;;  %v4584_v42 = vadd.f32 %v4580_v57, %v4574_v29  ;;  %5833 = vmatprep.subr.bf16.mxu1 %v6138_v58  ;;  %v6143_v63 = vld [vmem:[%s7636_s4 + $0x38] sm:$0xff]  }
 0x39c   : > { %v4523_v6 = vadd.f32 %v4521_v3, %v4519_v2  ;;  %v4585_v44 = vadd.f32 %v4581_v39, %v4575_v36 }
 0x39d   : > { %vm4524_vm2 = vcmp.ge.f32.partialorder %v4522_v5, 1.25 }
 0x39e   : > { %vm4525_vm3 = vcmp.ge.f32.partialorder %v4523_v6, 1.25  ;;  %v5699_v7 = vsel %vm4524_vm2, 1.0, %v6162_v11  ;;  %5834 = vmatpush3.bf16.msra.mxu1 %v6138_v58 }
 0x39f   : > { %v5700_v10 = vsel %vm4525_vm3, 1.0, %v6162_v11  ;;  %v4530_v12 = vpack.c.bf16 %v5699_v7, %v5699_v7  ;;  %v4540_v4 = vsub.f32 1.0, %v5699_v7  ;;  %5835 = vmatprep.subr.bf16.mxu1 %v6139_v59 }
 0x3a0   : > { %v4531_v8 = vpack.c.bf16 %v5700_v10, %v5700_v10  ;;  %v4541_v14 = vsub.f32 1.0, %v5700_v10 }
 0x3a1   : > { %v4534_v15 = vrot.slane %v4530_v12, 6  ;;  %v4542_v16 = vmul.f32 %v4540_v4, %v4522_v5 }
 0x3a2   : > { %v4535_v19 = vrot.slane %v4531_v8, 6  ;;  %v4543_v20 = vmul.f32 %v4541_v14, %v4523_v6  ;;  %5836 = vmatpush3.bf16.msra.mxu1 %v6139_v59 }
 0x3a3   : > { %4538 = vst [vmem:[#allocation5 + $0x10] sm:$0xc] %v4534_v15  ;;  %v4550_v21 = vmul.f32 0.97, %v4542_v16  ;;  %5837 = vmatprep.subr.bf16.mxu1 %v6140_v60 }
 0x3a4   : > { %4539 = vst [vmem:[#allocation5 + $0x18] sm:$0xc] %v4535_v19  ;;  %v4551_v23 = vmul.f32 0.97, %v4543_v20 }
 0x3a5   : > { %v4552_v24 = vadd.f32 %v4550_v21, %v4548_v25 }
 0x3a6   : > { %v4553_v26 = vadd.f32 %v4551_v23, %v4549_v22  ;;  %5838 = vmatpush3.bf16.msra.mxu1 %v6140_v60 }
 0x3a7   : > { %vm4554_vm4 = vcmp.ge.f32.partialorder %v4552_v24, 1.25  ;;  %5839 = vmatprep.subr.bf16.mxu1 %v6141_v61 }
 0x3a8   : > { %vm4555_vm5 = vcmp.ge.f32.partialorder %v4553_v26, 1.25  ;;  %v5701_v28 = vsel %vm4554_vm4, 1.0, %v6162_v11 }
 0x3a9   : > { %v5702_v31 = vsel %vm4555_vm5, 1.0, %v6162_v11  ;;  %v4560_v32 = vpack.c.bf16 %v5701_v28, %v5701_v28  ;;  %v4570_v35 = vsub.f32 1.0, %v5701_v28 }
 0x3aa   : > { %v4561_v37 = vpack.c.bf16 %v5702_v31, %v5702_v31  ;;  %v4571_v38 = vsub.f32 1.0, %v5702_v31  ;;  %5840 = vmatpush3.bf16.msra.mxu1 %v6141_v61 }
 0x3ab   : > { %v4564_v33 = vrot.slane %v4560_v32, 4  ;;  %v4572_v0 = vmul.f32 %v4570_v35, %v4552_v24  ;;  %5841 = vmatprep.subr.bf16.mxu1 %v6142_v62 }
 0x3ac   : > { %v4565_v40 = vrot.slane %v4561_v37, 4  ;;  %v4573_v41 = vmul.f32 %v4571_v38, %v4553_v26 }
 0x3ad   : > { %4568 = vst [vmem:[#allocation5 + $0x10] sm:$0x30] %v4564_v33  ;;  %v4586_v43 = vmul.f32 0.97, %v4572_v0 }
 0x3ae   : > { %4569 = vst [vmem:[#allocation5 + $0x18] sm:$0x30] %v4565_v40  ;;  %v4587_v45 = vmul.f32 0.97, %v4573_v41  ;;  %5842 = vmatpush3.bf16.msra.mxu1 %v6142_v62 }
 0x3af   : > { %v4588_v46 = vadd.f32 %v4586_v43, %v4584_v42  ;;  %5843 = vmatprep.subr.bf16.mxu1 %v6143_v63 }
 0x3b0   : > { %v4589_v47 = vadd.f32 %v4587_v45, %v4585_v44 }
 0x3b1   : > { %vm4590_vm6 = vcmp.ge.f32.partialorder %v4588_v46, 1.25 }
 0x3b2   : > { %vm4591_vm7 = vcmp.ge.f32.partialorder %v4589_v47, 1.25  ;;  %v5703_v48 = vsel %vm4590_vm6, 1.0, %v6162_v11  ;;  %5844 = vmatpush3.bf16.msra.mxu1 %v6143_v63 }
 0x3b3   : > { %v5704_v18 = vsel %vm4591_vm7, 1.0, %v6162_v11  ;;  %v4596_v49 = vpack.c.bf16 %v5703_v48, %v5703_v48 }
 0x3b4   : > { %v4597_v50 = vpack.c.bf16 %v5704_v18, %v5704_v18 }
 0x3b5   : > { %v4600_v51 = vrot.slane %v4596_v49, 2 }
 0x3b6   : > { %v4601_v52 = vrot.slane %v4597_v50, 2 }
 0x3b7   : > { %4604 = vst [vmem:[#allocation5 + $0x10] sm:$0xc0] %v4600_v51 }
 0x3b8   : > { %4605 = vst [vmem:[#allocation5 + $0x18] sm:$0xc0] %v4601_v52 }
 0x3be   : > { %v4608_v54 = vld [vmem:[#allocation5 + $0x10] sm:$0xff] }
 0x3bf   : > { %v4609_v53 = vld [vmem:[#allocation5 + $0x18] sm:$0xff] }
 0x3c0   : > { %4778 = vmatprep.mubr.bf16.mxu0 %v4609_v53 }
 0x3c1   : > { %4779 = vmatmul.mubr.bf16.gmra.mrb[20].mxu0 %v4608_v54 }
 0x468   : > { %v5807_v1 = vpop.f32.mrb[16].mxu0 }
 0x469   : > { %v5808_v2 = vpop.f32.mrb[17].mxu0 }
 0x46a   : > { %v5809_v3 = vadd.f32 %v5808_v2, %v5807_v1  ;;  %v5810_v5 = vpop.f32.mrb[18].mxu0 }
 0x46b   : > { %v5811_v6 = vpop.f32.mrb[19].mxu0 }
 0x46c   : > { %4787 = vst [vmem:[#allocation6] sm:$0xff] %v5809_v3  ;;  %v5812_v7 = vadd.f32 %v5811_v6, %v5810_v5 }
 0x46e   : > { %4788 = vst [vmem:[#allocation6 + $0x8] sm:$0xff] %v5812_v7 }
 0x473   : > { %v4792_v9 = vld [vmem:[#allocation6] sm:$0xf]  ;;  %v4808_v15 = vld [vmem:[#allocation6 + $0x4] sm:$0xf] }
 0x474   : > { %vm4795_vm8 = vcmp.ge.f32.partialorder %v4792_v9, 1.25  ;;  %v4807_v13 = vmul.f32 0.75, %v4792_v9 }
 0x475   : > { %v5721_v10 = vsel %vm4795_vm8, 1.0, %v6162_v11  ;;  %v4820_v23 = vld [vmem:[#allocation6 + $0x8] sm:$0xf]  ;;  %v4837_v36 = vld [vmem:[#allocation6 + $0xc] sm:$0xf] }
 0x476   : > { %v5787_v12 = vpack.c.bf16 %v5721_v10, %v5721_v10  ;;  %v4805_v4 = vsub.f32 1.0, %v5721_v10  ;;  %v4809_v16 = vadd.f32 %v4808_v15, %v4807_v13 }
 0x478   : > { %v4806_v8 = vmul.f32 %v4805_v4, %v4792_v9  ;;  %v4802_v14 = vrot.slane %v5787_v12, 6  ;;  %v4819_v34 = vmul.f32 0.75, %v4809_v16 }
 0x47a   : > { %v4810_v17 = vmul.f32 0.97, %v4806_v8  ;;  %4804 = vst [vmem:[#allocation7] sm:$0xc] %v4802_v14  ;;  %v4821_v24 = vadd.f32 %v4820_v23, %v4819_v34 }
 0x47c   : > { %v4811_v19 = vadd.f32 %v4810_v17, %v4809_v16  ;;  %v4836_v30 = vmul.f32 0.75, %v4821_v24 }
 0x47e   : > { %vm4812_vm9 = vcmp.ge.f32.partialorder %v4811_v19, 1.25  ;;  %v4838_v37 = vadd.f32 %v4837_v36, %v4836_v30 }
 0x47f   : > { %v5723_v20 = vsel %vm4812_vm9, 1.0, %v6162_v11 }
 0x480   : > { %v4817_v25 = vsub.f32 1.0, %v5723_v20  ;;  %v4815_v21 = vpack.c.bf16 %v5723_v20, %v5723_v20  ;;  %v4848_v48 = vmul.f32 0.75, %v4838_v37 }
 0x482   : > { %v4818_v22 = vmul.f32 %v4817_v25, %v4811_v19  ;;  %4816 = vst [vmem:[#allocation7 + $0x4] sm:$0x3] %v4815_v21 }
 0x484   : > { %v4822_v26 = vmul.f32 0.97, %v4818_v22 }
 0x486   : > { %v4823_v27 = vadd.f32 %v4822_v26, %v4821_v24 }
 0x488   : > { %vm4824_vm10 = vcmp.ge.f32.partialorder %v4823_v27, 1.25 }
 0x489   : > { %v5724_v28 = vsel %vm4824_vm10, 1.0, %v6162_v11 }
 0x48a   : > { %v4834_v29 = vsub.f32 1.0, %v5724_v28  ;;  %v5788_v31 = vpack.c.bf16 %v5724_v28, %v5724_v28 }
 0x48c   : > { %v4835_v32 = vmul.f32 %v4834_v29, %v4823_v27  ;;  %v4831_v35 = vrot.slane %v5788_v31, 6 }
 0x48e   : > { %v4839_v38 = vmul.f32 0.97, %v4835_v32  ;;  %4833 = vst [vmem:[#allocation7 + $0x4] sm:$0xc] %v4831_v35 }
 0x490   : > { %v4840_v57 = vadd.f32 %v4839_v38, %v4838_v37 }
 0x492   : > { %vm4841_vm11 = vcmp.ge.f32.partialorder %v4840_v57, 1.25 }
 0x493   : > { %v5726_v33 = vsel %vm4841_vm11, 1.0, %v6162_v11 }
 0x494   : > { %v4844_v0 = vpack.c.bf16 %v5726_v33, %v5726_v33  ;;  %v5813_v39 = vpop.f32.mrb[20].mxu0  ;;  %v4846_v45 = vsub.f32 1.0, %v5726_v33 }
 0x495   : > { %v5814_v40 = vpop.f32.mrb[21].mxu0  ;;  %v6135_v41 = vld [vmem:[#allocation7] sm:$0xff]  }
 0x496   : > { %4845 = vst [vmem:[#allocation7 + $0x8] sm:$0x3] %v4844_v0  ;;  %v5815_v42 = vadd.f32 %v5814_v40, %v5813_v39  ;;  %v5816_v43 = vpop.f32.mrb[22].mxu0  ;;  %5845 = vmatprep.mubr.bf16.mxu1 %v6135_v41  ;;  %v4847_v47 = vmul.f32 %v4846_v45, %v4840_v57 }
 0x497   : > { %v5817_v44 = vpop.f32.mrb[23].mxu0 }
 0x498   : > { %4789 = vst [vmem:[#allocation6 + $0x10] sm:$0xff] %v5815_v42  ;;  %v5818_v46 = vadd.f32 %v5817_v44, %v5816_v43  ;;  %v4851_v50 = vmul.f32 0.97, %v4847_v47 }
 0x49a   : > { %4790 = vst [vmem:[#allocation6 + $0x18] sm:$0xff] %v5818_v46 }
 0x49f   : > { %v4849_v18 = vld [vmem:[#allocation6 + $0x10] sm:$0xf]  ;;  %v4866_v59 = vld [vmem:[#allocation6 + $0x14] sm:$0xf] }
 0x4a0   : > { %v4850_v49 = vadd.f32 %v4849_v18, %v4848_v48 }
 0x4a1   : > { %v4878_v6 = vld [vmem:[#allocation6 + $0x18] sm:$0xf] }
 0x4a2   : > { %v4852_v51 = vadd.f32 %v4851_v50, %v4850_v49  ;;  %v4865_v55 = vmul.f32 0.75, %v4850_v49 }
 0x4a4   : > { %vm4853_vm12 = vcmp.ge.f32.partialorder %v4852_v51, 1.25  ;;  %v4867_v60 = vadd.f32 %v4866_v59, %v4865_v55 }
 0x4a5   : > { %v5727_v52 = vsel %vm4853_vm12, 1.0, %v6162_v11 }
 0x4a6   : > { %v5789_v53 = vpack.c.bf16 %v5727_v52, %v5727_v52  ;;  %v4863_v54 = vsub.f32 1.0, %v5727_v52  ;;  %v4877_v3 = vmul.f32 0.75, %v4867_v60 }
 0x4a8   : > { %v4860_v56 = vrot.slane %v5789_v53, 6  ;;  %v4864_v58 = vmul.f32 %v4863_v54, %v4852_v51  ;;  %v4879_v7 = vadd.f32 %v4878_v6, %v4877_v3 }
 0x4aa   : > { %4862 = vst [vmem:[#allocation7 + $0x8] sm:$0xc] %v4860_v56  ;;  %v4868_v61 = vmul.f32 0.97, %v4864_v58 }
 0x4ac   : > { %v4869_v62 = vadd.f32 %v4868_v61, %v4867_v60 }
 0x4ae   : > { %vm4870_vm13 = vcmp.ge.f32.partialorder %v4869_v62, 1.25 }
 0x4af   : > { %v5729_v63 = vsel %vm4870_vm13, 1.0, %v6162_v11 }
 0x4b0   : > { %v4873_v1 = vpack.c.bf16 %v5729_v63, %v5729_v63  ;;  %v4875_v2 = vsub.f32 1.0, %v5729_v63 }
 0x4b2   : > { %4874 = vst [vmem:[#allocation7 + $0xc] sm:$0x3] %v4873_v1  ;;  %v4876_v5 = vmul.f32 %v4875_v2, %v4869_v62 }
 0x4b4   : > { %v4880_v9 = vmul.f32 0.97, %v4876_v5 }
 0x4b6   : > { %v4881_v10 = vadd.f32 %v4880_v9, %v4879_v7 }
 0x4b8   : > { %vm4882_vm14 = vcmp.ge.f32.partialorder %v4881_v10, 1.25 }
 0x4b9   : > { %v5730_v12 = vsel %vm4882_vm14, 1.0, %v6162_v11 }
 0x4ba   : > { %v5790_v4 = vpack.c.bf16 %v5730_v12, %v5730_v12 }
 0x4bc   : > { %v4889_v13 = vrot.slane %v5790_v4, 6 }
 0x4be   : > { %4891 = vst [vmem:[#allocation7 + $0xc] sm:$0xc] %v4889_v13 }
 0x4c5   : > { %v6144_v8 = vld [vmem:[#allocation7 + $0x8] sm:$0xff]  }
 0x4c6   : > { %5846 = vmatmul.mubr.bf16.vlgmr.msra.gmra.mrb[24].mxu1 %v6144_v8 }
 0x599   : > { %v5847_v14 = vpop.f32.mrb[24].mxu1 }
 0x59a   : > { %5035 = vst [vmem:[#allocation8 + $0x10] sm:$0xff] %v5847_v14  ;;  %v5018_v15 = vpop.f32.mrb[25].mxu1 }
 0x59b   : > { %5033 = vst [vmem:[#allocation8] sm:$0xff] %v5018_v15  ;;  %v5848_v16 = vpop.f32.mrb[26].mxu1 }
 0x59c   : > { %5036 = vst [vmem:[#allocation8 + $0x18] sm:$0xff] %v5848_v16  ;;  %v5021_v17 = vpop.f32.mrb[27].mxu1 }
 0x59d   : > { %5034 = vst [vmem:[#allocation8 + $0x8] sm:$0xff] %v5021_v17 }
 0x5a1   : > { %v5080_v46 = vld [vmem:[#allocation8 + $0x10] sm:$0xf]  ;;  %v5091_v53 = vld [vmem:[#allocation8 + $0x14] sm:$0xf] }
 0x5a2   : > { %v5037_v19 = vld [vmem:[#allocation8] sm:$0xf]  ;;  %v5047_v22 = vld [vmem:[#allocation8 + $0x4] sm:$0xf] }
 0x5a3   : > { %vm5040_vm15 = vcmp.ge.f32.partialorder %v5037_v19, 1.25  ;;  %v5046_v34 = vmul.f32 0.75, %v5037_v19  ;;  %v5102_v62 = vld [vmem:[#allocation8 + $0x18] sm:$0xf]  ;;  %v5113_v9 = vld [vmem:[#allocation8 + $0x1c] sm:$0xf] }
 0x5a4   : > { %v5743_v20 = vsel %vm5040_vm15, 1.0, %v6162_v11  ;;  %v5058_v31 = vld [vmem:[#allocation8 + $0x8] sm:$0xf]  ;;  %v5069_v0 = vld [vmem:[#allocation8 + $0xc] sm:$0xf] }
 0x5a5   : > { %5043 = vst [vmem:[%s7611_s16] sm:$0xf] %v5743_v20  ;;  %v5044_v25 = vsub.f32 1.0, %v5743_v20  ;;  %v5048_v23 = vadd.f32 %v5047_v22, %v5046_v34 }
 0x5a7   : > { %v5045_v21 = vmul.f32 %v5044_v25, %v5037_v19  ;;  %v5057_v29 = vmul.f32 0.75, %v5048_v23 }
 0x5a9   : > { %v5049_v24 = vmul.f32 0.97, %v5045_v21  ;;  %v5059_v32 = vadd.f32 %v5058_v31, %v5057_v29 }
 0x5ab   : > { %v5050_v26 = vadd.f32 %v5049_v24, %v5048_v23  ;;  %v5068_v57 = vmul.f32 0.75, %v5059_v32 }
 0x5ad   : > { %vm5051_vm0 = vcmp.ge.f32.partialorder %v5050_v26, 1.25  ;;  %v5070_v39 = vadd.f32 %v5069_v0, %v5068_v57 }
 0x5ae   : > { %v5744_v27 = vsel %vm5051_vm0, 1.0, %v6162_v11 }
 0x5af   : > { %5054 = vst [vmem:[%s7611_s16 + $0x4] sm:$0xf] %v5744_v27  ;;  %v5055_v28 = vsub.f32 1.0, %v5744_v27  ;;  %v5079_v44 = vmul.f32 0.75, %v5070_v39 }
 0x5b1   : > { %v5056_v30 = vmul.f32 %v5055_v28, %v5050_v26  ;;  %v5081_v47 = vadd.f32 %v5080_v46, %v5079_v44 }
 0x5b3   : > { %v5060_v35 = vmul.f32 0.97, %v5056_v30  ;;  %v5090_v51 = vmul.f32 0.75, %v5081_v47 }
 0x5b5   : > { %v5061_v36 = vadd.f32 %v5060_v35, %v5059_v32  ;;  %v5092_v54 = vadd.f32 %v5091_v53, %v5090_v51 }
 0x5b7   : > { %vm5062_vm1 = vcmp.ge.f32.partialorder %v5061_v36, 1.25  ;;  %v5101_v60 = vmul.f32 0.75, %v5092_v54 }
 0x5b8   : > { %v5745_v37 = vsel %vm5062_vm1, 1.0, %v6162_v11 }
 0x5b9   : > { %5065 = vst [vmem:[%s7611_s16 + $0x8] sm:$0xf] %v5745_v37  ;;  %v5066_v38 = vsub.f32 1.0, %v5745_v37  ;;  %v5103_v63 = vadd.f32 %v5102_v62, %v5101_v60 }
 0x5bb   : > { %v5067_v33 = vmul.f32 %v5066_v38, %v5061_v36  ;;  %v5112_v6 = vmul.f32 0.75, %v5103_v63 }
 0x5bd   : > { %v5071_v40 = vmul.f32 0.97, %v5067_v33  ;;  %v5114_v10 = vadd.f32 %v5113_v9, %v5112_v6 }
 0x5bf   : > { %v5072_v41 = vadd.f32 %v5071_v40, %v5070_v39 }
 0x5c1   : > { %vm5073_vm2 = vcmp.ge.f32.partialorder %v5072_v41, 1.25 }
 0x5c2   : > { %v5746_v42 = vsel %vm5073_vm2, 1.0, %v6162_v11 }
 0x5c3   : > { %5076 = vst [vmem:[%s7611_s16 + $0xc] sm:$0xf] %v5746_v42  ;;  %v5077_v43 = vsub.f32 1.0, %v5746_v42 }
 0x5c5   : > { %v5078_v45 = vmul.f32 %v5077_v43, %v5072_v41 }
 0x5c7   : > { %v5082_v48 = vmul.f32 0.97, %v5078_v45 }
 0x5c9   : > { %v5083_v18 = vadd.f32 %v5082_v48, %v5081_v47 }
 0x5cb   : > { %vm5084_vm3 = vcmp.ge.f32.partialorder %v5083_v18, 1.25 }
 0x5cc   : > { %v5747_v49 = vsel %vm5084_vm3, 1.0, %v6162_v11 }
 0x5cd   : > { %5087 = vst [vmem:[%s7611_s16 + $0x10] sm:$0xf] %v5747_v49  ;;  %v5088_v50 = vsub.f32 1.0, %v5747_v49 }
 0x5cf   : > { %v5089_v52 = vmul.f32 %v5088_v50, %v5083_v18 }
 0x5d1   : > { %v5093_v55 = vmul.f32 0.97, %v5089_v52 }
 0x5d3   : > { %v5094_v56 = vadd.f32 %v5093_v55, %v5092_v54 }
 0x5d5   : > { %vm5095_vm4 = vcmp.ge.f32.partialorder %v5094_v56, 1.25 }
 0x5d6   : > { %v5748_v58 = vsel %vm5095_vm4, 1.0, %v6162_v11 }
 0x5d7   : > { %5098 = vst [vmem:[%s7611_s16 + $0x14] sm:$0xf] %v5748_v58  ;;  %v5099_v59 = vsub.f32 1.0, %v5748_v58 }
 0x5d9   : > { %v5100_v61 = vmul.f32 %v5099_v59, %v5094_v56 }
 0x5db   : > { %v5104_v1 = vmul.f32 0.97, %v5100_v61 }
 0x5dd   : > { %v5105_v2 = vadd.f32 %v5104_v1, %v5103_v63 }
 0x5df   : > { %vm5106_vm5 = vcmp.ge.f32.partialorder %v5105_v2, 1.25 }
 0x5e0   : > { %v5749_v3 = vsel %vm5106_vm5, 1.0, %v6162_v11 }
 0x5e1   : > { %5109 = vst [vmem:[%s7611_s16 + $0x18] sm:$0xf] %v5749_v3  ;;  %v5110_v5 = vsub.f32 1.0, %v5749_v3 }
 0x5e3   : > { %v5111_v7 = vmul.f32 %v5110_v5, %v5105_v2 }
 0x5e5   : > { %v5115_v12 = vmul.f32 0.97, %v5111_v7 }
 0x5e7   : > { %v5116_v4 = vadd.f32 %v5115_v12, %v5114_v10 }
 0x5e9   : > { %vm5117_vm6 = vcmp.ge.f32.partialorder %v5116_v4, 1.25 }
 0x5ea   : > { %v5750_v13 = vsel %vm5117_vm6, 1.0, %v6162_v11 }
 0x5eb   : > { %5120 = vst [vmem:[%s7611_s16 + $0x1c] sm:$0xf] %v5750_v13 }
 0x5ec PF: > { %s15_s18 = sadd.s32 1, %s6159_s18  }
 0x5ed   : > { %p12_p4 = scmp.ge.s32.totalorder %s15_s18, 4  }
 0x5ef   :  { %14 = sbr.rel (!%p12_p4) target bundleno = 1 (0x1), region = 70 }

</bundles_post_ra>
